<compile_context>
chip_gen: v5e
topology: v5e:2x2
jax: 0.10.0
libtpu: 0.0.40
codegen_flags: <defaults>
</compile_context>

<pallas_src>
import functools
import math

import jax
import jax.numpy as jnp
from jax import lax
from jax.experimental import pallas as pl
from jax.experimental.pallas import tpu as pltpu

F32 = jnp.float32
BF16 = jnp.bfloat16
TAPS = tuple((dy, dx) for dy in range(3) for dx in range(3))
VMEM_LIMIT = 32 * 1024 * 1024  # safe on v5e/v6e (128 MiB) and v7x (64 MiB)


def _ceil_div(a, b):
    return -(-a // b)


def flat_geom(H, W):
    """Geometry of the flattened padded layout for an HxW image."""
    Wp = _ceil_div(W + 1, 8) * 8          # >= W+1, multiple of 8 (aligned rows)
    F = Wp + 8                            # leading zero rows (>= Wp+1, mult of 8)
    n_rows = H * Wp
    L = n_rows + 2 * Wp + 16              # F + n_rows + (Wp + 8)
    return Wp, F, n_rows, L


def to_flat(x):
    """(N, H, W, C) f32 -> flattened padded (N, L, C)."""
    N, H, W, C = x.shape
    Wp, F, n_rows, L = flat_geom(H, W)
    xw = jnp.pad(x, ((0, 0), (0, 0), (0, Wp - W), (0, 0)))
    xf = xw.reshape(N, n_rows, C)
    return jnp.pad(xf, ((0, 0), (F, L - F - n_rows), (0, 0)))


def from_flat(xf, H, W, C):
    """flattened padded (N, L, C) -> (N, H, W, C)."""
    N = xf.shape[0]
    Wp, F, n_rows, _ = flat_geom(H, W)
    return xf[:, F:F + n_rows, :].reshape(N, H, Wp, C)[:, :, :W, :]


def _apply_act(acc, b, activation):
    acc = acc + b
    if activation == "relu":
        return jnp.maximum(acc, 0.0)
    if activation == "tanh":
        return jnp.tanh(acc)
    return acc


# ---------------------------------------------------------------------------
# Conv kernels
# ---------------------------------------------------------------------------
def _conv3x3_tapsum_kernel(x_ref, w_ref, b_ref, o_ref, *,
                           H, W, Wp, F, n_rows, Cout, activation, chained):
    """Variant A: 9 shifted matmuls (taps as K).  For wide Cout at tiny spatial."""
    acc = jnp.zeros((n_rows, Cout), F32)
    for dy, dx in TAPS:
        off = 7 + dy * Wp + dx
        xs = x_ref[0, pl.ds(off, n_rows), :].astype(BF16)
        acc = acc + jnp.dot(xs, w_ref[dy, dx], preferred_element_type=F32)
    acc = _apply_act(acc, b_ref[...], activation).astype(o_ref.dtype)

    if chained:
        o_ref[0, pl.ds(F, n_rows), :] = acc
        o_ref[0, pl.ds(0, F), :] = jnp.zeros((F, Cout), o_ref.dtype)
        o_ref[0, pl.ds(F + n_rows, Wp + 8), :] = jnp.zeros((Wp + 8, Cout),
                                                           o_ref.dtype)
        zjunk = jnp.zeros((Wp - W, Cout), o_ref.dtype)
        for y in range(H):                       # zero the junk columns
            o_ref[0, pl.ds(F + y * Wp + W, Wp - W), :] = zjunk
    else:
        o_ref[0] = acc


def _conv3x3_foldn_kernel(x_ref, w_ref, b_ref, o_ref, y_ref, *,
                          H, W, Wp, F, n_rows, L, Cout, CM, CH,
                          activation, chained):
    """Variant B: one matmul X @ (Cin, 9*Cout) into VMEM scratch, then a
    chunked shift-add epilogue.  For thin Cout (<=128) layers."""
    n_m = _ceil_div(L, CM)
    n_c = _ceil_div(n_rows, CH)

    def mm_step(s):
        xc = x_ref[0, pl.ds(s, CM), :].astype(BF16)
        y_ref[pl.ds(s, CM), :] = jnp.dot(xc, w_ref[...],
                                         preferred_element_type=F32)

    if n_m <= 12:
        for m in range(n_m):
            mm_step(min(m * CM, L - CM))
    else:
        def mm_body(m, carry):
            s = jnp.minimum(m * CM, L - CM)
            mm_step(pl.multiple_of(s, 8))
            return carry
        lax.fori_loop(0, n_m, mm_body, 0)

    bias = b_ref[...]
    dst_off = F if chained else 0

    def ep_step(s):
        acc = jnp.zeros((CH, Cout), F32)
        for t, (dy, dx) in enumerate(TAPS):
            off = 7 + dy * Wp + dx
            acc = acc + y_ref[pl.ds(s + off, CH), pl.ds(t * Cout, Cout)]
        acc = _apply_act(acc, bias, activation).astype(o_ref.dtype)
        o_ref[0, pl.ds(s + dst_off, CH), :] = acc

    if n_c <= 12:
        for c in range(n_c):
            ep_step(min(c * CH, n_rows - CH))
    else:
        def ep_body(c, carry):
            s = jnp.minimum(c * CH, n_rows - CH)
            ep_step(pl.multiple_of(s, 8))
            return carry
        lax.fori_loop(0, n_c, ep_body, 0)

    if chained:
        o_ref[0, pl.ds(0, F), :] = jnp.zeros((F, Cout), o_ref.dtype)
        o_ref[0, pl.ds(F + n_rows, Wp + 8), :] = jnp.zeros((Wp + 8, Cout),
                                                           o_ref.dtype)
        zjunk = jnp.zeros((Wp - W, Cout), o_ref.dtype)
        for y in range(H):
            o_ref[0, pl.ds(F + y * Wp + W, Wp - W), :] = zjunk


def conv3x3(xf, w, b, *, H, W, activation, out_mode):
    """3x3 'same' conv.
    xf: flattened padded (N, L, Cin) f32.  w: (3, 3, Cin, Cout) bf16.  b: (Cout,) f32.
    out_mode: "flat" (chained layout, same spatial) or "nhwc"."""
    N, L, Cin = xf.shape
    Cout = w.shape[-1]
    Wp, F, n_rows, Lg = flat_geom(H, W)
    assert L == Lg, (L, Lg)
    chained = out_mode == "flat"
    out_len = Lg if chained else n_rows
    b2 = b.reshape(1, Cout).astype(F32)

    if Cout <= 128:                                   # variant B (fold taps in N)
        w2 = jnp.transpose(w, (2, 0, 1, 3)).reshape(Cin, 9 * Cout).astype(BF16)
        CM = min(L, max(8, 8 * max(1, 40 // _ceil_div(9 * Cout, 128))))
        CH = min(n_rows, max(8, 8 * max(1, 32 // _ceil_div(Cout, 128))))
        kernel = functools.partial(
            _conv3x3_foldn_kernel, H=H, W=W, Wp=Wp, F=F, n_rows=n_rows, L=L,
            Cout=Cout, CM=CM, CH=CH, activation=activation, chained=chained)
        in_specs = [
            pl.BlockSpec((1, L, Cin), lambda n: (n, 0, 0)),
            pl.BlockSpec((Cin, 9 * Cout), lambda n: (0, 0)),
            pl.BlockSpec((1, Cout), lambda n: (0, 0)),
        ]
        scratch = [pltpu.VMEM((L, 9 * Cout), F32)]
        args = (xf, w2, b2)
    else:                                             # variant A (taps as K)
        wb = w.astype(BF16)
        kernel = functools.partial(
            _conv3x3_tapsum_kernel, H=H, W=W, Wp=Wp, F=F, n_rows=n_rows,
            Cout=Cout, activation=activation, chained=chained)
        in_specs = [
            pl.BlockSpec((1, L, Cin), lambda n: (n, 0, 0)),
            pl.BlockSpec((3, 3, Cin, Cout), lambda n: (0, 0, 0, 0)),
            pl.BlockSpec((1, Cout), lambda n: (0, 0)),
        ]
        scratch = []
        args = (xf, wb, b2)

    out = pl.pallas_call(
        kernel,
        out_shape=jax.ShapeDtypeStruct((N, out_len, Cout), F32),
        grid=(N,),
        in_specs=in_specs,
        out_specs=pl.BlockSpec((1, out_len, Cout), lambda n: (n, 0, 0)),
        scratch_shapes=scratch,
        compiler_params=pltpu.CompilerParams(
            dimension_semantics=("parallel",),
            vmem_limit_bytes=VMEM_LIMIT),
    )(*args)

    if chained:
        return out
    return out.reshape(N, H, Wp, Cout)[:, :, :W, :]


# ---------------------------------------------------------------------------
# MaxPool2d(2, 2) -> emits the chained layout of the next conv
# ---------------------------------------------------------------------------
def _pool_kernel(x_ref, o_ref, *, Hi, Wo, C, Wp2, F2, L2):
    v = x_ref[0]                                    # (Hi, Wo, 2C) lane-merged W pairs
    wm = jnp.maximum(v[:, :, :C], v[:, :, C:])      # max over W pair
    o_ref[0] = jnp.zeros((L2, C), o_ref.dtype)      # pads + junk columns
    for y in range(Hi // 2):
        row = jnp.maximum(wm[2 * y], wm[2 * y + 1])  # max over H pair -> (Wo, C)
        o_ref[0, pl.ds(F2 + y * Wp2, Wo), :] = row


def maxpool2x2_to_flat(x):
    """x: (N, H, W, C) -> flattened padded (N, L2, C) at spatial (H/2, W/2)."""
    N, H, W, C = x.shape
    assert H % 2 == 0 and W % 2 == 0
    Ho, Wo = H // 2, W // 2
    Wp2, F2, _, L2 = flat_geom(Ho, Wo)
    xm = x.reshape(N, H, Wo, 2 * C)                 # free reshape (W pairs -> lanes)
    kernel = functools.partial(_pool_kernel, Hi=H, Wo=Wo, C=C,
                               Wp2=Wp2, F2=F2, L2=L2)
    return pl.pallas_call(
        kernel,
        out_shape=jax.ShapeDtypeStruct((N, L2, C), x.dtype),
        grid=(N,),
        in_specs=[pl.BlockSpec((1, H, Wo, 2 * C), lambda n: (n, 0, 0, 0))],
        out_specs=pl.BlockSpec((1, L2, C), lambda n: (n, 0, 0)),
        compiler_params=pltpu.CompilerParams(
            dimension_semantics=("parallel",),
            vmem_limit_bytes=VMEM_LIMIT),
    )(xm)


def upsample_nearest(x, size):
    """nn.UpsamplingNearest2d(size=size) on NHWC; exact factors -> cheap repeat."""
    N, H, W, C = x.shape
    oh, ow = size
    if oh % H == 0 and ow % W == 0:
        x = jnp.repeat(x, oh // H, axis=1)
        return jnp.repeat(x, ow // W, axis=2)
    hi = (jnp.arange(oh) * H // oh).astype(jnp.int32)
    wi = (jnp.arange(ow) * W // ow).astype(jnp.int32)
    return x[:, hi][:, :, wi]


# ---------------------------------------------------------------------------
# Model definition (shapes match torchvision VGG16 features[:-1] + decoder)
# ---------------------------------------------------------------------------
ENC_CFG = [64, 64, "M", 128, 128, "M", 256, 256, 256, "M",
           512, 512, 512, "M", 512, 512, 512]          # final MaxPool dropped ([:-1])
DEC_CFG = [(512, 256), (256, 128), (128, 64), (64, 32), (32, 16), (16, 2)]


def init_params(key):
    params = {"enc": [], "dec": []}
    cin = 3
    for v in ENC_CFG:
        if v == "M":
            continue
        key, k1, k2 = jax.random.split(key, 3)
        scale = 1.0 / math.sqrt(cin * 9)
        w = (jax.random.normal(k1, (3, 3, cin, v), F32) * scale).astype(BF16)
        b = jax.random.normal(k2, (v,), F32) * 0.01
        params["enc"].append((w, b))
        cin = v
    for ci, co in DEC_CFG:
        key, k1, k2 = jax.random.split(key, 3)
        scale = 1.0 / math.sqrt(ci * 9)
        w = (jax.random.normal(k1, (3, 3, ci, co), F32) * scale).astype(BF16)
        b = jax.random.normal(k2, (co,), F32) * 0.01
        params["dec"].append((w, b))
    return params


def autoencoder_forward(x_nchw, params):
    x = jnp.transpose(x_nchw, (0, 2, 3, 1)).astype(F32)   # NCHW -> NHWC
    _, H, W, _ = x.shape

    # ---- encoder: VGG16 features[:-1] (13 convs + ReLU, 4 max-pools) ----
    xf = to_flat(x)
    ei = 0
    for idx, v in enumerate(ENC_CFG):
        if v == "M":
            continue
        w, b = params["enc"][ei]
        ei += 1
        next_is_pool = idx + 1 < len(ENC_CFG) and ENC_CFG[idx + 1] == "M"
        mode = "nhwc" if next_is_pool else "flat"
        out = conv3x3(xf, w, b, H=H, W=W, activation="relu", out_mode=mode)
        if next_is_pool:
            xf = maxpool2x2_to_flat(out)
            H, W = H // 2, W // 2
        else:
            xf = out

    # ---- decoder ----
    w, b = params["dec"][0]
    xf = conv3x3(xf, w, b, H=H, W=W, activation="relu", out_mode="flat")    # 512->256
    w, b = params["dec"][1]
    x = conv3x3(xf, w, b, H=H, W=W, activation="relu", out_mode="nhwc")     # 256->128
    x = upsample_nearest(x, (28, 28)); H, W = 28, 28
    xf = to_flat(x)
    w, b = params["dec"][2]
    xf = conv3x3(xf, w, b, H=H, W=W, activation="relu", out_mode="flat")    # 128->64
    w, b = params["dec"][3]
    x = conv3x3(xf, w, b, H=H, W=W, activation="relu", out_mode="nhwc")     # 64->32
    x = upsample_nearest(x, (56, 56)); H, W = 56, 56
    xf = to_flat(x)
    w, b = params["dec"][4]
    x = conv3x3(xf, w, b, H=H, W=W, activation="relu", out_mode="nhwc")     # 32->16
    x = upsample_nearest(x, (112, 112)); H, W = 112, 112
    xf = to_flat(x)
    w, b = params["dec"][5]
    x = conv3x3(xf, w, b, H=H, W=W, activation="tanh", out_mode="nhwc")     # 16->2
    x = upsample_nearest(x, (224, 224))

    return jnp.transpose(x, (0, 3, 1, 2))                                   # NCHW


# ---------------------------------------------------------------------------
# Main
# ---------------------------------------------------------------------------
if __name__ == "__main__":
    key = jax.random.PRNGKey(0)
    pkey, xkey, k1, k2, k3, k4 = jax.random.split(key, 6)

    def conv_ref(x, w, b):
        return lax.conv_general_dilated(
            x, w.astype(F32), (1, 1), "SAME",
            dimension_numbers=("NHWC", "HWIO", "NHWC")) + b

    def rel_err(a, b):
        return float(jnp.max(jnp.abs(a - b)) / (jnp.max(jnp.abs(b)) + 1e-6))

    # sanity: chained variant-B convs (thin Cout) vs XLA conv (bf16 tolerance)
    xs = jax.random.normal(k1, (2, 16, 16, 8), F32)
    w1 = (jax.random.normal(k2, (3, 3, 8, 16), F32) * 0.1).astype(BF16)
    b1 = jnp.zeros((16,), F32)
    w2 = (jax.random.normal(k3, (3, 3, 16, 32), F32) * 0.1).astype(BF16)
    b2 = jnp.zeros((32,), F32)
    flat1 = conv3x3(to_flat(xs), w1, b1, H=16, W=16, activation="relu",
                    out_mode="flat")
    got = conv3x3(flat1, w2, b2, H=16, W=16, activation="none", out_mode="nhwc")
    ref = conv_ref(jnp.maximum(conv_ref(xs, w1, b1), 0.0), w2, b2)
    assert rel_err(got, ref) < 5e-2, "variant-B conv chain mismatch"

    # sanity: chained variant-A convs (wide Cout) vs XLA conv
    xs2 = jax.random.normal(k4, (2, 8, 8, 16), F32)
    w3 = (jax.random.normal(k2, (3, 3, 16, 256), F32) * 0.1).astype(BF16)
    b3 = jnp.zeros((256,), F32)
    w4 = (jax.random.normal(k3, (3, 3, 256, 256), F32) * 0.05).astype(BF16)
    b4 = jnp.zeros((256,), F32)
    flat2 = conv3x3(to_flat(xs2), w3, b3, H=8, W=8, activation="relu",
                    out_mode="flat")
    got2 = conv3x3(flat2, w4, b4, H=8, W=8, activation="none", out_mode="nhwc")
    ref2 = conv_ref(jnp.maximum(conv_ref(xs2, w3, b3), 0.0), w4, b4)
    assert rel_err(got2, ref2) < 5e-2, "variant-A conv chain mismatch"

    # sanity: maxpool kernel vs reference
    xp = jax.random.normal(k1, (2, 8, 8, 64), F32)
    gp = from_flat(maxpool2x2_to_flat(xp), 4, 4, 64)
    rp = jnp.max(xp.reshape(2, 4, 2, 4, 2, 64), axis=(2, 4))
    assert float(jnp.max(jnp.abs(gp - rp))) < 1e-6, "maxpool mismatch"

    params = init_params(pkey)
    # small input consistent with the module (3-channel image); 32x32 keeps the
    # VGG encoder cheap while the decoder's hard-coded upsample sizes still apply.
    x = jax.random.normal(xkey, (2, 3, 32, 32), F32)

    fwd = jax.jit(autoencoder_forward)
    y = jax.block_until_ready(fwd(x, params))
    assert y.shape == (2, 2, 224, 224), y.shape
    assert bool(jnp.all(jnp.isfinite(y)))
    print("KERNEL_OK")
</pallas_src>

<mosaic_0001>
module attributes {stable_mosaic.version = 11 : i64} {
  func.func @_conv3x3_foldn_kernel(%arg0: i32, %arg1: memref<1x448x8xf32, #tpu.memory_space<vmem>>, %arg2: memref<8x144xbf16, #tpu.memory_space<vmem>>, %arg3: memref<1x16xf32, #tpu.memory_space<vmem>>, %arg4: memref<1x448x16xf32, #tpu.memory_space<vmem>>, %arg5: memref<448x144xf32, #tpu.memory_space<vmem>>) attributes {dimension_semantics = [#tpu.dimension_semantics<parallel>], iteration_bounds = array<i64: 2>, scalar_prefetch = 0 : i64, scratch_operands = 1 : i64, tpu.core_type = #tpu.core_type<tc>, window_params = [{transform_indices = @transform_0, window_bounds = array<i64: 1, 448, 8>}, {pipeline_mode = #tpu.pipeline_mode<synchronous>, transform_indices = @transform_1, window_bounds = array<i64: 8, 144>}, {pipeline_mode = #tpu.pipeline_mode<synchronous>, transform_indices = @transform_2, window_bounds = array<i64: 1, 16>}, {transform_indices = @transform_3, window_bounds = array<i64: 1, 448, 16>}]} {
    %c0 = arith.constant 0 : index
    %c0_0 = arith.constant 0 : index
    %c0_1 = arith.constant 0 : index
    %0 = vector.load %arg1[%c0, %c0_0, %c0_1] : memref<1x448x8xf32, #tpu.memory_space<vmem>>, vector<1x160x8xf32>
    %1 = vector.shape_cast %0 : vector<1x160x8xf32> to vector<160x8xf32>
    %2 = arith.truncf %1 : vector<160x8xf32> to vector<160x8xbf16>
    %c0_2 = arith.constant 0 : index
    %c0_3 = arith.constant 0 : index
    %3 = vector.load %arg2[%c0_2, %c0_3] : memref<8x144xbf16, #tpu.memory_space<vmem>>, vector<8x144xbf16>
    %cst = arith.constant dense<0.000000e+00> : vector<160x144xf32>
    %4 = tpu.matmul %2, %3, %cst {dimension_numbers = #tpu.dot_dimension_numbers<[1], [0], [0], [1], [0, 0, 1, 1], [], []>} : vector<160x8xbf16>, vector<8x144xbf16>, vector<160x144xf32> -> vector<160x144xf32>
    %c0_4 = arith.constant 0 : index
    %c0_5 = arith.constant 0 : index
    %5 = vector.load %arg5[%c0_4, %c0_5] : memref<448x144xf32, #tpu.memory_space<vmem>>, vector<160x144xf32>
    tpu.vector_store %arg5[%c0_4, %c0_5], %4 {strides = array<i32>} : memref<448x144xf32, #tpu.memory_space<vmem>>, vector<160x144xf32>,
    %c0_6 = arith.constant 0 : index
    %c160 = arith.constant 160 : index
    %c0_7 = arith.constant 0 : index
    %6 = vector.load %arg1[%c0_6, %c160, %c0_7] : memref<1x448x8xf32, #tpu.memory_space<vmem>>, vector<1x160x8xf32>
    %7 = vector.shape_cast %6 : vector<1x160x8xf32> to vector<160x8xf32>
    %8 = arith.truncf %7 : vector<160x8xf32> to vector<160x8xbf16>
    %c0_8 = arith.constant 0 : index
    %c0_9 = arith.constant 0 : index
    %9 = vector.load %arg2[%c0_8, %c0_9] : memref<8x144xbf16, #tpu.memory_space<vmem>>, vector<8x144xbf16>
    %cst_10 = arith.constant dense<0.000000e+00> : vector<160x144xf32>
    %10 = tpu.matmul %8, %9, %cst_10 {dimension_numbers = #tpu.dot_dimension_numbers<[1], [0], [0], [1], [0, 0, 1, 1], [], []>} : vector<160x8xbf16>, vector<8x144xbf16>, vector<160x144xf32> -> vector<160x144xf32>
    %c160_11 = arith.constant 160 : index
    %c0_12 = arith.constant 0 : index
    %11 = vector.load %arg5[%c160_11, %c0_12] : memref<448x144xf32, #tpu.memory_space<vmem>>, vector<160x144xf32>
    tpu.vector_store %arg5[%c160_11, %c0_12], %10 {strides = array<i32>} : memref<448x144xf32, #tpu.memory_space<vmem>>, vector<160x144xf32>,
    %c0_13 = arith.constant 0 : index
    %c288 = arith.constant 288 : index
    %c0_14 = arith.constant 0 : index
    %12 = vector.load %arg1[%c0_13, %c288, %c0_14] : memref<1x448x8xf32, #tpu.memory_space<vmem>>, vector<1x160x8xf32>
    %13 = vector.shape_cast %12 : vector<1x160x8xf32> to vector<160x8xf32>
    %14 = arith.truncf %13 : vector<160x8xf32> to vector<160x8xbf16>
    %c0_15 = arith.constant 0 : index
    %c0_16 = arith.constant 0 : index
    %15 = vector.load %arg2[%c0_15, %c0_16] : memref<8x144xbf16, #tpu.memory_space<vmem>>, vector<8x144xbf16>
    %cst_17 = arith.constant dense<0.000000e+00> : vector<160x144xf32>
    %16 = tpu.matmul %14, %15, %cst_17 {dimension_numbers = #tpu.dot_dimension_numbers<[1], [0], [0], [1], [0, 0, 1, 1], [], []>} : vector<160x8xbf16>, vector<8x144xbf16>, vector<160x144xf32> -> vector<160x144xf32>
    %c288_18 = arith.constant 288 : index
    %c0_19 = arith.constant 0 : index
    %17 = vector.load %arg5[%c288_18, %c0_19] : memref<448x144xf32, #tpu.memory_space<vmem>>, vector<160x144xf32>
    tpu.vector_store %arg5[%c288_18, %c0_19], %16 {strides = array<i32>} : memref<448x144xf32, #tpu.memory_space<vmem>>, vector<160x144xf32>,
    %c0_20 = arith.constant 0 : index
    %c0_21 = arith.constant 0 : index
    %18 = vector.load %arg3[%c0_20, %c0_21] : memref<1x16xf32, #tpu.memory_space<vmem>>, vector<1x16xf32>
    %cst_22 = arith.constant 0.000000e+00 : f32
    %19 = vector.broadcast %cst_22 : f32 to vector<256x16xf32>
    %c7 = arith.constant 7 : index
    %c0_23 = arith.constant 0 : index
    %20 = vector.load %arg5[%c7, %c0_23] : memref<448x144xf32, #tpu.memory_space<vmem>>, vector<256x16xf32>
    %21 = arith.addf %19, %20 : vector<256x16xf32>
    %c8 = arith.constant 8 : index
    %c16 = arith.constant 16 : index
    %22 = vector.load %arg5[%c8, %c16] : memref<448x144xf32, #tpu.memory_space<vmem>>, vector<256x16xf32>
    %23 = arith.addf %21, %22 : vector<256x16xf32>
    %c9 = arith.constant 9 : index
    %c32 = arith.constant 32 : index
    %24 = vector.load %arg5[%c9, %c32] : memref<448x144xf32, #tpu.memory_space<vmem>>, vector<256x16xf32>
    %25 = arith.addf %23, %24 : vector<256x16xf32>
    %c31 = arith.constant 31 : index
    %c48 = arith.constant 48 : index
    %26 = vector.load %arg5[%c31, %c48] : memref<448x144xf32, #tpu.memory_space<vmem>>, vector<256x16xf32>
    %27 = arith.addf %25, %26 : vector<256x16xf32>
    %c32_24 = arith.constant 32 : index
    %c64 = arith.constant 64 : index
    %28 = vector.load %arg5[%c32_24, %c64] : memref<448x144xf32, #tpu.memory_space<vmem>>, vector<256x16xf32>
    %29 = arith.addf %27, %28 : vector<256x16xf32>
    %c33 = arith.constant 33 : index
    %c80 = arith.constant 80 : index
    %30 = vector.load %arg5[%c33, %c80] : memref<448x144xf32, #tpu.memory_space<vmem>>, vector<256x16xf32>
    %31 = arith.addf %29, %30 : vector<256x16xf32>
    %c55 = arith.constant 55 : index
    %c96 = arith.constant 96 : index
    %32 = vector.load %arg5[%c55, %c96] : memref<448x144xf32, #tpu.memory_space<vmem>>, vector<256x16xf32>
    %33 = arith.addf %31, %32 : vector<256x16xf32>
    %c56 = arith.constant 56 : index
    %c112 = arith.constant 112 : index
    %34 = vector.load %arg5[%c56, %c112] : memref<448x144xf32, #tpu.memory_space<vmem>>, vector<256x16xf32>
    %35 = arith.addf %33, %34 : vector<256x16xf32>
    %c57 = arith.constant 57 : index
    %c128 = arith.constant 128 : index
    %36 = vector.load %arg5[%c57, %c128] : memref<448x144xf32, #tpu.memory_space<vmem>>, vector<256x16xf32>
    %37 = arith.addf %35, %36 : vector<256x16xf32>
    %38 = vector.broadcast %18 : vector<1x16xf32> to vector<256x16xf32>
    %39 = arith.addf %37, %38 : vector<256x16xf32>
    %cst_25 = arith.constant 0.000000e+00 : f32
    %40 = vector.broadcast %cst_25 : f32 to vector<256x16xf32>
    %41 = arith.maximumf %39, %40 : vector<256x16xf32>
    %c0_26 = arith.constant 0 : index
    %c32_27 = arith.constant 32 : index
    %c0_28 = arith.constant 0 : index
    %42 = vector.load %arg4[%c0_26, %c32_27, %c0_28] : memref<1x448x16xf32, #tpu.memory_space<vmem>>, vector<1x256x16xf32>
    %43 = vector.shape_cast %42 : vector<1x256x16xf32> to vector<256x16xf32>
    %44 = vector.shape_cast %41 : vector<256x16xf32> to vector<1x256x16xf32>
    tpu.vector_store %arg4[%c0_26, %c32_27, %c0_28], %44 {strides = array<i32>} : memref<1x448x16xf32, #tpu.memory_space<vmem>>, vector<1x256x16xf32>,
    %cst_29 = arith.constant 0.000000e+00 : f32
    %45 = vector.broadcast %cst_29 : f32 to vector<256x16xf32>
    %c135 = arith.constant 135 : index
    %c0_30 = arith.constant 0 : index
    %46 = vector.load %arg5[%c135, %c0_30] : memref<448x144xf32, #tpu.memory_space<vmem>>, vector<256x16xf32>
    %47 = arith.addf %45, %46 : vector<256x16xf32>
    %c136 = arith.constant 136 : index
    %c16_31 = arith.constant 16 : index
    %48 = vector.load %arg5[%c136, %c16_31] : memref<448x144xf32, #tpu.memory_space<vmem>>, vector<256x16xf32>
    %49 = arith.addf %47, %48 : vector<256x16xf32>
    %c137 = arith.constant 137 : index
    %c32_32 = arith.constant 32 : index
    %50 = vector.load %arg5[%c137, %c32_32] : memref<448x144xf32, #tpu.memory_space<vmem>>, vector<256x16xf32>
    %51 = arith.addf %49, %50 : vector<256x16xf32>
    %c159 = arith.constant 159 : index
    %c48_33 = arith.constant 48 : index
    %52 = vector.load %arg5[%c159, %c48_33] : memref<448x144xf32, #tpu.memory_space<vmem>>, vector<256x16xf32>
    %53 = arith.addf %51, %52 : vector<256x16xf32>
    %c160_34 = arith.constant 160 : index
    %c64_35 = arith.constant 64 : index
    %54 = vector.load %arg5[%c160_34, %c64_35] : memref<448x144xf32, #tpu.memory_space<vmem>>, vector<256x16xf32>
    %55 = arith.addf %53, %54 : vector<256x16xf32>
    %c161 = arith.constant 161 : index
    %c80_36 = arith.constant 80 : index
    %56 = vector.load %arg5[%c161, %c80_36] : memref<448x144xf32, #tpu.memory_space<vmem>>, vector<256x16xf32>
    %57 = arith.addf %55, %56 : vector<256x16xf32>
    %c183 = arith.constant 183 : index
    %c96_37 = arith.constant 96 : index
    %58 = vector.load %arg5[%c183, %c96_37] : memref<448x144xf32, #tpu.memory_space<vmem>>, vector<256x16xf32>
    %59 = arith.addf %57, %58 : vector<256x16xf32>
    %c184 = arith.constant 184 : index
    %c112_38 = arith.constant 112 : index
    %60 = vector.load %arg5[%c184, %c112_38] : memref<448x144xf32, #tpu.memory_space<vmem>>, vector<256x16xf32>
    %61 = arith.addf %59, %60 : vector<256x16xf32>
    %c185 = arith.constant 185 : index
    %c128_39 = arith.constant 128 : index
    %62 = vector.load %arg5[%c185, %c128_39] : memref<448x144xf32, #tpu.memory_space<vmem>>, vector<256x16xf32>
    %63 = arith.addf %61, %62 : vector<256x16xf32>
    %64 = vector.broadcast %18 : vector<1x16xf32> to vector<256x16xf32>
    %65 = arith.addf %63, %64 : vector<256x16xf32>
    %cst_40 = arith.constant 0.000000e+00 : f32
    %66 = vector.broadcast %cst_40 : f32 to vector<256x16xf32>
    %67 = arith.maximumf %65, %66 : vector<256x16xf32>
    %c0_41 = arith.constant 0 : index
    %c160_42 = arith.constant 160 : index
    %c0_43 = arith.constant 0 : index
    %68 = vector.load %arg4[%c0_41, %c160_42, %c0_43] : memref<1x448x16xf32, #tpu.memory_space<vmem>>, vector<1x256x16xf32>
    %69 = vector.shape_cast %68 : vector<1x256x16xf32> to vector<256x16xf32>
    %70 = vector.shape_cast %67 : vector<256x16xf32> to vector<1x256x16xf32>
    tpu.vector_store %arg4[%c0_41, %c160_42, %c0_43], %70 {strides = array<i32>} : memref<1x448x16xf32, #tpu.memory_space<vmem>>, vector<1x256x16xf32>,
    %cst_44 = arith.constant 0.000000e+00 : f32
    %71 = vector.broadcast %cst_44 : f32 to vector<32x16xf32>
    %c0_45 = arith.constant 0 : index
    %c0_46 = arith.constant 0 : index
    %c0_47 = arith.constant 0 : index
    %72 = vector.load %arg4[%c0_45, %c0_46, %c0_47] : memref<1x448x16xf32, #tpu.memory_space<vmem>>, vector<1x32x16xf32>
    %73 = vector.shape_cast %72 : vector<1x32x16xf32> to vector<32x16xf32>
    %74 = vector.shape_cast %71 : vector<32x16xf32> to vector<1x32x16xf32>
    tpu.vector_store %arg4[%c0_45, %c0_46, %c0_47], %74 {strides = array<i32>} : memref<1x448x16xf32, #tpu.memory_space<vmem>>, vector<1x32x16xf32>,
    %cst_48 = arith.constant 0.000000e+00 : f32
    %75 = vector.broadcast %cst_48 : f32 to vector<32x16xf32>
    %c0_49 = arith.constant 0 : index
    %c416 = arith.constant 416 : index
    %c0_50 = arith.constant 0 : index
    %76 = vector.load %arg4[%c0_49, %c416, %c0_50] : memref<1x448x16xf32, #tpu.memory_space<vmem>>, vector<1x32x16xf32>
    %77 = vector.shape_cast %76 : vector<1x32x16xf32> to vector<32x16xf32>
    %78 = vector.shape_cast %75 : vector<32x16xf32> to vector<1x32x16xf32>
    tpu.vector_store %arg4[%c0_49, %c416, %c0_50], %78 {strides = array<i32>} : memref<1x448x16xf32, #tpu.memory_space<vmem>>, vector<1x32x16xf32>,
    %cst_51 = arith.constant 0.000000e+00 : f32
    %79 = vector.broadcast %cst_51 : f32 to vector<8x16xf32>
    %c0_52 = arith.constant 0 : index
    %c48_53 = arith.constant 48 : index
    %c0_54 = arith.constant 0 : index
    %80 = vector.load %arg4[%c0_52, %c48_53, %c0_54] : memref<1x448x16xf32, #tpu.memory_space<vmem>>, vector<1x8x16xf32>
    %81 = vector.shape_cast %80 : vector<1x8x16xf32> to vector<8x16xf32>
    %82 = vector.shape_cast %79 : vector<8x16xf32> to vector<1x8x16xf32>
    tpu.vector_store %arg4[%c0_52, %c48_53, %c0_54], %82 {strides = array<i32>} : memref<1x448x16xf32, #tpu.memory_space<vmem>>, vector<1x8x16xf32>,
    %c0_55 = arith.constant 0 : index
    %c72 = arith.constant 72 : index
    %c0_56 = arith.constant 0 : index
    %83 = vector.load %arg4[%c0_55, %c72, %c0_56] : memref<1x448x16xf32, #tpu.memory_space<vmem>>, vector<1x8x16xf32>
    %84 = vector.shape_cast %83 : vector<1x8x16xf32> to vector<8x16xf32>
    %85 = vector.shape_cast %79 : vector<8x16xf32> to vector<1x8x16xf32>
    tpu.vector_store %arg4[%c0_55, %c72, %c0_56], %85 {strides = array<i32>} : memref<1x448x16xf32, #tpu.memory_space<vmem>>, vector<1x8x16xf32>,
    %c0_57 = arith.constant 0 : index
    %c96_58 = arith.constant 96 : index
    %c0_59 = arith.constant 0 : index
    %86 = vector.load %arg4[%c0_57, %c96_58, %c0_59] : memref<1x448x16xf32, #tpu.memory_space<vmem>>, vector<1x8x16xf32>
    %87 = vector.shape_cast %86 : vector<1x8x16xf32> to vector<8x16xf32>
    %88 = vector.shape_cast %79 : vector<8x16xf32> to vector<1x8x16xf32>
    tpu.vector_store %arg4[%c0_57, %c96_58, %c0_59], %88 {strides = array<i32>} : memref<1x448x16xf32, #tpu.memory_space<vmem>>, vector<1x8x16xf32>,
    %c0_60 = arith.constant 0 : index
    %c120 = arith.constant 120 : index
    %c0_61 = arith.constant 0 : index
    %89 = vector.load %arg4[%c0_60, %c120, %c0_61] : memref<1x448x16xf32, #tpu.memory_space<vmem>>, vector<1x8x16xf32>
    %90 = vector.shape_cast %89 : vector<1x8x16xf32> to vector<8x16xf32>
    %91 = vector.shape_cast %79 : vector<8x16xf32> to vector<1x8x16xf32>
    tpu.vector_store %arg4[%c0_60, %c120, %c0_61], %91 {strides = array<i32>} : memref<1x448x16xf32, #tpu.memory_space<vmem>>, vector<1x8x16xf32>,
    %c0_62 = arith.constant 0 : index
    %c144 = arith.constant 144 : index
    %c0_63 = arith.constant 0 : index
    %92 = vector.load %arg4[%c0_62, %c144, %c0_63] : memref<1x448x16xf32, #tpu.memory_space<vmem>>, vector<1x8x16xf32>
    %93 = vector.shape_cast %92 : vector<1x8x16xf32> to vector<8x16xf32>
    %94 = vector.shape_cast %79 : vector<8x16xf32> to vector<1x8x16xf32>
    tpu.vector_store %arg4[%c0_62, %c144, %c0_63], %94 {strides = array<i32>} : memref<1x448x16xf32, #tpu.memory_space<vmem>>, vector<1x8x16xf32>,
    %c0_64 = arith.constant 0 : index
    %c168 = arith.constant 168 : index
    %c0_65 = arith.constant 0 : index
    %95 = vector.load %arg4[%c0_64, %c168, %c0_65] : memref<1x448x16xf32, #tpu.memory_space<vmem>>, vector<1x8x16xf32>
    %96 = vector.shape_cast %95 : vector<1x8x16xf32> to vector<8x16xf32>
    %97 = vector.shape_cast %79 : vector<8x16xf32> to vector<1x8x16xf32>
    tpu.vector_store %arg4[%c0_64, %c168, %c0_65], %97 {strides = array<i32>} : memref<1x448x16xf32, #tpu.memory_space<vmem>>, vector<1x8x16xf32>,
    %c0_66 = arith.constant 0 : index
    %c192 = arith.constant 192 : index
    %c0_67 = arith.constant 0 : index
    %98 = vector.load %arg4[%c0_66, %c192, %c0_67] : memref<1x448x16xf32, #tpu.memory_space<vmem>>, vector<1x8x16xf32>
    %99 = vector.shape_cast %98 : vector<1x8x16xf32> to vector<8x16xf32>
    %100 = vector.shape_cast %79 : vector<8x16xf32> to vector<1x8x16xf32>
    tpu.vector_store %arg4[%c0_66, %c192, %c0_67], %100 {strides = array<i32>} : memref<1x448x16xf32, #tpu.memory_space<vmem>>, vector<1x8x16xf32>,
    %c0_68 = arith.constant 0 : index
    %c216 = arith.constant 216 : index
    %c0_69 = arith.constant 0 : index
    %101 = vector.load %arg4[%c0_68, %c216, %c0_69] : memref<1x448x16xf32, #tpu.memory_space<vmem>>, vector<1x8x16xf32>
    %102 = vector.shape_cast %101 : vector<1x8x16xf32> to vector<8x16xf32>
    %103 = vector.shape_cast %79 : vector<8x16xf32> to vector<1x8x16xf32>
    tpu.vector_store %arg4[%c0_68, %c216, %c0_69], %103 {strides = array<i32>} : memref<1x448x16xf32, #tpu.memory_space<vmem>>, vector<1x8x16xf32>,
    %c0_70 = arith.constant 0 : index
    %c240 = arith.constant 240 : index
    %c0_71 = arith.constant 0 : index
    %104 = vector.load %arg4[%c0_70, %c240, %c0_71] : memref<1x448x16xf32, #tpu.memory_space<vmem>>, vector<1x8x16xf32>
    %105 = vector.shape_cast %104 : vector<1x8x16xf32> to vector<8x16xf32>
    %106 = vector.shape_cast %79 : vector<8x16xf32> to vector<1x8x16xf32>
    tpu.vector_store %arg4[%c0_70, %c240, %c0_71], %106 {strides = array<i32>} : memref<1x448x16xf32, #tpu.memory_space<vmem>>, vector<1x8x16xf32>,
    %c0_72 = arith.constant 0 : index
    %c264 = arith.constant 264 : index
    %c0_73 = arith.constant 0 : index
    %107 = vector.load %arg4[%c0_72, %c264, %c0_73] : memref<1x448x16xf32, #tpu.memory_space<vmem>>, vector<1x8x16xf32>
    %108 = vector.shape_cast %107 : vector<1x8x16xf32> to vector<8x16xf32>
    %109 = vector.shape_cast %79 : vector<8x16xf32> to vector<1x8x16xf32>
    tpu.vector_store %arg4[%c0_72, %c264, %c0_73], %109 {strides = array<i32>} : memref<1x448x16xf32, #tpu.memory_space<vmem>>, vector<1x8x16xf32>,
    %c0_74 = arith.constant 0 : index
    %c288_75 = arith.constant 288 : index
    %c0_76 = arith.constant 0 : index
    %110 = vector.load %arg4[%c0_74, %c288_75, %c0_76] : memref<1x448x16xf32, #tpu.memory_space<vmem>>, vector<1x8x16xf32>
    %111 = vector.shape_cast %110 : vector<1x8x16xf32> to vector<8x16xf32>
    %112 = vector.shape_cast %79 : vector<8x16xf32> to vector<1x8x16xf32>
    tpu.vector_store %arg4[%c0_74, %c288_75, %c0_76], %112 {strides = array<i32>} : memref<1x448x16xf32, #tpu.memory_space<vmem>>, vector<1x8x16xf32>,
    %c0_77 = arith.constant 0 : index
    %c312 = arith.constant 312 : index
    %c0_78 = arith.constant 0 : index
    %113 = vector.load %arg4[%c0_77, %c312, %c0_78] : memref<1x448x16xf32, #tpu.memory_space<vmem>>, vector<1x8x16xf32>
    %114 = vector.shape_cast %113 : vector<1x8x16xf32> to vector<8x16xf32>
    %115 = vector.shape_cast %79 : vector<8x16xf32> to vector<1x8x16xf32>
    tpu.vector_store %arg4[%c0_77, %c312, %c0_78], %115 {strides = array<i32>} : memref<1x448x16xf32, #tpu.memory_space<vmem>>, vector<1x8x16xf32>,
    %c0_79 = arith.constant 0 : index
    %c336 = arith.constant 336 : index
    %c0_80 = arith.constant 0 : index
    %116 = vector.load %arg4[%c0_79, %c336, %c0_80] : memref<1x448x16xf32, #tpu.memory_space<vmem>>, vector<1x8x16xf32>
    %117 = vector.shape_cast %116 : vector<1x8x16xf32> to vector<8x16xf32>
    %118 = vector.shape_cast %79 : vector<8x16xf32> to vector<1x8x16xf32>
    tpu.vector_store %arg4[%c0_79, %c336, %c0_80], %118 {strides = array<i32>} : memref<1x448x16xf32, #tpu.memory_space<vmem>>, vector<1x8x16xf32>,
    %c0_81 = arith.constant 0 : index
    %c360 = arith.constant 360 : index
    %c0_82 = arith.constant 0 : index
    %119 = vector.load %arg4[%c0_81, %c360, %c0_82] : memref<1x448x16xf32, #tpu.memory_space<vmem>>, vector<1x8x16xf32>
    %120 = vector.shape_cast %119 : vector<1x8x16xf32> to vector<8x16xf32>
    %121 = vector.shape_cast %79 : vector<8x16xf32> to vector<1x8x16xf32>
    tpu.vector_store %arg4[%c0_81, %c360, %c0_82], %121 {strides = array<i32>} : memref<1x448x16xf32, #tpu.memory_space<vmem>>, vector<1x8x16xf32>,
    %c0_83 = arith.constant 0 : index
    %c384 = arith.constant 384 : index
    %c0_84 = arith.constant 0 : index
    %122 = vector.load %arg4[%c0_83, %c384, %c0_84] : memref<1x448x16xf32, #tpu.memory_space<vmem>>, vector<1x8x16xf32>
    %123 = vector.shape_cast %122 : vector<1x8x16xf32> to vector<8x16xf32>
    %124 = vector.shape_cast %79 : vector<8x16xf32> to vector<1x8x16xf32>
    tpu.vector_store %arg4[%c0_83, %c384, %c0_84], %124 {strides = array<i32>} : memref<1x448x16xf32, #tpu.memory_space<vmem>>, vector<1x8x16xf32>,
    %c0_85 = arith.constant 0 : index
    %c408 = arith.constant 408 : index
    %c0_86 = arith.constant 0 : index
    %125 = vector.load %arg4[%c0_85, %c408, %c0_86] : memref<1x448x16xf32, #tpu.memory_space<vmem>>, vector<1x8x16xf32>
    %126 = vector.shape_cast %125 : vector<1x8x16xf32> to vector<8x16xf32>
    %127 = vector.shape_cast %79 : vector<8x16xf32> to vector<1x8x16xf32>
    tpu.vector_store %arg4[%c0_85, %c408, %c0_86], %127 {strides = array<i32>} : memref<1x448x16xf32, #tpu.memory_space<vmem>>, vector<1x8x16xf32>,
    return
  }
  func.func @transform_0(%arg0: i32) -> (i32, i32, i32) {
    %c0_i32 = arith.constant 0 : i32
    %c0_i32_0 = arith.constant 0 : i32
    %c0_i32_1 = arith.constant 0 : i32
    return %arg0, %c0_i32, %c0_i32_0 : i32, i32, i32
  }
  func.func @transform_1(%arg0: i32) -> (i32, i32) {
    %c0_i32 = arith.constant 0 : i32
    %c0_i32_0 = arith.constant 0 : i32
    %c0_i32_1 = arith.constant 0 : i32
    return %c0_i32, %c0_i32_0 : i32, i32
  }
  func.func @transform_2(%arg0: i32) -> (i32, i32) {
    %c0_i32 = arith.constant 0 : i32
    %c0_i32_0 = arith.constant 0 : i32
    %c0_i32_1 = arith.constant 0 : i32
    return %c0_i32, %c0_i32_0 : i32, i32
  }
  func.func @transform_3(%arg0: i32) -> (i32, i32, i32) {
    %c0_i32 = arith.constant 0 : i32
    %c0_i32_0 = arith.constant 0 : i32
    %c0_i32_1 = arith.constant 0 : i32
    return %arg0, %c0_i32, %c0_i32_0 : i32, i32, i32
  }
}

</mosaic_0001>

<bundles_post_ra>
// kernel: tpu_custom_call.1
= control target key start
LH: loop header
LB: loop body
LE: loop exit
PB: predicated region body
PF: predicated region fallthrough
CT: control target
= control target key end

     0   :  { %s4142_s12 = smov 0   ;;  %s8110_s0 = inlined_call_operand.vmem [shape: f32[2,448,8], index: 0, kind: input, shape index: {}]   ;;  %s8111_s1 = inlined_call_operand.vmem [shape: bf16[8,144], index: 1, kind: input, shape index: {}]   ;;  %s8112_s2 = inlined_call_operand.vmem [shape: f32[1,16], index: 2, kind: input, shape index: {}]   ;;  %s8113_s3 = inlined_call_operand.vmem [shape: f32[2,448,16], index: 3, kind: output, shape index: {}]  }
   0x1 LB: > { %s3946_s13 = sadd.s32 4294967295, %s4112_s12   ;;  %p3950_p0 = scmp.ge.s32.totalorder %s4112_s12, 1  ;;  %s4112_s12 = sphi %s4142_s12, %s13_s12  }
   0x2   : > { %p137_p1 = scmp.lt.s32.totalorder %s4112_s12, 3 }
   0x4   : > { %p138_p2 = pnand %p3950_p0, %p137_p1 }
   0x6   : > { %141 = sbr.rel (%p138_p2) target bundleno = 1526 (0x5f6), region = 32 }
   0xb   : > { %v4153_v0 = vld [vmem:[%s8111_s1] sm:$0xff]  ;;  %p161_p3 = scmp.lt.s32.totalorder %s3946_s13, 1  ;;  %vm239_vm0 = vcmask 1043456   ;;  %vm208_vm1 = vcmask 64512   ;;  %s4114_s20 = smov 80   ;;  %vm965_vm2 = vcmask 1046528  }
   0xc   : > { %v204_v1 = vunpack.c.l.b16 %v4153_v0  ;;  %s4115_s21 = smov 112   ;;  %s4116_s22 = smov 96   ;;  %vm1165_vm3 = vcmask 1045504   ;;  %vm365_vm4 = vcmask 130048   ;;  %vm2335_vm5 = vcmask 130055  }
   0xd   : > { %s9109_s13 = smov (!%p161_p3, %s3946_s13), 1  ;;  %s4117_s23 = smov 64   ;;  %vm2368_vm6 = vcmask 129024  }
   0xe   : > { %v206_v2 = vpack.c.b16 %v204_v1, %v204_v1  ;;  %s4017_s16 = smul.u32 448, %s9109_s13  ;;  %s4118_s24 = smov 48  }
   0xf   : > { %s4119_s25 = smov 32   ;;  %s4120_s26 = smov 16  }
  0x10   : > { %v241_v3 = vsel %vm239_vm0, %v206_v2, 0  ;;  %s4165_s19 = scalar_lea.vmem %s8110_s0, %s4017_s16  ;;  %s5856_s4 = scalar_lea.vmem %s8113_s3, %s4017_s16 }
  0x11   : > { %253 = vmatpush.bf16.msra.mxu0 %v241_v3  ;;  %4015 = vmatpush.bf16.msra.mxu2 %v241_v3  ;;  %v172_v4 = vld [vmem:[%s4165_s19] sm:$0xff]  ;;  %v173_v5 = vld [vmem:[%s4165_s19 + $0x8] sm:$0xff]  ;;  %v182_v6 = vld [vmem:[%s4165_s19 + $0x50] sm:$0xff] }
  0x12   : > { %v4170_v7 = vpack.c.bf16 %v173_v5, %v172_v4  ;;  %v183_v8 = vld [vmem:[%s4165_s19 + $0x58] sm:$0xff]  ;;  %v174_v10 = vld [vmem:[%s4165_s19 + $0x10] sm:$0xff]  ;;  %v184_v12 = vld [vmem:[%s4165_s19 + $0x60] sm:$0xff] }
  0x13   : > { %v4173_v9 = vpack.c.bf16 %v183_v8, %v182_v6  ;;  %v175_v11 = vld [vmem:[%s4165_s19 + $0x18] sm:$0xff]  ;;  %v185_v13 = vld [vmem:[%s4165_s19 + $0x68] sm:$0xff]  ;;  %v176_v16 = vld [vmem:[%s4165_s19 + $0x20] sm:$0xff] }
  0x14   : > { %3953 = vmatmul.msk.bf16.vlgmr.msra.gmra.mxu0 %vm208_vm1, %v4170_v7  ;;  %v4183_v14 = vpack.c.bf16 %v175_v11, %v174_v10  ;;  %v4185_v15 = vpack.c.bf16 %v185_v13, %v184_v12  ;;  %v177_v17 = vld [vmem:[%s4165_s19 + $0x28] sm:$0xff]  ;;  %v186_v18 = vld [vmem:[%s4165_s19 + $0x70] sm:$0xff]  ;;  %v187_v19 = vld [vmem:[%s4165_s19 + $0x78] sm:$0xff] }
  0x15   : > { %484 = vmatpush.bf16.msrb.mxu2 %v241_v3  ;;  %714 = vmatpush.bf16.msrb.mxu0 %v241_v3  ;;  %v4195_v20 = vpack.c.bf16 %v177_v17, %v176_v16  ;;  %v4197_v21 = vpack.c.bf16 %v187_v19, %v186_v18  ;;  %v178_v22 = vld [vmem:[%s4165_s19 + $0x30] sm:$0xff]  ;;  %v179_v23 = vld [vmem:[%s4165_s19 + $0x38] sm:$0xff]  ;;  %v188_v24 = vld [vmem:[%s4165_s19 + $0x80] sm:$0xff] }
  0x16   : > { %3958 = vmatmul.msk.bf16.vlgmr.msra.gmra.mxu2 %vm208_vm1, %v4173_v9  ;;  %v189_v25 = vld [vmem:[%s4165_s19 + $0x88] sm:$0xff]  ;;  %v4207_v26 = vpack.c.bf16 %v179_v23, %v178_v22  ;;  %v180_v28 = vld [vmem:[%s4165_s19 + $0x40] sm:$0xff]  ;;  %v190_v30 = vld [vmem:[%s4165_s19 + $0x90] sm:$0xff] }
  0x17   : > { %v4209_v27 = vpack.c.bf16 %v189_v25, %v188_v24  ;;  %v181_v29 = vld [vmem:[%s4165_s19 + $0x48] sm:$0xff]  ;;  %v191_v31 = vld [vmem:[%s4165_s19 + $0x98] sm:$0xff]  ;;  %v405_v34 = vld [vmem:[%s4165_s19 + $0xa0] sm:$0xff] }
  0x18   : > { %v4219_v32 = vpack.c.bf16 %v181_v29, %v180_v28  ;;  %v4221_v33 = vpack.c.bf16 %v191_v31, %v190_v30  ;;  %v406_v35 = vld [vmem:[%s4165_s19 + $0xa8] sm:$0xff]  ;;  %v407_v54 = vld [vmem:[%s4165_s19 + $0xb0] sm:$0xff]  ;;  %v408_v55 = vld [vmem:[%s4165_s19 + $0xb8] sm:$0xff] }
  0x19   : > { %v4229_v36 = vpack.c.bf16 %v406_v35, %v405_v34  ;;  %v4271_v58 = vpack.c.bf16 %v408_v55, %v407_v54  ;;  %v409_v6 = vld [vmem:[%s4165_s19 + $0xc0] sm:$0xff]  ;;  %v410_v8 = vld [vmem:[%s4165_s19 + $0xc8] sm:$0xff]  ;;  %v411_v31 = vld [vmem:[%s4165_s19 + $0xd0] sm:$0xff] }
  0x1a   : > { %v4311_v10 = vpack.c.bf16 %v410_v8, %v409_v6  ;;  %v412_v34 = vld [vmem:[%s4165_s19 + $0xd8] sm:$0xff]  ;;  %v414_v54 = vld [vmem:[%s4165_s19 + $0xe8] sm:$0xff] }
  0x1b   : > { %v4363_v35 = vpack.c.bf16 %v412_v34, %v411_v31 }
  0x24   : > { %3954 = vmatmul.msk.bf16.gmra.mxu0 %vm208_vm1, %v4183_v14 }
  0x26   : > { %3959 = vmatmul.msk.bf16.gmra.mxu2 %vm208_vm1, %v4185_v15 }
  0x34   : > { %3955 = vmatmul.msk.bf16.gmra.mxu0 %vm208_vm1, %v4195_v20 }
  0x36   : > { %3960 = vmatmul.msk.bf16.gmra.mxu2 %vm208_vm1, %v4197_v21 }
  0x44   : > { %3956 = vmatmul.msk.bf16.gmra.mxu0 %vm208_vm1, %v4207_v26 }
  0x46   : > { %3961 = vmatmul.msk.bf16.gmra.mxu2 %vm208_vm1, %v4209_v27 }
  0x54   : > { %3957 = vmatmul.msk.bf16.gmra.mxu0 %vm208_vm1, %v4219_v32 }
  0x56   : > { %3962 = vmatmul.msk.bf16.gmra.mxu2 %vm208_vm1, %v4221_v33 }
  0x66   : > { %3973 = vmatmul.msk.bf16.vlgmr.msrb.gmra.mxu2 %vm208_vm1, %v4229_v36 }
  0x76   : > { %3974 = vmatmul.msk.bf16.gmra.mxu2 %vm208_vm1, %v4271_v58 }
  0x86   : > { %3975 = vmatmul.msk.bf16.gmra.mxu2 %vm208_vm1, %v4311_v10 }
  0x91   : > { %v255_v37 = vpop.f32.mrf.mxu0 }
  0x92   : > { %364 = vst [vmem:[#allocation2] sm:$0xff] %v255_v37 }
  0x96   : > { %3976 = vmatmul.msk.bf16.gmra.mxu2 %vm208_vm1, %v4363_v35 }
  0x99   : > { %v4233_v38 = vpop.f32.mrf.mxu2  ;;  %v257_v39 = vpop.f32.mrf.mxu0 }
  0x9a   : > { %385 = vst [vmem:[#allocation2 + $0xa0] sm:$0xff] %v4233_v38  ;;  %1385 = vrot.lane.b32.xlu1 %v4233_v38, %s4114_s20  ;;  %v966_v40 = vrot.slane %v257_v39, 1  ;;  %v8115_v43 = vrot.slane %v4233_v38, 1  ;;  %v8114_v52 = vrot.slane %v4233_v38, 2 }
  0x9b   : > { %367 = vst [vmem:[#allocation2 + $0x10] sm:$0xff] %v257_v39 }
  0x9c   : > { %1029 = vrot.lane.b32.xlu0 %v966_v40, %s4115_s21 }
  0xa1   : > { %v282_v41 = vpop.f32.mrf.mxu2  ;;  %v4239_v42 = vpop.f32.mrf.mxu0 }
  0xa2   : > { %387 = vst [vmem:[#allocation2 + $0xb0] sm:$0xff] %v282_v41  ;;  %1387 = vrot.lane.b32.xlu2 %v282_v41, %s4114_s20  ;;  %v985_v44 = vrot.slane %v282_v41, 1  ;;  %v1161_v45 = vld [vmem:[#allocation2 + $0x10] sm:$0xfe]  ;;  %v1185_v48 = vrot.slane %v282_v41, 2  ;;  %v967_v50 = vrot.slane %v4239_v42, 1 }
  0xa3   : > { %369 = vst [vmem:[#allocation2 + $0x20] sm:$0xff] %v4239_v42  ;;  %v1166_v46 = vrot.slane %v1161_v45, 2  ;;  %v1167_v1 = vrot.slane %v4239_v42, 2 }
  0xa4   : > { %v4247_v47 = vsel %vm965_vm2, %v8115_v43, %v985_v44  ;;  %v4266_v56 = vsel %vm1165_vm3, %v8114_v52, %v1185_v48  ;;  %v968_v59 = vsel %vm965_vm2, %v966_v40, %v967_v50  ;;  %v420_v52 = vld [vmem:[%s4165_s19 + $0x118] sm:$0xff] }
  0xa5   : > { %8277 = vst [vmem:[#allocation3_spill] sm:$0xff] %v4247_v47  ;;  %1049 = vrot.lane.b32.xlu1 %v4247_v47, %s4115_s21  ;;  %1231 = vrot.lane.b32.xlu0 %v1166_v46, %s4116_s22  ;;  %v1168_v4 = vsel %vm1165_vm3, %v1166_v46, %v1167_v1 }
  0xa9   : > { %v4252_v49 = vpop.f32.mrf.mxu2  ;;  %v4256_v51 = vpop.f32.mrf.mxu0 }
  0xaa   : > { %389 = vst [vmem:[#allocation2 + $0xc0] sm:$0xff] %v4252_v49  ;;  %v987_v53 = vrot.slane %v4252_v49, 1  ;;  %v1187_v60 = vrot.slane %v4252_v49, 2  ;;  %v1169_v11 = vrot.slane %v4256_v51, 2  ;;  %v969_v12 = vrot.slane %v4256_v51, 1 }
  0xab   : > { %371 = vst [vmem:[#allocation2 + $0x30] sm:$0xff] %v4256_v51 }
  0xac   : > { %v4269_v57 = vsel %vm965_vm2, %v985_v44, %v987_v53  ;;  %v4289_v63 = vsel %vm1165_vm3, %v1185_v48, %v1187_v60  ;;  %v1170_v18 = vsel %vm1165_vm3, %v1167_v1, %v1169_v11  ;;  %v970_v19 = vsel %vm965_vm2, %v967_v50, %v969_v12 }
  0xad   : > { %8278 = vst [vmem:[#allocation4_spill] sm:$0xff] %v4269_v57  ;;  %1251 = vrot.lane.b32.xlu1 %v4266_v56, %s4116_s22  ;;  %1051 = vrot.lane.b32.xlu2 %v4269_v57, %s4115_s21 }
  0xae   : > { %1031 = vrot.lane.b32.xlu0 %v968_v59, %s4115_s21 }
  0xb1   : > { %v4282_v61 = vpop.f32.mrf.mxu2  ;;  %v4285_v62 = vpop.f32.mrf.mxu0 }
  0xb2   : > { %391 = vst [vmem:[#allocation2 + $0xd0] sm:$0xff] %v4282_v61  ;;  %v1363_v5 = vld [vmem:[#allocation2 + $0x30] sm:$0x80]  ;;  %v989_v13 = vrot.slane %v4282_v61, 1  ;;  %v1189_v23 = vrot.slane %v4282_v61, 2  ;;  %v971_v37 = vrot.slane %v4285_v62, 1 }
  0xb3   : > { %373 = vst [vmem:[#allocation2 + $0x40] sm:$0xff] %v4285_v62  ;;  %v1171_v48 = vrot.slane %v4285_v62, 2 }
  0xb4   : > { %v4329_v22 = vsel %vm965_vm2, %v987_v53, %v989_v13  ;;  %v4345_v28 = vsel %vm1165_vm3, %v1187_v60, %v1189_v23  ;;  %v972_v42 = vsel %vm965_vm2, %v969_v12, %v971_v37  ;;  %v413_v53 = vld [vmem:[%s4165_s19 + $0xe0] sm:$0xff]  ;;  %v416_v12 = vld [vmem:[%s4165_s19 + $0xf8] sm:$0xff] }
  0xb5   : > { %1525 = vrot.lane.b32.xlu1 %v4247_v47, %s4117_s23  ;;  %1253 = vrot.lane.b32.xlu2 %v4289_v63, %s4116_s22  ;;  %8279 = vst [vmem:[#allocation5_spill] sm:$0xff] %v4329_v22  ;;  %v1172_v51 = vsel %vm1165_vm3, %v1169_v11, %v1171_v48  ;;  %v4397_v55 = vpack.c.bf16 %v414_v54, %v413_v53  ;;  %v415_v11 = vld [vmem:[%s4165_s19 + $0xf0] sm:$0xff] }
  0xb6   : > { %1389 = vrot.lane.b32.xlu0 %v4252_v49, %s4114_s20 }
  0xb7   : > { %3977 = vmatmul.msk.bf16.gmra.mxu2 %vm208_vm1, %v4397_v55 }
  0xb9   : > { %v4298_v2 = vpop.f32.mrf.mxu2  ;;  %v4301_v3 = vpop.f32.mrf.mxu0 }
  0xba   : > { %393 = vst [vmem:[#allocation2 + $0xe0] sm:$0xff] %v4298_v2  ;;  %v973_v39 = vrot.slane %v4301_v3, 1  ;;  %v991_v45 = vrot.slane %v4298_v2, 1  ;;  %v1191_v59 = vrot.slane %v4298_v2, 2  ;;  %v4422_v1 = vrot.slane %v4301_v3, 2 }
  0xbb   : > { %375 = vst [vmem:[#allocation2 + $0x50] sm:$0xff] %v4301_v3 }
  0xbc   : > { %v974_v44 = vsel %vm965_vm2, %v971_v37, %v973_v39  ;;  %v4384_v49 = vsel %vm965_vm2, %v989_v13, %v991_v45  ;;  %v1174_v6 = vsel %vm1165_vm3, %v1171_v48, %v4422_v1 }
  0xbd   : > { %1527 = vrot.lane.b32.xlu2 %v4269_v57, %s4117_s23  ;;  %1233 = vrot.lane.b32.xlu1 %v1168_v4, %s4116_s22  ;;  %8280 = vst [vmem:[#allocation6_spill] sm:$0xff] %v4384_v49 }
  0xbe   : > { %1371 = vrot.lane.b32.xlu0 %v1363_v5, %s4114_s20 }
  0xc1   : > { %v4316_v16 = vpop.f32.mrf.mxu2  ;;  %v4320_v17 = vpop.f32.mrf.mxu0 }
  0xc2   : > { %395 = vst [vmem:[#allocation2 + $0xf0] sm:$0xff] %v4316_v16  ;;  %v993_v46 = vrot.slane %v4316_v16, 1  ;;  %v1193_v60 = vrot.slane %v4316_v16, 2 }
  0xc3   : > { %377 = vst [vmem:[#allocation2 + $0x60] sm:$0xff] %v4320_v17 }
  0xc4   : > { %v4387_v50 = vsel %vm965_vm2, %v991_v45, %v993_v46  ;;  %v417_v45 = vld [vmem:[%s4165_s19 + $0x100] sm:$0xff] }
  0xc5   : > { %1235 = vrot.lane.b32.xlu2 %v1170_v18, %s4116_s22  ;;  %1033 = vrot.lane.b32.xlu1 %v970_v19, %s4115_s21  ;;  %8281 = vst [vmem:[#allocation7_spill] sm:$0xff] %v4387_v50  ;;  %v1175_v18 = vrot.slane %v4320_v17, 2 }
  0xc6   : > { %1053 = vrot.lane.b32.xlu0 %v4329_v22, %s4115_s21 }
  0xc9   : > { %v4334_v24 = vpop.f32.mrf.mxu2  ;;  %v4336_v25 = vpop.f32.mrf.mxu0 }
  0xca   : > { %397 = vst [vmem:[#allocation2 + $0x100] sm:$0xff] %v4334_v24  ;;  %v995_v4 = vrot.slane %v4334_v24, 1  ;;  %v1195_v19 = vrot.slane %v4334_v24, 2 }
  0xcb   : > { %379 = vst [vmem:[#allocation2 + $0x70] sm:$0xff] %v4336_v25 }
  0xcc   : > { %v4457_v31 = vsel %vm1165_vm3, %v1193_v60, %v1195_v19 }
  0xcd   : > { %1393 = vrot.lane.b32.xlu2 %v4298_v2, %s4114_s20  ;;  %1391 = vrot.lane.b32.xlu1 %v4282_v61, %s4114_s20  ;;  %v4404_v61 = vsel %vm1165_vm3, %v1189_v23, %v1191_v59  ;;  %v975_v2 = vrot.slane %v4320_v17, 1  ;;  %v4451_v23 = vsel %vm1165_vm3, %v4422_v1, %v1175_v18 }
  0xce   : > { %1255 = vrot.lane.b32.xlu0 %v4345_v28, %s4116_s22 }
  0xcf   : > { %v976_v8 = vsel %vm965_vm2, %v973_v39, %v975_v2 }
  0xd1   : > { %v4349_v29 = vpop.f32.mrf.mxu2  ;;  %v4351_v30 = vpop.f32.mrf.mxu0 }
  0xd2   : > { %399 = vst [vmem:[#allocation2 + $0x110] sm:$0xff] %v4349_v29 }
  0xd3   : > { %381 = vst [vmem:[#allocation2 + $0x80] sm:$0xff] %v4351_v30 }
  0xd5   : > { %1373 = vrot.lane.b32.xlu1 %v4285_v62, %s4114_s20  ;;  %1375 = vrot.lane.b32.xlu2 %v4301_v3, %s4114_s20  ;;  %v4407_v62 = vsel %vm1165_vm3, %v1191_v59, %v1193_v60  ;;  %v4435_v3 = vsel %vm965_vm2, %v993_v46, %v995_v4  ;;  %v418_v46 = vld [vmem:[%s4165_s19 + $0x108] sm:$0xff]  ;;  %v997_v59 = vrot.slane %v4349_v29, 1  ;;  %v1177_v60 = vrot.slane %v4336_v25, 2 }
  0xd6   : > { %1529 = vrot.lane.b32.xlu0 %v4329_v22, %s4117_s23  ;;  %8283 = vst [vmem:[#allocation9_spill] sm:$0xff] %v4435_v3  ;;  %v4493_v53 = vpack.c.bf16 %v418_v46, %v417_v45 }
  0xd8   : > { %8294 = vst [vmem:[#allocation20_spill] sm:$0xff] %v4493_v53 }
  0xd9   : > { %v4367_v40 = vpop.f32.mrf.mxu2  ;;  %v4371_v41 = vpop.f32.mrf.mxu0 }
  0xda   : > { %401 = vst [vmem:[#allocation2 + $0x120] sm:$0xff] %v4367_v40 }
  0xdb   : > { %383 = vst [vmem:[#allocation2 + $0x90] sm:$0xff] %v4371_v41 }
  0xdd   : > { %1035 = vrot.lane.b32.xlu1 %v972_v42, %s4115_s21  ;;  %1037 = vrot.lane.b32.xlu2 %v974_v44, %s4115_s21 }
  0xde   : > { %1511 = vrot.lane.b32.xlu0 %v971_v37, %s4117_s23 }
  0xe1   : > { %v4426_v5 = vpop.f32.mrf.mxu2 }
  0xe2   : > { %8282 = vst [vmem:[#allocation8_spill] sm:$0xff] %v4426_v5 }
  0xe3   : > { %403 = vst [vmem:[#allocation2 + $0x130] sm:$0xff] %v4426_v5 }
  0xe5   : > { %1055 = vrot.lane.b32.xlu1 %v4384_v49, %s4115_s21  ;;  %1057 = vrot.lane.b32.xlu2 %v4387_v50, %s4115_s21 }
  0xe6   : > { %1237 = vrot.lane.b32.xlu0 %v1172_v51, %s4116_s22 }
  0xe9   : > { %v4466_v34 = vpop.f32.mrf.mxu2 }
  0xea   : > { %8287 = vst [vmem:[#allocation13_spill] sm:$0xff] %v4466_v34 }
  0xeb   : > { %595 = vst [vmem:[#allocation2 + $0x140] sm:$0xff] %v4466_v34 }
  0xed   : > { %1257 = vrot.lane.b32.xlu1 %v4404_v61, %s4116_s22  ;;  %1259 = vrot.lane.b32.xlu2 %v4407_v62, %s4116_s22 }
  0xee   : > { %1395 = vrot.lane.b32.xlu0 %v4316_v16, %s4114_s20  ;;  %v4443_v16 = vpack.c.bf16 %v416_v12, %v415_v11  ;;  %v1197_v11 = vrot.slane %v4349_v29, 2  ;;  %v8116_v12 = vrot.slane %v4367_v40, 1 }
  0xf0   : > { %8285 = vst [vmem:[#allocation11_spill] sm:$0xff] %v4443_v16  ;;  %3978 = vmatmul.msk.bf16.gmra.mxu2 %vm208_vm1, %v4443_v16  ;;  %v4530_v46 = vsel %vm965_vm2, %v997_v59, %v8116_v12 }
  0xf1   : > { %v4521_v45 = vpop.f32.mrf.mxu2  ;;  %8301 = vst [vmem:[#allocation27_spill] sm:$0xff] %v4530_v46 }
  0xf2   : > { %8300 = vst [vmem:[#allocation26_spill] sm:$0xff] %v4521_v45  ;;  %v1205_v22 = vrot.slane %v4521_v45, 2 }
  0xf3   : > { %597 = vst [vmem:[#allocation2 + $0x150] sm:$0xff] %v4521_v45 }
  0xf5   : > { %1531 = vrot.lane.b32.xlu1 %v4384_v49, %s4117_s23  ;;  %1533 = vrot.lane.b32.xlu2 %v4387_v50, %s4117_s23 }
  0xf6   : > { %1377 = vrot.lane.b32.xlu0 %v4320_v17, %s4114_s20 }
  0xfc   : > { %v4441_v13 = vpop.permute.xlu2 %1387 }
  0xfd   : > { %1239 = vrot.lane.b32.xlu1 %v1174_v6, %s4116_s22  ;;  %1039 = vrot.lane.b32.xlu2 %v976_v8, %s4115_s21  ;;  %8284 = vst [vmem:[#allocation10_spill] sm:$0xff] %v4441_v13  ;;  %v4509_v6 = vsel %vm1165_vm3, %v1175_v18, %v1177_v60  ;;  %v4525_v18 = vsel %vm1165_vm3, %v1195_v19, %v1197_v11 }
  0xfe   : > { %1059 = vrot.lane.b32.xlu0 %v4435_v3, %s4115_s21 }
 0x100   : > { %3979 = vmatmul.msk.bf16.gmra.mxu2 %vm208_vm1, %v4493_v53 }
 0x105   : > { %1513 = vrot.lane.b32.xlu1 %v974_v44, %s4117_s23  ;;  %1241 = vrot.lane.b32.xlu2 %v4451_v23, %s4116_s22  ;;  %v4478_v44 = vrot.slane %v4336_v25, 1 }
 0x106   : > { %1261 = vrot.lane.b32.xlu0 %v4457_v31, %s4116_s22 }
 0x107   : > { %v4461_v17 = vpop.permute.xlu2 %1051  ;;  %8291 = vst [vmem:[#allocation17_spill] sm:$0xff] %v4478_v44 }
 0x108   : > { %8286 = vst [vmem:[#allocation12_spill] sm:$0xff] %v4461_v17  ;;  %v1201_v17 = vrot.slane %v4426_v5, 2 }
 0x10c   : > { %v4468_v37 = vpop.permute.xlu1 %1385 }
 0x10d   : > { %1397 = vrot.lane.b32.xlu1 %v4334_v24, %s4114_s20  ;;  %1515 = vrot.lane.b32.xlu2 %v976_v8, %s4117_s23  ;;  %8288 = vst [vmem:[#allocation14_spill] sm:$0xff] %v4468_v37  ;;  %v978_v24 = vsel %vm965_vm2, %v975_v2, %v4478_v44  ;;  %v4502_v2 = vsel %vm965_vm2, %v995_v4, %v997_v59  ;;  %v8117_v59 = vrot.slane %v4367_v40, 2 }
 0x10e   : > { %1535 = vrot.lane.b32.xlu0 %v4435_v3, %s4117_s23  ;;  %v4475_v42 = vpop.permute.xlu0 %1029  ;;  %8296 = vst [vmem:[#allocation22_spill] sm:$0xff] %v4502_v2  ;;  %v1005_v3 = vrot.slane %v4521_v45, 1 }
 0x10f   : > { %v4473_v39 = vpop.permute.xlu2 %1253  ;;  %8290 = vst [vmem:[#allocation16_spill] sm:$0xff] %v4475_v42  ;;  %v4553_v12 = vsel %vm1165_vm3, %v1197_v11, %v8117_v59 }
 0x110   : > { %8289 = vst [vmem:[#allocation15_spill] sm:$0xff] %v4473_v39 }
 0x115   : > { %1399 = vrot.lane.b32.xlu2 %v4349_v29, %s4114_s20  ;;  %1379 = vrot.lane.b32.xlu1 %v4336_v25, %s4114_s20  ;;  %v419_v29 = vld [vmem:[%s4165_s19 + $0x110] sm:$0xff] }
 0x116   : > { %1041 = vrot.lane.b32.xlu0 %v978_v24, %s4115_s21  ;;  %v4543_v19 = vpack.c.bf16 %v420_v52, %v419_v29 }
 0x117   : > { %v4489_v48 = vpop.permute.xlu1 %1049  ;;  %v4491_v51 = vpop.permute.xlu2 %1527 }
 0x118   : > { %8292 = vst [vmem:[#allocation18_spill] sm:$0xff] %v4489_v48  ;;  %v4495_v54 = vpop.permute.xlu0 %1231  ;;  %3980 = vmatmul.msk.bf16.gmra.mxu2 %vm208_vm1, %v4543_v19  ;;  %v422_v48 = vld [vmem:[%s4165_s19 + $0x128] sm:$0xff] }
 0x119   : > { %8293 = vst [vmem:[#allocation19_spill] sm:$0xff] %v4491_v51 }
 0x11a   : > { %8295 = vst [vmem:[#allocation21_spill] sm:$0xff] %v4495_v54  ;;  %v421_v54 = vld [vmem:[%s4165_s19 + $0x120] sm:$0xff] }
 0x11b   : > { %8304 = vst [vmem:[#allocation30_spill] sm:$0xff] %v4543_v19  ;;  %v4618_v39 = vpack.c.bf16 %v422_v48, %v421_v54  ;;  %v8322_v48 = vrot.slane %v4233_v38, 2 }
 0x11d   : > { %1061 = vrot.lane.b32.xlu1 %v4502_v2, %s4115_s21  ;;  %1381 = vrot.lane.b32.xlu2 %v4351_v30, %s4114_s20 }
 0x11e   : > { %1243 = vrot.lane.b32.xlu0 %v4509_v6, %s4116_s22  ;;  %3993 = vmatmul.msk.bf16.vlgmr.msrb.gmra.mxu0 %vm208_vm1, %v4618_v39 }
 0x11f   : > { %v4513_v25 = vpop.permute.xlu1 %1251  ;;  %v4515_v8 = vpop.permute.xlu2 %1235 }
 0x120   : > { %8297 = vst [vmem:[#allocation23_spill] sm:$0xff] %v4513_v25  ;;  %v4517_v4 = vpop.permute.xlu0 %1031 }
 0x121   : > { %8298 = vst [vmem:[#allocation24_spill] sm:$0xff] %v4515_v8 }
 0x122   : > { %8299 = vst [vmem:[#allocation25_spill] sm:$0xff] %v4517_v4  ;;  %v1181_v4 = vrot.slane %v4371_v41, 2 }
 0x124   : > { %v4636_v54 = vsel %vm1165_vm3, %v1181_v4, %v8322_v48 }
 0x125   : > { %1263 = vrot.lane.b32.xlu1 %v4525_v18, %s4116_s22  ;;  %1063 = vrot.lane.b32.xlu2 %v4530_v46, %s4115_s21 }
 0x126   : > { %1517 = vrot.lane.b32.xlu0 %v978_v24, %s4117_s23 }
 0x127   : > { %v4539_v43 = vpop.permute.xlu1 %1525  ;;  %v4541_v51 = vpop.permute.xlu2 %1393 }
 0x128   : > { %8302 = vst [vmem:[#allocation28_spill] sm:$0xff] %v4539_v43  ;;  %v4545_v37 = vpop.permute.xlu0 %1389  ;;  %v979_v43 = vrot.slane %v4351_v30, 1  ;;  %3981 = vmatmul.msk.bf16.gmra.mxu2 %vm208_vm1, %v4618_v39 }
 0x129   : > { %8303 = vst [vmem:[#allocation29_spill] sm:$0xff] %v4541_v51 }
 0x12a   : > { %8305 = vst [vmem:[#allocation31_spill] sm:$0xff] %v4545_v37  ;;  %v4568_v37 = vpop.f32.mrf.mxu2  ;;  %v4573_v11 = vsel %vm965_vm2, %v4478_v44, %v979_v43 }
 0x12b   : > { %8309 = vst [vmem:[#allocation35_spill] sm:$0xff] %v4568_v37 }
 0x12c   : > { %599 = vst [vmem:[#allocation2 + $0x160] sm:$0xff] %v4568_v37 }
 0x12d   : > { %1537 = vrot.lane.b32.xlu1 %v4502_v2, %s4117_s23  ;;  %1265 = vrot.lane.b32.xlu2 %v4553_v12, %s4116_s22  ;;  %8310 = vst [vmem:[#allocation36_spill] sm:$0xff] %v4573_v11 }
 0x12e   : > { %1401 = vrot.lane.b32.xlu0 %v4367_v40, %s4114_s20 }
 0x12f   : > { %v4561_v52 = vpop.permute.xlu1 %1233  ;;  %v4563_v24 = vpop.permute.xlu2 %1375 }
 0x130   : > { %8306 = vst [vmem:[#allocation32_spill] sm:$0xff] %v4561_v52  ;;  %v4565_v29 = vpop.permute.xlu0 %1371  ;;  %v981_v52 = vrot.slane %v4371_v41, 1 }
 0x131   : > { %8307 = vst [vmem:[#allocation33_spill] sm:$0xff] %v4563_v24 }
 0x132   : > { %8308 = vst [vmem:[#allocation34_spill] sm:$0xff] %v4565_v29  ;;  %v1179_v29 = vrot.slane %v4351_v30, 2  ;;  %v4589_v51 = vpop.f32.mrf.mxu2  ;;  %v4596_v8 = vsel %vm965_vm2, %v979_v43, %v981_v52  ;;  %v8316_v30 = vrot.slane %v4233_v38, 1 }
 0x133   : > { %8314 = vst [vmem:[#allocation40_spill] sm:$0xff] %v4589_v51 }
 0x134   : > { %601 = vst [vmem:[#allocation2 + $0x170] sm:$0xff] %v4589_v51  ;;  %v4593_v25 = vsel %vm1165_vm3, %v1177_v60, %v1179_v29  ;;  %v4621_v42 = vsel %vm1165_vm3, %v1179_v29, %v1181_v4 }
 0x135   : > { %1539 = vrot.lane.b32.xlu2 %v4530_v46, %s4117_s23  ;;  %1043 = vrot.lane.b32.xlu1 %v4573_v11, %s4115_s21  ;;  %8315 = vst [vmem:[#allocation41_spill] sm:$0xff] %v4596_v8  ;;  %v1203_v46 = vrot.slane %v4466_v34, 2 }
 0x136   : > { %1383 = vrot.lane.b32.xlu0 %v4371_v41, %s4114_s20 }
 0x137   : > { %v4581_v59 = vpop.permute.xlu1 %1033  ;;  %v4583_v13 = vpop.permute.xlu2 %1037  ;;  %v4688_v50 = vsel %vm1165_vm3, %v1201_v17, %v1203_v46  ;;  %v4715_v57 = vsel %vm1165_vm3, %v1203_v46, %v1205_v22 }
 0x138   : > { %8311 = vst [vmem:[#allocation37_spill] sm:$0xff] %v4581_v59  ;;  %v4585_v24 = vpop.permute.xlu0 %1053 }
 0x139   : > { %8312 = vst [vmem:[#allocation38_spill] sm:$0xff] %v4583_v13 }
 0x13a   : > { %8313 = vst [vmem:[#allocation39_spill] sm:$0xff] %v4585_v24  ;;  %v4605_v24 = vsel %vm965_vm2, %v981_v52, %v8316_v30  ;;  %v4625_v52 = vpop.f32.mrf.mxu2 }
 0x13b   : > { %8317 = vst [vmem:[#allocation42_spill] sm:$0xff] %v4605_v24  ;;  %v1011_v49 = vrot.slane %v4625_v52, 1 }
 0x13c   : > { %8321 = vst [vmem:[#allocation46_spill] sm:$0xff] %v4625_v52 }
 0x13d   : > { %1245 = vrot.lane.b32.xlu1 %v4593_v25, %s4116_s22  ;;  %1045 = vrot.lane.b32.xlu2 %v4596_v8, %s4115_s21  ;;  %603 = vst [vmem:[#allocation2 + $0x180] sm:$0xff] %v4625_v52 }
 0x13e   : > { %1047 = vrot.lane.b32.xlu0 %v4605_v24, %s4115_s21 }
 0x13f   : > { %v4609_v13 = vpop.permute.xlu1 %1391  ;;  %v4611_v60 = vpop.permute.xlu2 %1057 }
 0x140   : > { %8318 = vst [vmem:[#allocation43_spill] sm:$0xff] %v4609_v13  ;;  %v4613_v43 = vpop.permute.xlu0 %1255 }
 0x141   : > { %8319 = vst [vmem:[#allocation44_spill] sm:$0xff] %v4611_v60 }
 0x142   : > { %8320 = vst [vmem:[#allocation45_spill] sm:$0xff] %v4613_v43 }
 0x145   : > { %1519 = vrot.lane.b32.xlu1 %v4573_v11, %s4117_s23  ;;  %1247 = vrot.lane.b32.xlu2 %v4621_v42, %s4116_s22 }
 0x146   : > { %1249 = vrot.lane.b32.xlu0 %v4636_v54, %s4116_s22 }
 0x147   : > { %v4641_v29 = vpop.permute.xlu1 %1373  ;;  %v4643_v30 = vpop.permute.xlu2 %1259 }
 0x148   : > { %8323 = vst [vmem:[#allocation47_spill] sm:$0xff] %v4641_v29  ;;  %v4645_v43 = vpop.permute.xlu0 %1529  ;;  %v1001_v29 = vrot.slane %v4426_v5, 1 }
 0x149   : > { %8324 = vst [vmem:[#allocation48_spill] sm:$0xff] %v4643_v30  ;;  %v1003_v30 = vrot.slane %v4466_v34, 1 }
 0x14a   : > { %8325 = vst [vmem:[#allocation49_spill] sm:$0xff] %v4645_v43  ;;  %v4661_v43 = vpop.f32.mrf.mxu2 }
 0x14b   : > { %8329 = vst [vmem:[#allocation53_spill] sm:$0xff] %v4661_v43  ;;  %v4665_v13 = vsel %vm965_vm2, %v1001_v29, %v1003_v30 }
 0x14c   : > { %605 = vst [vmem:[#allocation2 + $0x190] sm:$0xff] %v4661_v43 }
 0x14d   : > { %1403 = vrot.lane.b32.xlu1 %v4426_v5, %s4114_s20  ;;  %1521 = vrot.lane.b32.xlu2 %v4596_v8, %s4117_s23  ;;  %8330 = vst [vmem:[#allocation54_spill] sm:$0xff] %v4665_v13 }
 0x14e   : > { %1523 = vrot.lane.b32.xlu0 %v4605_v24, %s4117_s23  ;;  %v1207_v24 = vrot.slane %v4568_v37, 2 }
 0x14f   : > { %v4653_v38 = vpop.permute.xlu1 %1035  ;;  %v4655_v4 = vpop.permute.xlu2 %1533 }
 0x150   : > { %8326 = vst [vmem:[#allocation50_spill] sm:$0xff] %v4653_v38  ;;  %v4657_v48 = vpop.permute.xlu0 %1511 }
 0x151   : > { %8327 = vst [vmem:[#allocation51_spill] sm:$0xff] %v4655_v4  ;;  %v8331_v4 = vrot.slane %v4367_v40, 1 }
 0x152   : > { %8328 = vst [vmem:[#allocation52_spill] sm:$0xff] %v4657_v48 }
 0x153   : > { %v4674_v48 = vsel %vm965_vm2, %v8331_v4, %v1001_v29  ;;  %v4691_v29 = vsel %vm965_vm2, %v1003_v30, %v1005_v3  ;;  %v4693_v4 = vpop.f32.mrf.mxu2 }
 0x154   : > { %8332 = vst [vmem:[#allocation55_spill] sm:$0xff] %v4674_v48  ;;  %v1215_v19 = vrot.slane %v4693_v4, 2 }
 0x155   : > { %1067 = vrot.lane.b32.xlu1 %v4665_v13, %s4115_s21  ;;  %1405 = vrot.lane.b32.xlu2 %v4466_v34, %s4114_s20  ;;  %8336 = vst [vmem:[#allocation59_spill] sm:$0xff] %v4691_v29 }
 0x156   : > { %1065 = vrot.lane.b32.xlu0 %v4674_v48, %s4115_s21  ;;  %8337 = vst [vmem:[#allocation60_spill] sm:$0xff] %v4693_v4 }
 0x157   : > { %v4678_v38 = vpop.permute.xlu1 %1055  ;;  %v4680_v60 = vpop.permute.xlu2 %1039  ;;  %607 = vst [vmem:[#allocation2 + $0x1a0] sm:$0xff] %v4693_v4 }
 0x158   : > { %8333 = vst [vmem:[#allocation56_spill] sm:$0xff] %v4678_v38  ;;  %v4682_v59 = vpop.permute.xlu0 %1237 }
 0x159   : > { %8334 = vst [vmem:[#allocation57_spill] sm:$0xff] %v4680_v60 }
 0x15a   : > { %8335 = vst [vmem:[#allocation58_spill] sm:$0xff] %v4682_v59  ;;  %v8338_v59 = vrot.slane %v4367_v40, 2 }
 0x15b   : > { %v4717_v40 = vpop.f32.mrf.mxu2 }
 0x15c   : > { %v4702_v60 = vsel %vm1165_vm3, %v8338_v59, %v1201_v17  ;;  %8342 = vst [vmem:[#allocation64_spill] sm:$0xff] %v4717_v40 }
 0x15d   : > { %1269 = vrot.lane.b32.xlu1 %v4688_v50, %s4116_s22  ;;  %1069 = vrot.lane.b32.xlu2 %v4691_v29, %s4115_s21  ;;  %609 = vst [vmem:[#allocation2 + $0x1b0] sm:$0xff] %v4717_v40 }
 0x15e   : > { %1267 = vrot.lane.b32.xlu0 %v4702_v60, %s4116_s22 }
 0x15f   : > { %v4707_v30 = vpop.permute.xlu1 %1257  ;;  %v4709_v38 = vpop.permute.xlu2 %1241 }
 0x160   : > { %8339 = vst [vmem:[#allocation61_spill] sm:$0xff] %v4707_v30  ;;  %v4711_v2 = vpop.permute.xlu0 %1395  ;;  %v1007_v30 = vrot.slane %v4568_v37, 1 }
 0x161   : > { %8340 = vst [vmem:[#allocation62_spill] sm:$0xff] %v4709_v38 }
 0x162   : > { %8341 = vst [vmem:[#allocation63_spill] sm:$0xff] %v4711_v2 }
 0x163   : > { %v4732_v46 = vpop.f32.mrf.mxu2 }
 0x164   : > { %8346 = vst [vmem:[#allocation68_spill] sm:$0xff] %v4732_v46 }
 0x165   : > { %1543 = vrot.lane.b32.xlu1 %v4665_v13, %s4117_s23  ;;  %1271 = vrot.lane.b32.xlu2 %v4715_v57, %s4116_s22  ;;  %611 = vst [vmem:[#allocation2 + $0x1c0] sm:$0xff] %v4732_v46  ;;  %v1209_v13 = vrot.slane %v4589_v51, 2 }
 0x166   : > { %1541 = vrot.lane.b32.xlu0 %v4674_v48, %s4117_s23 }
 0x167   : > { %v4726_v17 = vpop.permute.xlu1 %1531  ;;  %v4728_v59 = vpop.permute.xlu2 %1515 }
 0x168   : > { %8343 = vst [vmem:[#allocation65_spill] sm:$0xff] %v4726_v17  ;;  %v4730_v2 = vpop.permute.xlu0 %1377 }
 0x169   : > { %8344 = vst [vmem:[#allocation66_spill] sm:$0xff] %v4728_v59 }
 0x16a   : > { %8345 = vst [vmem:[#allocation67_spill] sm:$0xff] %v4730_v2  ;;  %v1009_v2 = vrot.slane %v4589_v51, 1 }
 0x16b   : > { %v4770_v8 = vpop.f32.mrf.mxu2 }
 0x16c   : > { %v4750_v48 = vsel %vm965_vm2, %v1007_v30, %v1009_v2  ;;  %8355 = vst [vmem:[#allocation77_spill] sm:$0xff] %v4770_v8 }
 0x16d   : > { %1409 = vrot.lane.b32.xlu1 %v4568_v37, %s4114_s20  ;;  %1545 = vrot.lane.b32.xlu2 %v4691_v29, %s4117_s23  ;;  %8350 = vst [vmem:[#allocation72_spill] sm:$0xff] %v4750_v48  ;;  %v4757_v29 = vsel %vm965_vm2, %v1005_v3, %v1007_v30  ;;  %v4774_v3 = vsel %vm1165_vm3, %v1207_v24, %v1209_v13  ;;  %v1221_v37 = vrot.slane %v4770_v8, 2 }
 0x16e   : > { %1407 = vrot.lane.b32.xlu0 %v4521_v45, %s4114_s20  ;;  %8351 = vst [vmem:[#allocation73_spill] sm:$0xff] %v4757_v29  ;;  %v4777_v30 = vsel %vm965_vm2, %v1009_v2, %v1011_v49  ;;  %v1211_v2 = vrot.slane %v4625_v52, 2 }
 0x16f   : > { %v4741_v38 = vpop.permute.xlu1 %1239  ;;  %v4743_v17 = vpop.permute.xlu2 %1399  ;;  %613 = vst [vmem:[#allocation2 + $0x1d0] sm:$0xff] %v4770_v8 }
 0x170   : > { %8347 = vst [vmem:[#allocation69_spill] sm:$0xff] %v4741_v38  ;;  %v4745_v59 = vpop.permute.xlu0 %1059  ;;  %v4796_v44 = vsel %vm1165_vm3, %v1209_v13, %v1211_v2 }
 0x171   : > { %8348 = vst [vmem:[#allocation70_spill] sm:$0xff] %v4743_v17 }
 0x172   : > { %8349 = vst [vmem:[#allocation71_spill] sm:$0xff] %v4745_v59 }
 0x173   : > { %8356 = vst [vmem:[#allocation78_spill] sm:$0xff] %v4777_v30  ;;  %v4798_v11 = vpop.f32.mrf.mxu2 }
 0x174   : > { %615 = vst [vmem:[#allocation2 + $0x1e0] sm:$0xff] %v4798_v11  ;;  %v1023_v53 = vrot.slane %v4798_v11, 1 }
 0x175   : > { %1073 = vrot.lane.b32.xlu1 %v4750_v48, %s4115_s21  ;;  %1411 = vrot.lane.b32.xlu2 %v4589_v51, %s4114_s20 }
 0x176   : > { %1071 = vrot.lane.b32.xlu0 %v4757_v29, %s4115_s21 }
 0x177   : > { %v4761_v17 = vpop.permute.xlu1 %1513  ;;  %v4763_v38 = vpop.permute.xlu2 %1381 }
 0x178   : > { %8352 = vst [vmem:[#allocation74_spill] sm:$0xff] %v4761_v17  ;;  %v4765_v59 = vpop.permute.xlu0 %1261 }
 0x179   : > { %8353 = vst [vmem:[#allocation75_spill] sm:$0xff] %v4763_v38 }
 0x17a   : > { %8354 = vst [vmem:[#allocation76_spill] sm:$0xff] %v4765_v59  ;;  %v4784_v59 = vsel %vm1165_vm3, %v1205_v22, %v1207_v24 }
 0x17d   : > { %1275 = vrot.lane.b32.xlu1 %v4774_v3, %s4116_s22  ;;  %1075 = vrot.lane.b32.xlu2 %v4777_v30, %s4115_s21 }
 0x17e   : > { %1273 = vrot.lane.b32.xlu0 %v4784_v59, %s4116_s22 }
 0x17f   : > { %v4788_v38 = vpop.permute.xlu1 %1397  ;;  %v4790_v17 = vpop.permute.xlu2 %1063 }
 0x180   : > { %8357 = vst [vmem:[#allocation79_spill] sm:$0xff] %v4788_v38  ;;  %v4792_v47 = vpop.permute.xlu0 %1535 }
 0x181   : > { %8358 = vst [vmem:[#allocation80_spill] sm:$0xff] %v4790_v17 }
 0x182   : > { %8359 = vst [vmem:[#allocation81_spill] sm:$0xff] %v4792_v47 }
 0x185   : > { %1549 = vrot.lane.b32.xlu1 %v4750_v48, %s4117_s23  ;;  %1277 = vrot.lane.b32.xlu2 %v4796_v44, %s4116_s22  ;;  %v1213_v48 = vrot.slane %v4661_v43, 2 }
 0x186   : > { %1547 = vrot.lane.b32.xlu0 %v4757_v29, %s4117_s23 }
 0x187   : > { %v4807_v22 = vpop.permute.xlu1 %1379  ;;  %v4809_v24 = vpop.permute.xlu2 %1265  ;;  %v4852_v51 = vsel %vm1165_vm3, %v1213_v48, %v1215_v19 }
 0x188   : > { %8360 = vst [vmem:[#allocation82_spill] sm:$0xff] %v4807_v22  ;;  %v4811_v47 = vpop.permute.xlu0 %1041  ;;  %v1013_v22 = vrot.slane %v4661_v43, 1 }
 0x189   : > { %8361 = vst [vmem:[#allocation83_spill] sm:$0xff] %v4809_v24  ;;  %v1015_v24 = vrot.slane %v4693_v4, 1 }
 0x18a   : > { %8362 = vst [vmem:[#allocation84_spill] sm:$0xff] %v4811_v47  ;;  %v4827_v47 = vpop.f32.mrf.mxu2 }
 0x18b   : > { %617 = vst [vmem:[#allocation2 + $0x1f0] sm:$0xff] %v4827_v47  ;;  %v4831_v29 = vsel %vm965_vm2, %v1013_v22, %v1015_v24 }
 0x18c   : > { %8366 = vst [vmem:[#allocation88_spill] sm:$0xff] %v4831_v29 }
 0x18d   : > { %1415 = vrot.lane.b32.xlu1 %v4661_v43, %s4114_s20  ;;  %1551 = vrot.lane.b32.xlu2 %v4777_v30, %s4117_s23 }
 0x18e   : > { %1413 = vrot.lane.b32.xlu0 %v4625_v52, %s4114_s20  ;;  %v1017_v52 = vrot.slane %v4717_v40, 1 }
 0x18f   : > { %v4819_v13 = vpop.permute.xlu1 %1061  ;;  %v4821_v17 = vpop.permute.xlu2 %1539 }
 0x190   : > { %8363 = vst [vmem:[#allocation85_spill] sm:$0xff] %v4819_v13  ;;  %v4823_v38 = vpop.permute.xlu0 %1243 }
 0x191   : > { %8364 = vst [vmem:[#allocation86_spill] sm:$0xff] %v4821_v17  ;;  %v4838_v17 = vsel %vm965_vm2, %v1011_v49, %v1013_v22  ;;  %v4855_v49 = vsel %vm965_vm2, %v1015_v24, %v1017_v52 }
 0x192   : > { %8365 = vst [vmem:[#allocation87_spill] sm:$0xff] %v4823_v38  ;;  %v4857_v22 = vpop.f32.mrf.mxu2 }
 0x193   : > { %8367 = vst [vmem:[#allocation89_spill] sm:$0xff] %v4838_v17 }
 0x194   : > { %8371 = vst [vmem:[#allocation93_spill] sm:$0xff] %v4855_v49 }
 0x195   : > { %1079 = vrot.lane.b32.xlu1 %v4831_v29, %s4115_s21  ;;  %1417 = vrot.lane.b32.xlu2 %v4693_v4, %s4114_s20  ;;  %619 = vst [vmem:[#allocation2 + $0x200] sm:$0xff] %v4857_v22  ;;  %v1217_v4 = vrot.slane %v4717_v40, 2 }
 0x196   : > { %1077 = vrot.lane.b32.xlu0 %v4838_v17, %s4115_s21 }
 0x197   : > { %v4842_v38 = vpop.permute.xlu1 %1263  ;;  %v4844_v13 = vpop.permute.xlu2 %1045  ;;  %v4877_v43 = vsel %vm1165_vm3, %v1215_v19, %v1217_v4 }
 0x198   : > { %8368 = vst [vmem:[#allocation90_spill] sm:$0xff] %v4842_v38  ;;  %v4846_v30 = vpop.permute.xlu0 %1517 }
 0x199   : > { %8369 = vst [vmem:[#allocation91_spill] sm:$0xff] %v4844_v13 }
 0x19a   : > { %8370 = vst [vmem:[#allocation92_spill] sm:$0xff] %v4846_v30  ;;  %v4864_v30 = vsel %vm1165_vm3, %v1211_v2, %v1213_v48  ;;  %v4879_v45 = vpop.f32.mrf.mxu2 }
 0x19b   : > { %621 = vst [vmem:[#allocation2 + $0x210] sm:$0xff] %v4879_v45 }
 0x19d   : > { %1281 = vrot.lane.b32.xlu1 %v4852_v51, %s4116_s22  ;;  %1081 = vrot.lane.b32.xlu2 %v4855_v49, %s4115_s21 }
 0x19e   : > { %1279 = vrot.lane.b32.xlu0 %v4864_v30, %s4116_s22 }
 0x19f   : > { %v4869_v38 = vpop.permute.xlu1 %1537  ;;  %v4871_v24 = vpop.permute.xlu2 %1247 }
 0x1a0   : > { %8372 = vst [vmem:[#allocation94_spill] sm:$0xff] %v4869_v38  ;;  %v4873_v13 = vpop.permute.xlu0 %1401 }
 0x1a1   : > { %8373 = vst [vmem:[#allocation95_spill] sm:$0xff] %v4871_v24  ;;  %v1019_v24 = vrot.slane %v4732_v46, 1 }
 0x1a2   : > { %8374 = vst [vmem:[#allocation96_spill] sm:$0xff] %v4873_v13  ;;  %v4894_v13 = vpop.f32.mrf.mxu2 }
 0x1a3   : > { %623 = vst [vmem:[#allocation2 + $0x220] sm:$0xff] %v4894_v13 }
 0x1a5   : > { %1555 = vrot.lane.b32.xlu1 %v4831_v29, %s4117_s23  ;;  %1283 = vrot.lane.b32.xlu2 %v4877_v43, %s4116_s22 }
 0x1a6   : > { %1553 = vrot.lane.b32.xlu0 %v4838_v17, %s4117_s23 }
 0x1a7   : > { %v4888_v48 = vpop.permute.xlu1 %1043  ;;  %v4890_v2 = vpop.permute.xlu2 %1521 }
 0x1a8   : > { %8375 = vst [vmem:[#allocation97_spill] sm:$0xff] %v4888_v48  ;;  %v4892_v19 = vpop.permute.xlu0 %1383 }
 0x1a9   : > { %8376 = vst [vmem:[#allocation98_spill] sm:$0xff] %v4890_v2 }
 0x1aa   : > { %8377 = vst [vmem:[#allocation99_spill] sm:$0xff] %v4892_v19  ;;  %v1021_v19 = vrot.slane %v4770_v8, 1 }
 0x1ac   : > { %v4912_v17 = vsel %vm965_vm2, %v1019_v24, %v1021_v19 }
 0x1ad   : > { %1421 = vrot.lane.b32.xlu1 %v4732_v46, %s4114_s20  ;;  %1557 = vrot.lane.b32.xlu2 %v4855_v49, %s4117_s23  ;;  %v4919_v49 = vsel %vm965_vm2, %v1017_v52, %v1019_v24  ;;  %v1219_v52 = vrot.slane %v4732_v46, 2  ;;  %v205_v46 = vunpack.c.h.b16 %v4153_v0 }
 0x1ae   : > { %1419 = vrot.lane.b32.xlu0 %v4717_v40, %s4114_s20 }
 0x1af   : > { %v4903_v38 = vpop.permute.xlu1 %1245  ;;  %v4905_v2 = vpop.permute.xlu2 %1405  ;;  %v4944_v24 = vsel %vm1165_vm3, %v1219_v52, %v1221_v37  ;;  %v207_v16 = vpack.c.b16 %v205_v46, %v205_v46 }
 0x1b0   : > { %8378 = vst [vmem:[#allocation100_spill] sm:$0xff] %v4903_v38  ;;  %v4907_v48 = vpop.permute.xlu0 %1047  ;;  %v423_v38 = vld [vmem:[%s4165_s19 + $0x130] sm:$0xff] }
 0x1b1   : > { %8379 = vst [vmem:[#allocation101_spill] sm:$0xff] %v4905_v2  ;;  %v424_v2 = vld [vmem:[%s4165_s19 + $0x138] sm:$0xff] }
 0x1b2   : > { %8380 = vst [vmem:[#allocation102_spill] sm:$0xff] %v4907_v48  ;;  %v4925_v48 = vpack.c.bf16 %v424_v2, %v423_v38  ;;  %v4940_v38 = vpop.f32.mrf.mxu2  ;;  %v4947_v2 = vsel %vm965_vm2, %v1021_v19, %v1023_v53  ;;  %v1223_v19 = vrot.slane %v4798_v11, 2 }
 0x1b3   : > { %625 = vst [vmem:[#allocation2 + $0x230] sm:$0xff] %v4940_v38 }
 0x1b4   : > { %3982 = vmatmul.msk.bf16.gmra.mxu2 %vm208_vm1, %v4925_v48  ;;  %3994 = vmatmul.msk.bf16.gmra.mxu0 %vm208_vm1, %v4925_v48  ;;  %v4967_v5 = vsel %vm1165_vm3, %v1221_v37, %v1223_v19 }
 0x1b5   : > { %1085 = vrot.lane.b32.xlu1 %v4912_v17, %s4115_s21  ;;  %1423 = vrot.lane.b32.xlu2 %v4770_v8, %s4114_s20 }
 0x1b6   : > { %1083 = vrot.lane.b32.xlu0 %v4919_v49, %s4115_s21 }
 0x1b7   : > { %v4927_v29 = vpop.permute.xlu1 %1519  ;;  %v4929_v40 = vpop.permute.xlu2 %1069 }
 0x1b8   : > { %8381 = vst [vmem:[#allocation103_spill] sm:$0xff] %v4927_v29  ;;  %v4931_v34 = vpop.permute.xlu0 %1249 }
 0x1b9   : > { %8382 = vst [vmem:[#allocation104_spill] sm:$0xff] %v4929_v40  ;;  %v4954_v40 = vsel %vm1165_vm3, %v1217_v4, %v1219_v52  ;;  %v4973_v4 = vpop.f32.mrf.mxu0  ;;  %v244_v52 = vsel %vm239_vm0, %v207_v16, 0 }
 0x1ba   : > { %8383 = vst [vmem:[#allocation105_spill] sm:$0xff] %v4931_v34  ;;  %4016 = vmatpush.bf16.msra.mxu3 %v244_v52  ;;  %312 = vmatpush.bf16.msra.mxu1 %v244_v52 }
 0x1bb   : > { %825 = vst [vmem:[#allocation2 + $0x240] sm:$0xff] %v4973_v4 }
 0x1bd   : > { %1287 = vrot.lane.b32.xlu1 %v4944_v24, %s4116_s22  ;;  %1087 = vrot.lane.b32.xlu2 %v4947_v2, %s4115_s21 }
 0x1be   : > { %1285 = vrot.lane.b32.xlu0 %v4954_v40, %s4116_s22  ;;  %543 = vmatpush.bf16.msrb.mxu3 %v244_v52 }
 0x1bf   : > { %v4958_v29 = vpop.permute.xlu1 %1403  ;;  %v4960_v34 = vpop.permute.xlu2 %1271  ;;  %773 = vmatpush.bf16.msrb.mxu1 %v244_v52  ;;  %3968 = vmatmul.msk.bf16.vlgmr.msra.gmra.mxu3 %vm208_vm1, %v4173_v9  ;;  %v1025_v9 = vrot.slane %v4827_v47, 1 }
 0x1c0   : > { %8384 = vst [vmem:[#allocation106_spill] sm:$0xff] %v4958_v29  ;;  %v4962_v8 = vpop.permute.xlu0 %1523  ;;  %3963 = vmatmul.msk.bf16.vlgmr.msra.gmra.mxu1 %vm208_vm1, %v4170_v7 }
 0x1c1   : > { %8385 = vst [vmem:[#allocation107_spill] sm:$0xff] %v4960_v34  ;;  %v5023_v34 = vrot.slane %v4857_v22, 2 }
 0x1c2   : > { %8386 = vst [vmem:[#allocation108_spill] sm:$0xff] %v4962_v8  ;;  %v526_v8 = vpop.f32.mrf.mxu2 }
 0x1c5   : > { %1561 = vrot.lane.b32.xlu1 %v4912_v17, %s4117_s23  ;;  %1289 = vrot.lane.b32.xlu2 %v4967_v5, %s4116_s22 }
 0x1c6   : > { %1559 = vrot.lane.b32.xlu0 %v4919_v49, %s4117_s23 }
 0x1c7   : > { %v4979_v0 = vpop.permute.xlu1 %1067  ;;  %v4981_v37 = vpop.permute.xlu2 %1545 }
 0x1c8   : > { %8387 = vst [vmem:[#allocation109_spill] sm:$0xff] %v4979_v0  ;;  %v4983_v46 = vpop.permute.xlu0 %1065  ;;  %v1225_v0 = vrot.slane %v4827_v47, 2 }
 0x1c9   : > { %8388 = vst [vmem:[#allocation110_spill] sm:$0xff] %v4981_v37 }
 0x1ca   : > { %8389 = vst [vmem:[#allocation111_spill] sm:$0xff] %v4983_v46  ;;  %v1027_v46 = vrot.slane %v4857_v22, 1  ;;  %v528_v7 = vpop.f32.mrf.mxu2 }
 0x1cc   : > { %v5004_v37 = vsel %vm965_vm2, %v1025_v9, %v1027_v46 }
 0x1cd   : > { %1427 = vrot.lane.b32.xlu1 %v4827_v47, %s4114_s20  ;;  %1563 = vrot.lane.b32.xlu2 %v4947_v2, %s4117_s23 }
 0x1ce   : > { %1425 = vrot.lane.b32.xlu0 %v4798_v11, %s4114_s20 }
 0x1cf   : > { %v4995_v16 = vpop.permute.xlu1 %1269  ;;  %v4997_v8 = vpop.permute.xlu2 %1411  ;;  %3969 = vmatmul.msk.bf16.gmra.mxu3 %vm208_vm1, %v4185_v15 }
 0x1d0   : > { %8390 = vst [vmem:[#allocation112_spill] sm:$0xff] %v4995_v16  ;;  %v4999_v52 = vpop.permute.xlu0 %1267  ;;  %v5011_v16 = vsel %vm965_vm2, %v1023_v53, %v1025_v9  ;;  %3964 = vmatmul.msk.bf16.gmra.mxu1 %vm208_vm1, %v4183_v14  ;;  %v5031_v53 = vsel %vm1165_vm3, %v1225_v0, %v5023_v34  ;;  %v5037_v9 = vsel %vm1165_vm3, %v1223_v19, %v1225_v0 }
 0x1d1   : > { %8391 = vst [vmem:[#allocation113_spill] sm:$0xff] %v4997_v8 }
 0x1d2   : > { %8392 = vst [vmem:[#allocation114_spill] sm:$0xff] %v4999_v52 }
 0x1d5   : > { %1091 = vrot.lane.b32.xlu1 %v5004_v37, %s4115_s21  ;;  %1429 = vrot.lane.b32.xlu2 %v4857_v22, %s4114_s20 }
 0x1d6   : > { %1089 = vrot.lane.b32.xlu0 %v5011_v16, %s4115_s21 }
 0x1d7   : > { %v5015_v52 = vpop.permute.xlu1 %1543  ;;  %v5017_v8 = vpop.permute.xlu2 %1075 }
 0x1d8   : > { %8393 = vst [vmem:[#allocation115_spill] sm:$0xff] %v5015_v52  ;;  %v5019_v7 = vpop.permute.xlu0 %1541 }
 0x1d9   : > { %8394 = vst [vmem:[#allocation116_spill] sm:$0xff] %v5017_v8 }
 0x1da   : > { %8395 = vst [vmem:[#allocation117_spill] sm:$0xff] %v5019_v7  ;;  %v1162_v7 = vld [vmem:[#allocation2 + $0x210] sm:$0x1] }
 0x1db   : > { %v1229_v8 = vrot.slane %v1162_v7, 2 }
 0x1dd   : > { %1293 = vrot.lane.b32.xlu1 %v5031_v53, %s4116_s22  ;;  %1093 = vrot.lane.b32.xlu2 %v1027_v46, %s4115_s21  ;;  %v1230_v29 = vsel %vm1165_vm3, %v5023_v34, %v1229_v8 }
 0x1de   : > { %1291 = vrot.lane.b32.xlu0 %v5037_v9, %s4116_s22 }
 0x1df   : > { %v5041_v15 = vpop.permute.xlu1 %1409  ;;  %v5043_v52 = vpop.permute.xlu2 %1277  ;;  %3970 = vmatmul.msk.bf16.gmra.mxu3 %vm208_vm1, %v4197_v21 }
 0x1e0   : > { %8396 = vst [vmem:[#allocation118_spill] sm:$0xff] %v5041_v15  ;;  %v5045_v14 = vpop.permute.xlu0 %1407  ;;  %3965 = vmatmul.msk.bf16.gmra.mxu1 %vm208_vm1, %v4195_v20 }
 0x1e1   : > { %8397 = vst [vmem:[#allocation119_spill] sm:$0xff] %v5045_v14  ;;  %v1505_v14 = vrot.slane %v4879_v45, 1 }
 0x1e3   : > { %v5066_v8 = vsel %vm965_vm2, %v1027_v46, %v1505_v14  ;;  %v1507_v46 = vrot.slane %v4894_v13, 1 }
 0x1e5   : > { %1567 = vrot.lane.b32.xlu1 %v5004_v37, %s4117_s23  ;;  %1295 = vrot.lane.b32.xlu2 %v1230_v29, %s4116_s22  ;;  %v1643_v29 = vld [vmem:[#allocation2 + $0x40] sm:$0xfe] }
 0x1e6   : > { %1431 = vrot.lane.b32.xlu0 %v4879_v45, %s4114_s20  ;;  %v1647_v20 = vrot.slane %v1643_v29, 2 }
 0x1e7   : > { %v5054_v19 = vpop.permute.xlu1 %1073  ;;  %v5056_v0 = vpop.permute.xlu2 %1551 }
 0x1e8   : > { %8398 = vst [vmem:[#allocation120_spill] sm:$0xff] %v5054_v19  ;;  %v5058_v15 = vpop.permute.xlu0 %1071  ;;  %v5087_v19 = vsel %vm965_vm2, %v1505_v14, %v1507_v46  ;;  %v1366_v14 = vld [vmem:[#allocation2 + $0x230] sm:$0x7f] }
 0x1e9   : > { %8399 = vst [vmem:[#allocation121_spill] sm:$0xff] %v5056_v0  ;;  %v1648_v0 = vsel %vm1165_vm3, %v1647_v20, %v4422_v1  ;;  %v5098_v1 = vrot.slane %v4940_v38, 1 }
 0x1ea   : > { %8400 = vst [vmem:[#allocation122_spill] sm:$0xff] %v5058_v15 }
 0x1ed   : > { %1433 = vrot.lane.b32.xlu1 %v4894_v13, %s4114_s20  ;;  %1569 = vrot.lane.b32.xlu2 %v5066_v8, %s4117_s23 }
 0x1ee   : > { %1565 = vrot.lane.b32.xlu0 %v5011_v16, %s4117_s23 }
 0x1ef   : > { %v5074_v7 = vpop.permute.xlu1 %1275  ;;  %v5076_v15 = vpop.permute.xlu2 %1417  ;;  %3971 = vmatmul.msk.bf16.gmra.mxu3 %vm208_vm1, %v4209_v27 }
 0x1f0   : > { %8401 = vst [vmem:[#allocation123_spill] sm:$0xff] %v5076_v15  ;;  %v5078_v21 = vpop.permute.xlu0 %1273  ;;  %3966 = vmatmul.msk.bf16.gmra.mxu1 %vm208_vm1, %v4207_v26 }
 0x1f1   : > { %8402 = vst [vmem:[#allocation124_spill] sm:$0xff] %v5078_v21 }
 0x1f5   : > { %1659 = vrot.lane.b32.xlu1 %v1648_v0, %s4118_s24  ;;  %1661 = vrot.lane.b32.xlu2 %v4451_v23, %s4118_s24  ;;  %v5106_v23 = vsel %vm965_vm2, %v1507_v46, %v5098_v1 }
 0x1f6   : > { %1571 = vrot.lane.b32.xlu0 %v5087_v19, %s4117_s23 }
 0x1f7   : > { %v5091_v15 = vpop.permute.xlu1 %1549  ;;  %v5093_v29 = vpop.permute.xlu2 %1081 }
 0x1f8   : > { %v5095_v21 = vpop.permute.xlu0 %1547 }
 0x1f9   : > { %8403 = vst [vmem:[#allocation125_spill] sm:$0xff] %v5095_v21 }
 0x1fd   : > { %1573 = vrot.lane.b32.xlu1 %v5106_v23, %s4117_s23  ;;  %1435 = vrot.lane.b32.xlu2 %v1366_v14, %s4114_s20 }
 0x1fe   : > { %1657 = vrot.lane.b32.xlu0 %v1647_v20, %s4118_s24 }
 0x1ff   : > { %v5112_v0 = vpop.permute.xlu1 %1415  ;;  %v5114_v21 = vpop.permute.xlu2 %1283  ;;  %3972 = vmatmul.msk.bf16.gmra.mxu3 %vm208_vm1, %v4221_v33  ;;  %v640_v33 = vld [vmem:[%s4165_s19 + $0x148] sm:$0xff] }
 0x200   : > { %v5116_v27 = vpop.permute.xlu0 %1413  ;;  %3967 = vmatmul.msk.bf16.gmra.mxu1 %vm208_vm1, %v4219_v32  ;;  %v639_v32 = vld [vmem:[%s4165_s19 + $0x140] sm:$0xff] }
 0x201   : > { %8404 = vst [vmem:[#allocation126_spill] sm:$0xff] %v5116_v27 }
 0x205   : > { %1665 = vrot.lane.b32.xlu1 %v4593_v25, %s4118_s24  ;;  %1575 = vrot.lane.b32.xlu2 %v5098_v1, %s4117_s23 }
 0x206   : > { %1663 = vrot.lane.b32.xlu0 %v4509_v6, %s4118_s24 }
 0x207   : > { %v5124_v26 = vpop.permute.xlu1 %1079  ;;  %v5126_v20 = vpop.permute.xlu2 %1557 }
 0x208   : > { %8405 = vst [vmem:[#allocation127_spill] sm:$0xff] %v5124_v26  ;;  %v5128_v46 = vpop.permute.xlu0 %1077 }
 0x209   : > { %8406 = vst [vmem:[#allocation128_spill] sm:$0xff] %v5126_v20  ;;  %v8537_v20 = vld [vmem:[#allocation21_spill] sm:$0xff] }
 0x20a   : > { %8407 = vst [vmem:[#allocation129_spill] sm:$0xff] %v5128_v46 }
 0x20d   : > { %1671 = vrot.lane.b32.xlu1 %v4266_v56, %s4118_s24  ;;  %1667 = vrot.lane.b32.xlu2 %v4621_v42, %s4118_s24  ;;  %v657_v56 = vpack.c.bf16 %v640_v33, %v639_v32 }
 0x20e   : > { %1669 = vrot.lane.b32.xlu0 %v4636_v54, %s4118_s24 }
 0x20f   : > { %v5140_v6 = vpop.permute.xlu1 %1281  ;;  %v5142_v25 = vpop.permute.xlu2 %1423  ;;  %3995 = vmatmul.msk.bf16.gmra.mxu0 %vm208_vm1, %v657_v56  ;;  %3983 = vmatmul.msk.bf16.vlgmr.msrb.gmra.mxu3 %vm208_vm1, %v4229_v36 }
 0x210   : > { %8408 = vst [vmem:[#allocation130_spill] sm:$0xff] %v5140_v6  ;;  %v5144_v14 = vpop.permute.xlu0 %1279  ;;  %4003 = vmatmul.msk.bf16.vlgmr.msrb.gmra.mxu1 %vm208_vm1, %v4618_v39 }
 0x211   : > { %8409 = vst [vmem:[#allocation131_spill] sm:$0xff] %v5142_v25  ;;  %v8536_v25 = vld [vmem:[#allocation18_spill] sm:$0xff] }
 0x212   : > { %8410 = vst [vmem:[#allocation132_spill] sm:$0xff] %v5144_v14 }
 0x215   : > { %1677 = vrot.lane.b32.xlu1 %v4404_v61, %s4118_s24  ;;  %1673 = vrot.lane.b32.xlu2 %v4289_v63, %s4118_s24 }
 0x216   : > { %1675 = vrot.lane.b32.xlu0 %v4345_v28, %s4118_s24 }
 0x217   : > { %v5154_v42 = vpop.permute.xlu1 %1555  ;;  %v5156_v54 = vpop.permute.xlu2 %1087 }
 0x218   : > { %8411 = vst [vmem:[#allocation133_spill] sm:$0xff] %v5154_v42  ;;  %v5158_v6 = vpop.permute.xlu0 %1553  ;;  %v646_v42 = vld [vmem:[%s4165_s19 + $0x178] sm:$0xff] }
 0x219   : > { %8412 = vst [vmem:[#allocation134_spill] sm:$0xff] %v5156_v54  ;;  %v8526_v54 = vld [vmem:[#allocation37_spill] sm:$0xff] }
 0x21a   : > { %8413 = vst [vmem:[#allocation135_spill] sm:$0xff] %v5158_v6  ;;  %v645_v6 = vld [vmem:[%s4165_s19 + $0x170] sm:$0xff] }
 0x21d   : > { %1683 = vrot.lane.b32.xlu1 %v4525_v18, %s4118_s24  ;;  %1679 = vrot.lane.b32.xlu2 %v4407_v62, %s4118_s24 }
 0x21e   : > { %1681 = vrot.lane.b32.xlu0 %v4457_v31, %s4118_s24 }
 0x21f   : > { %v5171_v63 = vpop.permute.xlu1 %1421  ;;  %v5173_v28 = vpop.permute.xlu2 %1289  ;;  %3984 = vmatmul.msk.bf16.gmra.mxu3 %vm208_vm1, %v4271_v58 }
 0x220   : > { %8414 = vst [vmem:[#allocation136_spill] sm:$0xff] %v5171_v63  ;;  %v5175_v61 = vpop.permute.xlu0 %1419  ;;  %4004 = vmatmul.msk.bf16.gmra.mxu1 %vm208_vm1, %v4925_v48 }
 0x221   : > { %8415 = vst [vmem:[#allocation137_spill] sm:$0xff] %v5173_v28  ;;  %v8456_v28 = vld [vmem:[#allocation46_spill] sm:$0xff] }
 0x222   : > { %8416 = vst [vmem:[#allocation138_spill] sm:$0xff] %v5175_v61  ;;  %v8450_v61 = vld [vmem:[#allocation26_spill] sm:$0xff] }
 0x225   : > { %1689 = vrot.lane.b32.xlu1 %v4688_v50, %s4118_s24  ;;  %1685 = vrot.lane.b32.xlu2 %v4553_v12, %s4118_s24 }
 0x226   : > { %1687 = vrot.lane.b32.xlu0 %v4702_v60, %s4118_s24  ;;  %v5205_v60 = vpop.f32.mrf.mxu0 }
 0x227   : > { %v5183_v36 = vpop.permute.xlu1 %1085  ;;  %v5185_v62 = vpop.permute.xlu2 %1563  ;;  %827 = vst [vmem:[#allocation2 + $0x250] sm:$0xff] %v5205_v60 }
 0x228   : > { %8417 = vst [vmem:[#allocation139_spill] sm:$0xff] %v5183_v36  ;;  %v5187_v31 = vpop.permute.xlu0 %1083  ;;  %v644_v36 = vld [vmem:[%s4165_s19 + $0x168] sm:$0xff] }
 0x229   : > { %8418 = vst [vmem:[#allocation140_spill] sm:$0xff] %v5185_v62 }
 0x22a   : > { %8419 = vst [vmem:[#allocation141_spill] sm:$0xff] %v5187_v31  ;;  %v5348_v31 = vld [vmem:[#allocation2 + $0x110] sm:$0xff] }
 0x22d   : > { %1695 = vrot.lane.b32.xlu1 %v4774_v3, %s4118_s24  ;;  %1691 = vrot.lane.b32.xlu2 %v4715_v57, %s4118_s24 }
 0x22e   : > { %1693 = vrot.lane.b32.xlu0 %v4784_v59, %s4118_s24 }
 0x22f   : > { %v5199_v50 = vpop.permute.xlu1 %1287  ;;  %v5201_v12 = vpop.permute.xlu2 %1429  ;;  %3985 = vmatmul.msk.bf16.gmra.mxu3 %vm208_vm1, %v4311_v10 }
 0x230   : > { %8420 = vst [vmem:[#allocation142_spill] sm:$0xff] %v5199_v50  ;;  %v5203_v18 = vpop.permute.xlu0 %1285  ;;  %4005 = vmatmul.msk.bf16.gmra.mxu1 %vm208_vm1, %v657_v56  ;;  %v1653_v56 = vrot.slane %v4940_v38, 2  ;;  %v5335_v50 = vld [vmem:[#allocation2 + $0xf0] sm:$0xff] }
 0x231   : > { %8421 = vst [vmem:[#allocation143_spill] sm:$0xff] %v5201_v12  ;;  %v5220_v3 = vpop.f32.mrf.mxu0  ;;  %v8448_v12 = vld [vmem:[#allocation35_spill] sm:$0xff] }
 0x232   : > { %8422 = vst [vmem:[#allocation144_spill] sm:$0xff] %v5203_v18  ;;  %v8441_v18 = vld [vmem:[#allocation11_spill] sm:$0xff] }
 0x233   : > { %829 = vst [vmem:[#allocation2 + $0x260] sm:$0xff] %v5220_v3 }
 0x235   : > { %1701 = vrot.lane.b32.xlu1 %v4852_v51, %s4118_s24  ;;  %1697 = vrot.lane.b32.xlu2 %v4796_v44, %s4118_s24 }
 0x236   : > { %1699 = vrot.lane.b32.xlu0 %v4864_v30, %s4118_s24 }
 0x237   : > { %v5214_v57 = vpop.permute.xlu1 %1561  ;;  %v5216_v58 = vpop.permute.xlu2 %1093 }
 0x238   : > { %8423 = vst [vmem:[#allocation145_spill] sm:$0xff] %v5214_v57  ;;  %v5218_v59 = vpop.permute.xlu0 %1559  ;;  %v531_v51 = vpop.f32.mrf.mxu2 }
 0x239   : > { %8424 = vst [vmem:[#allocation146_spill] sm:$0xff] %v5216_v58  ;;  %v1651_v51 = vrot.slane %v4894_v13, 2 }
 0x23a   : > { %8425 = vst [vmem:[#allocation147_spill] sm:$0xff] %v5218_v59  ;;  %v5327_v59 = vld [vmem:[#allocation2 + $0x100] sm:$0xff] }
 0x23d   : > { %1707 = vrot.lane.b32.xlu1 %v4944_v24, %s4118_s24  ;;  %1703 = vrot.lane.b32.xlu2 %v4877_v43, %s4118_s24 }
 0x23e   : > { %1705 = vrot.lane.b32.xlu0 %v4954_v40, %s4118_s24  ;;  %v1649_v40 = vrot.slane %v4879_v45, 2 }
 0x23f   : > { %v5232_v44 = vpop.permute.xlu1 %1427  ;;  %v5234_v30 = vpop.permute.xlu2 %1295  ;;  %3986 = vmatmul.msk.bf16.gmra.mxu3 %vm208_vm1, %v4363_v35 }
 0x240   : > { %8426 = vst [vmem:[#allocation148_spill] sm:$0xff] %v5232_v44  ;;  %v5236_v32 = vpop.permute.xlu0 %1425  ;;  %v533_v10 = vpop.f32.mrf.mxu2  ;;  %v5270_v44 = vld [vmem:[#allocation2 + $0x70] sm:$0xff] }
 0x241   : > { %8427 = vst [vmem:[#allocation149_spill] sm:$0xff] %v5234_v30  ;;  %v1644_v10 = vld [vmem:[#allocation2 + $0x240] sm:$0x1] }
 0x242   : > { %8428 = vst [vmem:[#allocation150_spill] sm:$0xff] %v5236_v32  ;;  %v5352_v30 = vld [vmem:[#allocation2 + $0x120] sm:$0xff] }
 0x245   : > { %1713 = vrot.lane.b32.xlu1 %v5031_v53, %s4118_s24  ;;  %1709 = vrot.lane.b32.xlu2 %v4967_v5, %s4118_s24  ;;  %v1654_v5 = vsel %vm1165_vm3, %v1651_v51, %v1653_v56  ;;  %v1650_v53 = vsel %vm1165_vm3, %v5023_v34, %v1649_v40  ;;  %v1655_v34 = vrot.slane %v1644_v10, 2  ;;  %v5289_v10 = vld [vmem:[#allocation2 + $0x80] sm:$0xff] }
 0x246   : > { %1711 = vrot.lane.b32.xlu0 %v5037_v9, %s4118_s24  ;;  %v1652_v9 = vsel %vm1165_vm3, %v1649_v40, %v1651_v51  ;;  %v1789_v40 = vld [vmem:[#allocation2 + $0x60] sm:$0x80] }
 0x247   : > { %v5244_v43 = vpop.permute.xlu1 %1091  ;;  %v5246_v24 = vpop.permute.xlu2 %1569 }
 0x248   : > { %8429 = vst [vmem:[#allocation151_spill] sm:$0xff] %v5244_v43  ;;  %v5249_v33 = vpop.permute.xlu0 %1089 }
 0x249   : > { %8430 = vst [vmem:[#allocation152_spill] sm:$0xff] %v5246_v24  ;;  %v8447_v24 = vld [vmem:[#allocation20_spill] sm:$0xff] }
 0x24a   : > { %8431 = vst [vmem:[#allocation153_spill] sm:$0xff] %v5249_v33  ;;  %v339_v33 = vpop.f32.mrf.mxu3 }
 0x24b   : > { %386 = vst.msk [vmem:[#allocation2 + $0xa8] sm:$0xff] %vm365_vm4, %v339_v33 }
 0x24d   : > { %1719 = vrot.lane.b32.xlu1 %v1654_v5, %s4118_s24  ;;  %1715 = vrot.lane.b32.xlu2 %v1650_v53, %s4118_s24  ;;  %v1656_v5 = vsel %vm1165_vm3, %v1653_v56, %v1655_v34  ;;  %v5285_v56 = vld [vmem:[#allocation2 + $0xa0] sm:$0xff] }
 0x24e   : > { %1717 = vrot.lane.b32.xlu0 %v1652_v9, %s4118_s24 }
 0x24f   : > { %v5263_v43 = vpop.permute.xlu1 %1293  ;;  %v5265_v35 = vpop.permute.xlu2 %1661  ;;  %3987 = vmatmul.msk.bf16.gmra.mxu3 %vm208_vm1, %v4397_v55 }
 0x250   : > { %8432 = vst [vmem:[#allocation154_spill] sm:$0xff] %v5263_v43  ;;  %v5267_v32 = vpop.permute.xlu0 %1291 }
 0x251   : > { %8433 = vst [vmem:[#allocation155_spill] sm:$0xff] %v5267_v32  ;;  %v5310_v32 = vld [vmem:[#allocation2 + $0xc0] sm:$0xff] }
 0x252   : > { %v341_v51 = vpop.f32.mrf.mxu3 }
 0x253   : > { %388 = vst.msk [vmem:[#allocation2 + $0xb8] sm:$0xff] %vm365_vm4, %v341_v51  ;;  %v5302_v51 = vld [vmem:[#allocation2 + $0xd0] sm:$0xff] }
 0x255   : > { %1799 = vrot.lane.b32.xlu1 %v5270_v44, %s4119_s25  ;;  %1721 = vrot.lane.b32.xlu2 %v1656_v5, %s4118_s24 }
 0x256   : > { %1797 = vrot.lane.b32.xlu0 %v1789_v40, %s4119_s25 }
 0x257   : > { %v5277_v33 = vpop.permute.xlu1 %1567  ;;  %v5279_v53 = vpop.permute.xlu2 %1435 }
 0x258   : > { %8434 = vst [vmem:[#allocation156_spill] sm:$0xff] %v5277_v33  ;;  %v5281_v9 = vpop.permute.xlu0 %1431  ;;  %v642_v33 = vld [vmem:[%s4165_s19 + $0x158] sm:$0xff] }
 0x259   : > { %8435 = vst [vmem:[#allocation157_spill] sm:$0xff] %v5279_v53 }
 0x25a   : > { %8436 = vst [vmem:[#allocation158_spill] sm:$0xff] %v5281_v9  ;;  %v344_v34 = vpop.f32.mrf.mxu3  ;;  %v5306_v9 = vld [vmem:[#allocation2 + $0xb0] sm:$0xff] }
 0x25b   : > { %390 = vst.msk [vmem:[#allocation2 + $0xc8] sm:$0xff] %vm365_vm4, %v344_v34 }
 0x25d   : > { %1805 = vrot.lane.b32.xlu1 %v5285_v56, %s4119_s25  ;;  %1801 = vrot.lane.b32.xlu2 %v5289_v10, %s4119_s25 }
 0x25e   : > { %1803 = vrot.lane.b32.xlu0 %v4371_v41, %s4119_s25 }
 0x25f   : > { %v5296_v5 = vpop.permute.xlu1 %1433  ;;  %v5298_v55 = vpop.permute.xlu2 %1575  ;;  %3988 = vmatmul.msk.bf16.gmra.mxu3 %vm208_vm1, %v8441_v18 }
 0x260   : > { %8437 = vst [vmem:[#allocation159_spill] sm:$0xff] %v5296_v5  ;;  %v5300_v40 = vpop.permute.xlu0 %1565 }
 0x261   : > { %8438 = vst [vmem:[#allocation160_spill] sm:$0xff] %v5298_v55 }
 0x262   : > { %8439 = vst [vmem:[#allocation161_spill] sm:$0xff] %v5300_v40  ;;  %v346_v41 = vpop.f32.mrf.mxu3  ;;  %v641_v40 = vld [vmem:[%s4165_s19 + $0x150] sm:$0xff] }
 0x263   : > { %392 = vst.msk [vmem:[#allocation2 + $0xd8] sm:$0xff] %vm365_vm4, %v346_v41  ;;  %v658_v55 = vpack.c.bf16 %v642_v33, %v641_v40  ;;  %v5331_v41 = vld [vmem:[#allocation2 + $0xe0] sm:$0xff]  ;;  %v8443_v40 = vld [vmem:[#allocation8_spill] sm:$0xff] }
 0x265   : > { %1811 = vrot.lane.b32.xlu1 %v5302_v51, %s4119_s25  ;;  %1807 = vrot.lane.b32.xlu2 %v5306_v9, %s4119_s25 }
 0x266   : > { %1809 = vrot.lane.b32.xlu0 %v5310_v32, %s4119_s25  ;;  %3996 = vmatmul.msk.bf16.gmra.mxu0 %vm208_vm1, %v658_v55 }
 0x267   : > { %v5315_v34 = vpop.permute.xlu1 %1659  ;;  %v5317_v5 = vpop.permute.xlu2 %1667  ;;  %4006 = vmatmul.msk.bf16.gmra.mxu1 %vm208_vm1, %v658_v55 }
 0x268   : > { %v5319_v43 = vpop.permute.xlu0 %1571 }
 0x269   : > { %8440 = vst [vmem:[#allocation162_spill] sm:$0xff] %v5319_v43 }
 0x26a   : > { %v349_v43 = vpop.f32.mrf.mxu3 }
 0x26b   : > { %394 = vst.msk [vmem:[#allocation2 + $0xe8] sm:$0xff] %vm365_vm4, %v349_v43 }
 0x26d   : > { %1817 = vrot.lane.b32.xlu1 %v5327_v59, %s4119_s25  ;;  %1813 = vrot.lane.b32.xlu2 %v5331_v41, %s4119_s25 }
 0x26e   : > { %1815 = vrot.lane.b32.xlu0 %v5335_v50, %s4119_s25 }
 0x26f   : > { %v5340_v18 = vpop.permute.xlu1 %1573  ;;  %v5342_v33 = vpop.permute.xlu2 %1673  ;;  %3989 = vmatmul.msk.bf16.gmra.mxu3 %vm208_vm1, %v8447_v24 }
 0x270   : > { %8442 = vst [vmem:[#allocation11_spill] sm:$0xff] %v5340_v18  ;;  %v5344_v55 = vpop.permute.xlu0 %1657 }
 0x272   : > { %v351_v53 = vpop.f32.mrf.mxu3 }
 0x273   : > { %396 = vst.msk [vmem:[#allocation2 + $0xf8] sm:$0xff] %vm365_vm4, %v351_v53  ;;  %v8449_v53 = vld [vmem:[#allocation13_spill] sm:$0xff] }
 0x275   : > { %1823 = vrot.lane.b32.xlu1 %v8443_v40, %s4119_s25  ;;  %1819 = vrot.lane.b32.xlu2 %v5348_v31, %s4119_s25  ;;  %v643_v40 = vld [vmem:[%s4165_s19 + $0x160] sm:$0xff] }
 0x276   : > { %1821 = vrot.lane.b32.xlu0 %v5352_v30, %s4119_s25  ;;  %v659_v58 = vpack.c.bf16 %v644_v36, %v643_v40 }
 0x277   : > { %v5357_v43 = vpop.permute.xlu1 %1665  ;;  %v5359_v18 = vpop.permute.xlu2 %1679 }
 0x278   : > { %8444 = vst [vmem:[#allocation8_spill] sm:$0xff] %v5357_v43  ;;  %v5361_v57 = vpop.permute.xlu0 %1663  ;;  %3997 = vmatmul.msk.bf16.gmra.mxu0 %vm208_vm1, %v659_v58  ;;  %4007 = vmatmul.msk.bf16.gmra.mxu1 %vm208_vm1, %v659_v58  ;;  %v8454_v58 = vld [vmem:[#allocation53_spill] sm:$0xff]  ;;  %v8579_v43 = vld [vmem:[#allocation71_spill] sm:$0xff] }
 0x279   : > { %8445 = vst [vmem:[#allocation163_spill] sm:$0xff] %v5359_v18 }
 0x27a   : > { %8446 = vst [vmem:[#allocation164_spill] sm:$0xff] %v5361_v57  ;;  %v354_v62 = vpop.f32.mrf.mxu3  ;;  %v8578_v57 = vld [vmem:[#allocation67_spill] sm:$0xff] }
 0x27b   : > { %398 = vst.msk [vmem:[#allocation2 + $0x108] sm:$0xff] %vm365_vm4, %v354_v62 }
 0x27d   : > { %1829 = vrot.lane.b32.xlu1 %v8448_v12, %s4119_s25  ;;  %1825 = vrot.lane.b32.xlu2 %v8449_v53, %s4119_s25  ;;  %v8455_v12 = vld [vmem:[#allocation40_spill] sm:$0xff] }
 0x27e   : > { %1827 = vrot.lane.b32.xlu0 %v8450_v61, %s4119_s25 }
 0x27f   : > { %v5376_v24 = vpop.permute.xlu1 %1671  ;;  %v5378_v36 = vpop.permute.xlu2 %1685 }
 0x280   : > { %8451 = vst [vmem:[#allocation20_spill] sm:$0xff] %v5376_v24  ;;  %v5380_v40 = vpop.permute.xlu0 %1669 }
 0x281   : > { %8452 = vst [vmem:[#allocation35_spill] sm:$0xff] %v5378_v36 }
 0x282   : > { %8453 = vst [vmem:[#allocation13_spill] sm:$0xff] %v5380_v40  ;;  %v356_v53 = vpop.f32.mrf.mxu3  ;;  %v8460_v40 = vld [vmem:[#allocation30_spill] sm:$0xff] }
 0x283   : > { %400 = vst.msk [vmem:[#allocation2 + $0x118] sm:$0xff] %vm365_vm4, %v356_v53  ;;  %3990 = vmatmul.msk.bf16.gmra.mxu3 %vm208_vm1, %v8460_v40 }
 0x285   : > { %1835 = vrot.lane.b32.xlu1 %v8454_v58, %s4119_s25  ;;  %1831 = vrot.lane.b32.xlu2 %v8455_v12, %s4119_s25  ;;  %v660_v58 = vpack.c.bf16 %v646_v42, %v645_v6  ;;  %v8462_v12 = vld [vmem:[#allocation60_spill] sm:$0xff] }
 0x286   : > { %1833 = vrot.lane.b32.xlu0 %v8456_v28, %s4119_s25  ;;  %v8461_v28 = vld [vmem:[#allocation68_spill] sm:$0xff] }
 0x287   : > { %v5389_v61 = vpop.permute.xlu1 %1677  ;;  %v5391_v62 = vpop.permute.xlu2 %1691 }
 0x288   : > { %8457 = vst [vmem:[#allocation26_spill] sm:$0xff] %v5389_v61  ;;  %v5393_v63 = vpop.permute.xlu0 %1675  ;;  %3998 = vmatmul.msk.bf16.gmra.mxu0 %vm208_vm1, %v660_v58  ;;  %4008 = vmatmul.msk.bf16.gmra.mxu1 %vm208_vm1, %v660_v58  ;;  %v8467_v58 = vld [vmem:[#allocation77_spill] sm:$0xff] }
 0x289   : > { %8458 = vst [vmem:[#allocation53_spill] sm:$0xff] %v5391_v62  ;;  %v723_v62 = vpop.f32.mrf.mxu0 }
 0x28a   : > { %8459 = vst [vmem:[#allocation40_spill] sm:$0xff] %v5393_v63  ;;  %v359_v53 = vpop.f32.mrf.mxu3  ;;  %v8463_v63 = vld [vmem:[#allocation64_spill] sm:$0xff] }
 0x28b   : > { %402 = vst.msk [vmem:[#allocation2 + $0x128] sm:$0xff] %vm365_vm4, %v359_v53 }
 0x28c   : > { %831 = vst [vmem:[#allocation2 + $0x270] sm:$0xff] %v723_v62 }
 0x28d   : > { %1841 = vrot.lane.b32.xlu1 %v8461_v28, %s4119_s25  ;;  %1837 = vrot.lane.b32.xlu2 %v8462_v12, %s4119_s25 }
 0x28e   : > { %1839 = vrot.lane.b32.xlu0 %v8463_v63, %s4119_s25 }
 0x28f   : > { %v5408_v6 = vpop.permute.xlu1 %1683  ;;  %v5410_v42 = vpop.permute.xlu2 %1697 }
 0x290   : > { %8464 = vst [vmem:[#allocation46_spill] sm:$0xff] %v5408_v6  ;;  %v5412_v40 = vpop.permute.xlu0 %1681 }
 0x291   : > { %8465 = vst [vmem:[#allocation30_spill] sm:$0xff] %v5410_v42  ;;  %v726_v63 = vpop.f32.mrf.mxu0  ;;  %v648_v42 = vld [vmem:[%s4165_s19 + $0x188] sm:$0xff] }
 0x292   : > { %8466 = vst [vmem:[#allocation68_spill] sm:$0xff] %v5412_v40  ;;  %v361_v28 = vpop.f32.mrf.mxu3  ;;  %v647_v40 = vld [vmem:[%s4165_s19 + $0x180] sm:$0xff] }
 0x293   : > { %404 = vst.msk [vmem:[#allocation2 + $0x138] sm:$0xff] %vm365_vm4, %v361_v28  ;;  %3991 = vmatmul.msk.bf16.gmra.mxu3 %vm208_vm1, %v4618_v39 }
 0x294   : > { %833 = vst [vmem:[#allocation2 + $0x280] sm:$0xff] %v726_v63 }
 0x295   : > { %1847 = vrot.lane.b32.xlu1 %v4827_v47, %s4119_s25  ;;  %1843 = vrot.lane.b32.xlu2 %v8467_v58, %s4119_s25  ;;  %v661_v47 = vpack.c.bf16 %v648_v42, %v647_v40  ;;  %v314_v58 = vpop.f32.mrf.mxu1 }
 0x296   : > { %1845 = vrot.lane.b32.xlu0 %v4798_v11, %s4119_s25  ;;  %v1792_v58 = vld [vmem:[#allocation2 + $0x260] sm:$0x7f] }
 0x297   : > { %v5421_v12 = vpop.permute.xlu1 %1689  ;;  %v5423_v53 = vpop.permute.xlu2 %1703 }
 0x298   : > { %8468 = vst [vmem:[#allocation60_spill] sm:$0xff] %v5421_v12  ;;  %v5425_v62 = vpop.permute.xlu0 %1687  ;;  %3999 = vmatmul.msk.bf16.gmra.mxu0 %vm208_vm1, %v661_v47  ;;  %4009 = vmatmul.msk.bf16.gmra.mxu1 %vm208_vm1, %v661_v47  ;;  %v649_v47 = vld [vmem:[%s4165_s19 + $0x190] sm:$0xff] }
 0x299   : > { %8469 = vst [vmem:[#allocation64_spill] sm:$0xff] %v5423_v53 }
 0x29a   : > { %8470 = vst [vmem:[#allocation77_spill] sm:$0xff] %v5425_v62  ;;  %v545_v11 = vpop.f32.mrf.mxu3  ;;  %v8501_v62 = vld [vmem:[#allocation72_spill] sm:$0xff] }
 0x29b   : > { %596 = vst.msk [vmem:[#allocation2 + $0x148] sm:$0xff] %vm365_vm4, %v545_v11  ;;  %v650_v11 = vld [vmem:[%s4165_s19 + $0x198] sm:$0xff] }
 0x29d   : > { %1853 = vrot.lane.b32.xlu1 %v4894_v13, %s4119_s25  ;;  %1849 = vrot.lane.b32.xlu2 %v4857_v22, %s4119_s25  ;;  %v316_v22 = vpop.f32.mrf.mxu1 }
 0x29e   : > { %1851 = vrot.lane.b32.xlu0 %v4879_v45, %s4119_s25 }
 0x29f   : > { %v5440_v39 = vpop.permute.xlu1 %1695  ;;  %v5442_v42 = vpop.permute.xlu2 %1709 }
 0x2a0   : > { %8471 = vst [vmem:[#allocation165_spill] sm:$0xff] %v5440_v39  ;;  %v5444_v40 = vpop.permute.xlu0 %1693 }
 0x2a1   : > { %8472 = vst [vmem:[#allocation166_spill] sm:$0xff] %v5442_v42 }
 0x2a2   : > { %8473 = vst [vmem:[#allocation167_spill] sm:$0xff] %v5444_v40  ;;  %v547_v13 = vpop.f32.mrf.mxu3 }
 0x2a3   : > { %598 = vst.msk [vmem:[#allocation2 + $0x158] sm:$0xff] %vm365_vm4, %v547_v13  ;;  %3992 = vmatmul.msk.bf16.gmra.mxu3 %vm208_vm1, %v4925_v48  ;;  %v8477_v13 = vld [vmem:[#allocation36_spill] sm:$0xff] }
 0x2a5   : > { %1859 = vrot.lane.b32.xlu1 %v5205_v60, %s4119_s25  ;;  %1855 = vrot.lane.b32.xlu2 %v4940_v38, %s4119_s25  ;;  %v662_v38 = vpack.c.bf16 %v650_v11, %v649_v47  ;;  %v8482_v11 = vld [vmem:[#allocation3_spill] sm:$0xff] }
 0x2a6   : > { %1857 = vrot.lane.b32.xlu0 %v4973_v4, %s4119_s25 }
 0x2a7   : > { %v5453_v45 = vpop.permute.xlu1 %1701  ;;  %v5455_v28 = vpop.permute.xlu2 %1715 }
 0x2a8   : > { %8474 = vst [vmem:[#allocation168_spill] sm:$0xff] %v5453_v45  ;;  %v5457_v63 = vpop.permute.xlu0 %1699  ;;  %4000 = vmatmul.msk.bf16.gmra.mxu0 %vm208_vm1, %v662_v38  ;;  %4010 = vmatmul.msk.bf16.gmra.mxu1 %vm208_vm1, %v662_v38  ;;  %v8483_v38 = vld [vmem:[#allocation41_spill] sm:$0xff] }
 0x2a9   : > { %8475 = vst [vmem:[#allocation169_spill] sm:$0xff] %v5455_v28  ;;  %v319_v28 = vpop.f32.mrf.mxu1 }
 0x2aa   : > { %8476 = vst [vmem:[#allocation170_spill] sm:$0xff] %v5457_v63  ;;  %v550_v22 = vpop.f32.mrf.mxu3  ;;  %v8478_v63 = vld [vmem:[#allocation17_spill] sm:$0xff]  ;;  %v8484_v28 = vld [vmem:[#allocation42_spill] sm:$0xff] }
 0x2ab   : > { %600 = vst.msk [vmem:[#allocation2 + $0x168] sm:$0xff] %vm365_vm4, %v550_v22 }
 0x2ad   : > { %1939 = vrot.lane.b32.xlu1 %v8477_v13, %s4120_s26  ;;  %1861 = vrot.lane.b32.xlu2 %v1792_v58, %s4119_s25 }
 0x2ae   : > { %1937 = vrot.lane.b32.xlu0 %v8478_v63, %s4120_s26 }
 0x2af   : > { %v5471_v45 = vpop.permute.xlu1 %1707  ;;  %v5473_v48 = vpop.permute.xlu2 %1721 }
 0x2b0   : > { %8479 = vst [vmem:[#allocation36_spill] sm:$0xff] %v5471_v45  ;;  %v5475_v47 = vpop.permute.xlu0 %1705 }
 0x2b1   : > { %8480 = vst [vmem:[#allocation17_spill] sm:$0xff] %v5473_v48  ;;  %v321_v13 = vpop.f32.mrf.mxu1 }
 0x2b2   : > { %8481 = vst [vmem:[#allocation171_spill] sm:$0xff] %v5475_v47  ;;  %v552_v58 = vpop.f32.mrf.mxu3  ;;  %v8487_v47 = vld [vmem:[#allocation6_spill] sm:$0xff]  ;;  %v8489_v13 = vld [vmem:[#allocation5_spill] sm:$0xff] }
 0x2b3   : > { %602 = vst.msk [vmem:[#allocation2 + $0x178] sm:$0xff] %vm365_vm4, %v552_v58 }
 0x2b5   : > { %1945 = vrot.lane.b32.xlu1 %v8482_v11, %s4120_s26  ;;  %1941 = vrot.lane.b32.xlu2 %v8483_v38, %s4120_s26  ;;  %v8488_v11 = vld [vmem:[#allocation4_spill] sm:$0xff] }
 0x2b6   : > { %1943 = vrot.lane.b32.xlu0 %v8484_v28, %s4120_s26 }
 0x2b7   : > { %v5484_v63 = vpop.permute.xlu1 %1713  ;;  %v5486_v22 = vpop.permute.xlu2 %1801 }
 0x2b8   : > { %8485 = vst [vmem:[#allocation3_spill] sm:$0xff] %v5484_v63  ;;  %v5488_v48 = vpop.permute.xlu0 %1711 }
 0x2b9   : > { %8486 = vst [vmem:[#allocation41_spill] sm:$0xff] %v5488_v48  ;;  %v324_v45 = vpop.f32.mrf.mxu1  ;;  %v8492_v48 = vld [vmem:[#allocation22_spill] sm:$0xff] }
 0x2ba   : > { %v555_v38 = vpop.f32.mrf.mxu3  ;;  %v8494_v45 = vld [vmem:[#allocation9_spill] sm:$0xff] }
 0x2bb   : > { %604 = vst.msk [vmem:[#allocation2 + $0x188] sm:$0xff] %vm365_vm4, %v555_v38 }
 0x2bd   : > { %1951 = vrot.lane.b32.xlu1 %v8487_v47, %s4120_s26  ;;  %1947 = vrot.lane.b32.xlu2 %v8488_v11, %s4120_s26  ;;  %v8493_v47 = vld [vmem:[#allocation7_spill] sm:$0xff] }
 0x2be   : > { %1949 = vrot.lane.b32.xlu0 %v8489_v13, %s4120_s26 }
 0x2bf   : > { %v5497_v58 = vpop.permute.xlu1 %1719  ;;  %v5499_v28 = vpop.permute.xlu2 %1807 }
 0x2c0   : > { %8490 = vst [vmem:[#allocation42_spill] sm:$0xff] %v5497_v58  ;;  %v5501_v63 = vpop.permute.xlu0 %1717 }
 0x2c1   : > { %8491 = vst [vmem:[#allocation6_spill] sm:$0xff] %v5501_v63  ;;  %v326_v40 = vpop.f32.mrf.mxu1  ;;  %v8495_v63 = vld [vmem:[#allocation54_spill] sm:$0xff] }
 0x2c2   : > { %v557_v11 = vpop.f32.mrf.mxu3  ;;  %v8497_v40 = vld [vmem:[#allocation55_spill] sm:$0xff] }
 0x2c3   : > { %606 = vst.msk [vmem:[#allocation2 + $0x198] sm:$0xff] %vm365_vm4, %v557_v11 }
 0x2c5   : > { %1957 = vrot.lane.b32.xlu1 %v8492_v48, %s4120_s26  ;;  %1953 = vrot.lane.b32.xlu2 %v8493_v47, %s4120_s26  ;;  %v8496_v48 = vld [vmem:[#allocation27_spill] sm:$0xff] }
 0x2c6   : > { %1955 = vrot.lane.b32.xlu0 %v8494_v45, %s4120_s26 }
 0x2c7   : > { %v5510_v38 = vpop.permute.xlu1 %1799  ;;  %v5512_v13 = vpop.permute.xlu2 %1813 }
 0x2c8   : > { %v5514_v58 = vpop.permute.xlu0 %1797 }
 0x2c9   : > { %v329_v42 = vpop.f32.mrf.mxu1 }
 0x2ca   : > { %v560_v47 = vpop.f32.mrf.mxu3  ;;  %v8503_v42 = vld [vmem:[#allocation73_spill] sm:$0xff] }
 0x2cb   : > { %608 = vst.msk [vmem:[#allocation2 + $0x1a8] sm:$0xff] %vm365_vm4, %v560_v47 }
 0x2cd   : > { %1963 = vrot.lane.b32.xlu1 %v8495_v63, %s4120_s26  ;;  %1959 = vrot.lane.b32.xlu2 %v8496_v48, %s4120_s26  ;;  %v8502_v63 = vld [vmem:[#allocation59_spill] sm:$0xff] }
 0x2ce   : > { %1961 = vrot.lane.b32.xlu0 %v8497_v40, %s4120_s26 }
 0x2cf   : > { %v5523_v11 = vpop.permute.xlu1 %1805  ;;  %v5525_v45 = vpop.permute.xlu2 %1819 }
 0x2d0   : > { %8498 = vst [vmem:[#allocation4_spill] sm:$0xff] %v5523_v11  ;;  %v5527_v39 = vpop.permute.xlu0 %1803  ;;  %v8545_v11 = vld [vmem:[#allocation32_spill] sm:$0xff] }
 0x2d1   : > { %8499 = vst [vmem:[#allocation5_spill] sm:$0xff] %v5525_v45  ;;  %v331_v53 = vpop.f32.mrf.mxu1 }
 0x2d2   : > { %8500 = vst [vmem:[#allocation22_spill] sm:$0xff] %v5527_v39  ;;  %v562_v48 = vpop.f32.mrf.mxu3  ;;  %v2377_v39 = vld [vmem:[#allocation2 + $0x170] sm:$0xff] }
 0x2d3   : > { %610 = vst.msk [vmem:[#allocation2 + $0x1b8] sm:$0xff] %vm365_vm4, %v562_v48 }
 0x2d4   : > { %380 = vst.msk [vmem:[#allocation2 + $0x78] sm:$0xff] %vm365_vm4, %v331_v53 }
 0x2d5   : > { %1969 = vrot.lane.b32.xlu1 %v8501_v62, %s4120_s26  ;;  %1965 = vrot.lane.b32.xlu2 %v8502_v63, %s4120_s26  ;;  %v8507_v62 = vld [vmem:[#allocation88_spill] sm:$0xff]  ;;  %v8508_v63 = vld [vmem:[#allocation78_spill] sm:$0xff] }
 0x2d6   : > { %1967 = vrot.lane.b32.xlu0 %v8503_v42, %s4120_s26  ;;  %v8509_v42 = vld [vmem:[#allocation89_spill] sm:$0xff] }
 0x2d7   : > { %v5536_v47 = vpop.permute.xlu1 %1811  ;;  %v5538_v40 = vpop.permute.xlu2 %1825 }
 0x2d8   : > { %8504 = vst [vmem:[#allocation7_spill] sm:$0xff] %v5536_v47  ;;  %v5541_v12 = vpop.permute.xlu0 %1809  ;;  %v866_v47 = vld [vmem:[#allocation2] sm:$0x80] }
 0x2d9   : > { %8505 = vst [vmem:[#allocation9_spill] sm:$0xff] %v5538_v40  ;;  %v334_v61 = vpop.f32.mrf.mxu1 }
 0x2da   : > { %8506 = vst [vmem:[#allocation54_spill] sm:$0xff] %v5541_v12  ;;  %v565_v6 = vpop.f32.mrf.mxu3  ;;  %v5557_v12 = vpop.f32.mrf.mxu0 }
 0x2db   : > { %612 = vst.msk [vmem:[#allocation2 + $0x1c8] sm:$0xff] %vm365_vm4, %v565_v6 }
 0x2dc   : > { %382 = vst.msk [vmem:[#allocation2 + $0x88] sm:$0xff] %vm365_vm4, %v334_v61 }
 0x2dd   : > { %1975 = vrot.lane.b32.xlu1 %v8507_v62, %s4120_s26  ;;  %1971 = vrot.lane.b32.xlu2 %v8508_v63, %s4120_s26  ;;  %8513 = vst [vmem:[#allocation59_spill] sm:$0xff] %v5557_v12  ;;  %v8514_v62 = vld [vmem:[#allocation93_spill] sm:$0xff] }
 0x2de   : > { %1973 = vrot.lane.b32.xlu0 %v8509_v42, %s4120_s26  ;;  %835 = vst [vmem:[#allocation2 + $0x290] sm:$0xff] %v5557_v12 }
 0x2df   : > { %v5550_v48 = vpop.permute.xlu1 %1817  ;;  %v5552_v40 = vpop.permute.xlu2 %1831 }
 0x2e0   : > { %8510 = vst [vmem:[#allocation27_spill] sm:$0xff] %v5550_v48  ;;  %v5555_v53 = vpop.permute.xlu0 %1815 }
 0x2e1   : > { %8511 = vst [vmem:[#allocation55_spill] sm:$0xff] %v5552_v40  ;;  %v336_v6 = vpop.f32.mrf.mxu1  ;;  %v8525_v40 = vld [vmem:[#allocation12_spill] sm:$0xff] }
 0x2e2   : > { %8512 = vst [vmem:[#allocation72_spill] sm:$0xff] %v5555_v53  ;;  %v567_v63 = vpop.f32.mrf.mxu3  ;;  %v1139_v48 = vadd.f32 %v5306_v9, %v8525_v40 }
 0x2e3   : > { %614 = vst.msk [vmem:[#allocation2 + $0x1d8] sm:$0xff] %vm365_vm4, %v567_v63  ;;  %v5574_v53 = vpop.f32.mrf.mxu0 }
 0x2e4   : > { %384 = vst.msk [vmem:[#allocation2 + $0x98] sm:$0xff] %vm365_vm4, %v336_v6  ;;  %v5590_v6 = vld [vmem:[#allocation2 + $0x110] sm:$0xff] }
 0x2e5   : > { %1981 = vrot.lane.b32.xlu1 %v4912_v17, %s4120_s26  ;;  %1977 = vrot.lane.b32.xlu2 %v8514_v62, %s4120_s26  ;;  %8518 = vst [vmem:[#allocation89_spill] sm:$0xff] %v5574_v53  ;;  %v8530_v9 = vrot.slane %v5590_v6, 1 }
 0x2e6   : > { %1979 = vrot.lane.b32.xlu0 %v4919_v49, %s4120_s26  ;;  %837 = vst [vmem:[#allocation2 + $0x2a0] sm:$0xff] %v5574_v53  ;;  %v2372_v53 = vld [vmem:[#allocation2 + $0x120] sm:$0xff] }
 0x2e7   : > { %v5567_v61 = vpop.permute.xlu1 %1823  ;;  %v5569_v42 = vpop.permute.xlu2 %1837 }
 0x2e8   : > { %8515 = vst [vmem:[#allocation73_spill] sm:$0xff] %v5567_v61  ;;  %v5572_v12 = vpop.permute.xlu0 %1821  ;;  %v2470_v61 = vrot.slane %v2372_v53, 1 }
 0x2e9   : > { %8516 = vst [vmem:[#allocation88_spill] sm:$0xff] %v5569_v42  ;;  %v4046_v42 = vld [vmem:[#allocation2 + $0x20] sm:$0xff] }
 0x2ea   : > { %8517 = vst [vmem:[#allocation78_spill] sm:$0xff] %v5572_v12  ;;  %v570_v17 = vpop.f32.mrf.mxu3  ;;  %v5592_v12 = vld [vmem:[#allocation2 + $0x110] sm:$0xfe]  ;;  %v1130_v36 = vadd.f32 %v4046_v42, %v8526_v54  ;;  %v5620_v40 = vsel %vm965_vm2, %v8530_v9, %v2470_v61  ;;  %v8533_v42 = vld [vmem:[#allocation15_spill] sm:$0xff] }
 0x2eb   : > { %616 = vst.msk [vmem:[#allocation2 + $0x1e8] sm:$0xff] %vm365_vm4, %v570_v17  ;;  %v2669_v17 = vrot.slane %v2372_v53, 2  ;;  %v8527_v53 = vld [vmem:[#allocation16_spill] sm:$0xff]  ;;  %v8531_v54 = vrot.slane %v5592_v12, 2  ;;  %v2376_v9 = vld [vmem:[#allocation2 + $0x160] sm:$0xff] }
 0x2ec   : > { %8522 = vst [vmem:[#allocation174_spill] sm:$0xff] %v5592_v12  ;;  %v1138_v12 = vadd.f32 %v5285_v56, %v8536_v25  ;;  %v8543_v56 = vld [vmem:[#allocation23_spill] sm:$0xff]  ;;  %v2478_v45 = vrot.slane %v2376_v9, 1  ;;  %v8550_v9 = vld [vmem:[#allocation44_spill] sm:$0xff] }
 0x2ed   : > { %1987 = vrot.lane.b32.xlu1 %v5004_v37, %s4120_s26  ;;  %1983 = vrot.lane.b32.xlu2 %v4947_v2, %s4120_s26  ;;  %v5594_v37 = vld [vmem:[#allocation2 + $0x140] sm:$0xff]  ;;  %v2373_v2 = vld [vmem:[#allocation2 + $0x130] sm:$0xff] }
 0x2ee   : > { %1985 = vrot.lane.b32.xlu0 %v5011_v16, %s4120_s26  ;;  %8523 = vst [vmem:[#allocation175_spill] sm:$0xff] %v5594_v37  ;;  %v1128_v16 = vadd.f32 %v8527_v53, %v866_v47  ;;  %v1931_v47 = vrot.slane %v4973_v4, 1  ;;  %v4047_v4 = vld [vmem:[#allocation2 + $0x10] sm:$0xff]  ;;  %v8541_v25 = vrot.slane %v5594_v37, 2 }
 0x2ef   : > { %v5584_v49 = vpop.permute.xlu1 %1829  ;;  %v5586_v62 = vpop.permute.xlu2 %1843 }
 0x2f0   : > { %8519 = vst [vmem:[#allocation93_spill] sm:$0xff] %v5584_v49  ;;  %v5588_v63 = vpop.permute.xlu0 %1827 }
 0x2f1   : > { %8520 = vst [vmem:[#allocation172_spill] sm:$0xff] %v5586_v62  ;;  %v2472_v62 = vrot.slane %v2373_v2, 1 }
 0x2f2   : > { %8521 = vst [vmem:[#allocation173_spill] sm:$0xff] %v5588_v63  ;;  %v5603_v63 = vrot.slane %v5594_v37, 1  ;;  %v572_v49 = vpop.f32.mrf.mxu3 }
 0x2f3   : > { %618 = vst.msk [vmem:[#allocation2 + $0x1f8] sm:$0xff] %vm365_vm4, %v572_v49  ;;  %v1341_v49 = vadd.f32 %v8533_v42, %v1139_v48  ;;  %v8538_v48 = vld [vmem:[#allocation25_spill] sm:$0xff] }
 0x2f4   : > { %8524 = vst [vmem:[#allocation176_spill] sm:$0xff] %v5603_v63  ;;  %v1129_v42 = vadd.f32 %v4047_v4, %v8538_v48  ;;  %v8546_v48 = vld [vmem:[#allocation34_spill] sm:$0xff] }
 0x2f5   : > { %1993 = vrot.lane.b32.xlu1 %v5106_v23, %s4120_s26  ;;  %1989 = vrot.lane.b32.xlu2 %v5066_v8, %s4120_s26  ;;  %v2671_v8 = vrot.slane %v2373_v2, 2  ;;  %v1933_v2 = vrot.slane %v5205_v60, 1  ;;  %v5643_v60 = vsel %vm965_vm2, %v2472_v62, %v5603_v63  ;;  %v8539_v23 = vld [vmem:[#allocation24_spill] sm:$0xff] }
 0x2f6   : > { %1991 = vrot.lane.b32.xlu0 %v5087_v19, %s4120_s26  ;;  %v5625_v19 = vsel %vm1165_vm3, %v8531_v54, %v2669_v17  ;;  %v1330_v54 = vadd.f32 %v8537_v20, %v1128_v16  ;;  %v8544_v16 = vld [vmem:[#allocation29_spill] sm:$0xff]  ;;  %v1331_v4 = vadd.f32 %v8545_v11, %v1129_v42 }
 0x2f7   : > { %v5613_v24 = vpop.permute.xlu1 %1835  ;;  %v5615_v14 = vpop.permute.xlu2 %1849  ;;  %8532 = vst [vmem:[#allocation16_spill] sm:$0xff] %v5625_v19  ;;  %v5639_v19 = vsel %vm965_vm2, %v2470_v61, %v2472_v62  ;;  %v5649_v27 = vsel %vm1165_vm3, %v2669_v17, %v2671_v8  ;;  %v5654_v20 = vsel %vm1165_vm3, %v2671_v8, %v8541_v25  ;;  %v1340_v61 = vadd.f32 %v8543_v56, %v1138_v12  ;;  %v4048_v25 = vld [vmem:[#allocation2 + $0x40] sm:$0xff]  ;;  %v8551_v42 = vld [vmem:[#allocation33_spill] sm:$0xff] }
 0x2f8   : > { %8528 = vst [vmem:[#allocation12_spill] sm:$0xff] %v5613_v24  ;;  %v5630_v53 = vpop.permute.xlu0 %1833  ;;  %v5633_v24 = vpop.f32.mrf.mxu0  ;;  %v1481_v62 = vadd.f32 %v8544_v16, %v1341_v49  ;;  %v8547_v17 = vrot.slane %v5220_v3, 1  ;;  %v1932_v8 = vsel %vm965_vm2, %v5098_v1, %v1931_v47  ;;  %v8549_v56 = vld [vmem:[#allocation39_spill] sm:$0xff]  ;;  %v1934_v11 = vsel %vm965_vm2, %v1931_v47, %v1933_v2 }
 0x2f9   : > { %8529 = vst [vmem:[#allocation37_spill] sm:$0xff] %v5615_v14  ;;  %v2375_v14 = vld [vmem:[#allocation2 + $0x150] sm:$0xff]  ;;  %v5675_v1 = vrot.slane %v2377_v39, 1  ;;  %v2380_v39 = vld [vmem:[#allocation2 + $0x1a0] sm:$0xff] }
 0x2fa   : > { %8534 = vst [vmem:[#allocation15_spill] sm:$0xff] %v5630_v53  ;;  %v1332_v53 = vadd.f32 %v8539_v23, %v1130_v36  ;;  %v2476_v46 = vrot.slane %v2375_v14, 1  ;;  %v1470_v36 = vadd.f32 %v8546_v48, %v1330_v54  ;;  %v1936_v23 = vsel %vm965_vm2, %v1933_v2, %v8547_v17  ;;  %v575_v49 = vpop.f32.mrf.mxu3  ;;  %v8553_v48 = vld [vmem:[#allocation43_spill] sm:$0xff] }
 0x2fb   : > { %8535 = vst [vmem:[#allocation177_spill] sm:$0xff] %v5633_v24  ;;  %v1140_v14 = vadd.f32 %v5310_v32, %v8549_v56  ;;  %v1142_v54 = vadd.f32 %v5331_v41, %v8550_v9  ;;  %v2379_v32 = vld [vmem:[#allocation2 + $0x190] sm:$0xff]  ;;  %v1480_v17 = vadd.f32 %v8553_v48, %v1340_v61  ;;  %v8560_v56 = vld [vmem:[#allocation48_spill] sm:$0xff]  ;;  %v8561_v61 = vld [vmem:[#allocation50_spill] sm:$0xff] }
 0x2fc   : > { %839 = vst [vmem:[#allocation2 + $0x2b0] sm:$0xff] %v5633_v24  ;;  %v2378_v24 = vld [vmem:[#allocation2 + $0x180] sm:$0xff]  ;;  %v1472_v16 = vadd.f32 %v8551_v42, %v1332_v53  ;;  %v5686_v41 = vsel %vm965_vm2, %v5603_v63, %v2476_v46  ;;  %v5689_v47 = vsel %vm965_vm2, %v2476_v46, %v2478_v45  ;;  %v2381_v63 = vld [vmem:[#allocation2 + $0x1b0] sm:$0xff]  ;;  %v8567_v46 = vld [vmem:[#allocation56_spill] sm:$0xff] }
 0x2fd   : > { %8540 = vst [vmem:[#allocation18_spill] sm:$0xff] %v5649_v27  ;;  %1999 = vrot.lane.b32.xlu1 %v1936_v23, %s4120_s26  ;;  %1995 = vrot.lane.b32.xlu2 %v1932_v8, %s4120_s26  ;;  %v8554_v23 = vld [vmem:[#allocation45_spill] sm:$0xff]  ;;  %v8566_v27 = vld [vmem:[#allocation52_spill] sm:$0xff] }
 0x2fe   : > { %8542 = vst [vmem:[#allocation21_spill] sm:$0xff] %v5654_v20  ;;  %v8548_v20 = vld [vmem:[#allocation38_spill] sm:$0xff]  ;;  %1997 = vrot.lane.b32.xlu0 %v1934_v11, %s4120_s26  ;;  %v1342_v8 = vadd.f32 %v8554_v23, %v1140_v14  ;;  %v1344_v11 = vadd.f32 %v8560_v56, %v1142_v54  ;;  %v8562_v14 = vld [vmem:[#allocation51_spill] sm:$0xff]  ;;  %v5702_v37 = vadd.f32 %v8566_v27, %v1470_v36  ;;  %v2484_v56 = vrot.slane %v2379_v32, 1 }
 0x2ff   : > { %v1132_v12 = vadd.f32 %v4048_v25, %v8548_v20  ;;  %8552 = vst [vmem:[#allocation25_spill] sm:$0xff] %v5675_v1  ;;  %v2482_v20 = vrot.slane %v2378_v24, 1  ;;  %v5680_v25 = vpop.permute.xlu1 %1841  ;;  %v5682_v2 = vpop.permute.xlu2 %1855  ;;  %v8559_v24 = vld [vmem:[#allocation47_spill] sm:$0xff]  ;;  %v5695_v42 = vadd.f32 %v8562_v14, %v1481_v62  ;;  %v8569_v62 = vld [vmem:[#allocation58_spill] sm:$0xff]  ;;  %v5717_v27 = vsel %vm965_vm2, %v2478_v45, %v5675_v1 }
 0x300   : > { %620 = vst.msk [vmem:[#allocation2 + $0x208] sm:$0xff] %vm365_vm4, %v575_v49  ;;  %v1471_v53 = vadd.f32 %v8559_v24, %v1331_v4  ;;  %v4049_v49 = vld [vmem:[#allocation2 + $0x30] sm:$0xff]  ;;  %v5697_v48 = vpop.permute.xlu0 %1839  ;;  %v5699_v23 = vpop.f32.mrf.mxu0  ;;  %v2486_v36 = vrot.slane %v2380_v39, 1  ;;  %v2488_v32 = vrot.slane %v2381_v63, 1  ;;  %v1143_v45 = vadd.f32 %v5335_v50, %v8579_v43  ;;  %v8580_v39 = vld [vmem:[#allocation91_spill] sm:$0xff] }
 0x301   : > { %8555 = vst [vmem:[#allocation24_spill] sm:$0xff] %v5680_v25  ;;  %v1131_v9 = vadd.f32 %v4049_v49, %v8561_v61  ;;  %v4050_v4 = vld [vmem:[#allocation2 + $0x50] sm:$0xff]  ;;  %v5708_v49 = vld [vmem:[#allocation2 + $0x1c0] sm:$0xff]  ;;  %v5713_v14 = vsel %vm965_vm2, %v5675_v1, %v2482_v20  ;;  %v8581_v63 = vrot.slane %v5220_v3, 1  ;;  %v8586_v50 = vrot.slane %v5590_v6, 1 }
 0x302   : > { %8556 = vst [vmem:[#allocation23_spill] sm:$0xff] %v5682_v2  ;;  %v1141_v2 = vadd.f32 %v5302_v51, %v8567_v46  ;;  %v8568_v24 = vld [vmem:[#allocation57_spill] sm:$0xff]  ;;  %v577_v43 = vpop.f32.mrf.mxu3  ;;  %v5761_v6 = vsel %vm965_vm2, %v2486_v36, %v2488_v32 }
 0x303   : > { %8557 = vst [vmem:[#allocation29_spill] sm:$0xff] %v5686_v41  ;;  %v1133_v54 = vadd.f32 %v4050_v4, %v8568_v24  ;;  %v1333_v61 = vadd.f32 %v8569_v62, %v1131_v9  ;;  %v8572_v51 = vld [vmem:[#allocation61_spill] sm:$0xff]  ;;  %v8574_v24 = vld [vmem:[#allocation63_spill] sm:$0xff]  ;;  %v8577_v9 = vld [vmem:[#allocation66_spill] sm:$0xff] }
 0x304   : > { %8558 = vst [vmem:[#allocation32_spill] sm:$0xff] %v5689_v47  ;;  %v1343_v46 = vadd.f32 %v8572_v51, %v1141_v2  ;;  %v1482_v25 = vadd.f32 %v8574_v24, %v1342_v8  ;;  %v1612_v62 = vadd.f32 %v8577_v9, %v1472_v16  ;;  %v1136_v2 = vadd.f32 %v5289_v10, %v8580_v39  ;;  %v8583_v16 = vld [vmem:[#allocation69_spill] sm:$0xff]  ;;  %v8584_v8 = vld [vmem:[#allocation70_spill] sm:$0xff]  ;;  %v8590_v51 = vld [vmem:[#allocation95_spill] sm:$0xff] }
 0x305   : > { %8563 = vst [vmem:[#allocation34_spill] sm:$0xff] %v5695_v42  ;;  %v1473_v18 = vadd.f32 %v8578_v57, %v1333_v61  ;;  %v2490_v42 = vrot.slane %v5708_v49, 1  ;;  %2534 = vrot.lane.b32.xlu1 %v5620_v40, %s4115_s21  ;;  %2001 = vrot.lane.b32.xlu2 %v8581_v63, %s4120_s26  ;;  %v1334_v57 = vadd.f32 %v8583_v16, %v1132_v12  ;;  %v2383_v3 = vld [vmem:[#allocation2 + $0x1d0] sm:$0xff]  ;;  %v5751_v40 = vld [vmem:[#allocation2 + $0x1e0] sm:$0xff]  ;;  %v8589_v61 = vld [vmem:[#allocation76_spill] sm:$0xff] }
 0x306   : > { %8564 = vst [vmem:[#allocation38_spill] sm:$0xff] %v5697_v48  ;;  %v8573_v48 = vld [vmem:[#allocation62_spill] sm:$0xff]  ;;  %2532 = vrot.lane.b32.xlu0 %v8586_v50, %s4115_s21  ;;  %v5749_v10 = vsel %vm965_vm2, %v2484_v56, %v2486_v36  ;;  %v1345_v12 = vadd.f32 %v8589_v61, %v1143_v45  ;;  %v8595_v39 = vld [vmem:[#allocation80_spill] sm:$0xff]  ;;  %v8596_v16 = vld [vmem:[#allocation97_spill] sm:$0xff] }
 0x307   : > { %8565 = vst [vmem:[#allocation39_spill] sm:$0xff] %v5699_v23  ;;  %v1335_v4 = vadd.f32 %v8573_v48, %v1133_v54  ;;  %v1484_v48 = vadd.f32 %v8584_v8, %v1344_v11  ;;  %v1338_v11 = vadd.f32 %v8590_v51, %v1136_v2  ;;  %v5756_v24 = vpop.permute.xlu1 %1847  ;;  %v1145_v63 = vadd.f32 %v5348_v31, %v8595_v39  ;;  %v5771_v2 = vld [vmem:[#allocation2 + $0x88] sm:$0xff]  ;;  %v5773_v8 = vld [vmem:[#allocation2 + $0x98] sm:$0xff]  ;;  %v8599_v36 = vld [vmem:[#allocation81_spill] sm:$0xff] }
 0x308   : > { %841 = vst [vmem:[#allocation2 + $0x2c0] sm:$0xff] %v5699_v23  ;;  %v8575_v23 = vld [vmem:[#allocation65_spill] sm:$0xff]  ;;  %v5769_v45 = vpop.permute.xlu0 %1845  ;;  %v5779_v50 = vadd.f32 %v8599_v36, %v1482_v25  ;;  %v2494_v31 = vrot.slane %v5751_v40, 1  ;;  %v8602_v61 = vld [vmem:[#allocation83_spill] sm:$0xff]  ;;  %v8163_v40 = vrot.slane %v5771_v2, 2 }
 0x309   : > { %8570 = vst [vmem:[#allocation44_spill] sm:$0xff] %v5713_v14  ;;  %v5723_v26 = vadd.f32 %v8575_v23, %v1480_v17  ;;  %v5738_v17 = vsel %vm965_vm2, %v2482_v20, %v2484_v56  ;;  %v8585_v23 = vld [vmem:[#allocation74_spill] sm:$0xff]  ;;  %v8588_v20 = vld [vmem:[#allocation75_spill] sm:$0xff]  ;;  %v1347_v51 = vadd.f32 %v8602_v61, %v1145_v63  ;;  %v8607_v25 = vld [vmem:[#allocation85_spill] sm:$0xff]  ;;  %v8162_v63 = vrot.slane %v5773_v8, 2 }
 0x30a   : > { %8571 = vst [vmem:[#allocation33_spill] sm:$0xff] %v5717_v27  ;;  %v5743_v54 = vadd.f32 %v8585_v23, %v1471_v53  ;;  %v1475_v49 = vadd.f32 %v8588_v20, %v1335_v4  ;;  %v5758_v53 = vpop.permute.xlu2 %1861  ;;  %v8594_v56 = vld [vmem:[#allocation79_spill] sm:$0xff]  ;;  %v1135_v4 = vadd.f32 %v5270_v44, %v8596_v16  ;;  %v5776_v23 = vsel %vm965_vm2, %v2488_v32, %v2490_v42  ;;  %v8604_v16 = vld [vmem:[#allocation100_spill] sm:$0xff]  ;;  %v5787_v32 = vpop.f32.mrf.mxu0  ;;  %v8609_v61 = vld [vmem:[#allocation86_spill] sm:$0xff] }
 0x30b   : > { %8576 = vst [vmem:[#allocation43_spill] sm:$0xff] %v5723_v26  ;;  %v1483_v9 = vadd.f32 %v8594_v56, %v1343_v46  ;;  %v2492_v20 = vrot.slane %v2383_v3, 1  ;;  %v4051_v44 = vld [vmem:[#allocation2 + $0x60] sm:$0xff]  ;;  %v8603_v56 = vld [vmem:[#allocation84_spill] sm:$0xff]  ;;  %v2385_v26 = vld [vmem:[#allocation2 + $0x1f0] sm:$0xff]  ;;  %v1144_v36 = vadd.f32 %v5327_v59, %v8607_v25 }
 0x30c   : > { %8582 = vst [vmem:[#allocation45_spill] sm:$0xff] %v5738_v17  ;;  %v1134_v39 = vadd.f32 %v4051_v44, %v8603_v56  ;;  %v1337_v1 = vadd.f32 %v8604_v16, %v1135_v4  ;;  %v5796_v4 = vadd.f32 %v8609_v61, %v1484_v48  ;;  %v8610_v44 = vld [vmem:[#allocation87_spill] sm:$0xff]  ;;  %v1758_v16 = vadd.f32 %v5265_v35, %v1612_v62  ;;  %v2387_v25 = vld [vmem:[#allocation2 + $0x210] sm:$0xff]  ;;  %v8616_v35 = vld [vmem:[#allocation14_spill] sm:$0xff] }
 0x30d   : > { %8587 = vst [vmem:[#allocation47_spill] sm:$0xff] %v5749_v10  ;;  %2540 = vrot.lane.b32.xlu1 %v5686_v41, %s4115_s21  ;;  %2536 = vrot.lane.b32.xlu2 %v5639_v19, %s4115_s21  ;;  %v5810_v48 = vsel %vm965_vm2, %v2490_v42, %v2492_v20  ;;  %v5819_v61 = vld [vmem:[#allocation2 + $0x220] sm:$0xff] }
 0x30e   : > { %8591 = vst [vmem:[#allocation48_spill] sm:$0xff] %v5756_v24  ;;  %v1477_v62 = vadd.f32 %v8616_v35, %v1337_v1  ;;  %2538 = vrot.lane.b32.xlu0 %v5643_v60, %s4115_s21 }
 0x30f   : > { %8592 = vst [vmem:[#allocation50_spill] sm:$0xff] %v5758_v53  ;;  %v8605_v53 = vld [vmem:[#allocation102_spill] sm:$0xff]  ;;  %v5830_v1 = vpop.permute.xlu1 %1853 }
 0x310   : > { %8593 = vst [vmem:[#allocation51_spill] sm:$0xff] %v5761_v6  ;;  %v5845_v35 = vpop.permute.xlu0 %1851 }
 0x311   : > { %622 = vst.msk [vmem:[#allocation2 + $0x218] sm:$0xff] %vm365_vm4, %v577_v43  ;;  %v8601_v43 = vld [vmem:[#allocation82_spill] sm:$0xff] }
 0x312   : > { %8597 = vst [vmem:[#allocation52_spill] sm:$0xff] %v5769_v45  ;;  %v1474_v46 = vadd.f32 %v8601_v43, %v1334_v57  ;;  %v4052_v45 = vld [vmem:[#allocation2 + $0x90] sm:$0xff]  ;;  %v8608_v57 = vld [vmem:[#allocation10_spill] sm:$0xff]  ;;  %v2386_v43 = vld [vmem:[#allocation2 + $0x200] sm:$0xff]  ;;  %v1942_v60 = vpop.permute.xlu2 %1941 }
 0x313   : > { %8598 = vst [vmem:[#allocation56_spill] sm:$0xff] %v5776_v23  ;;  %v1137_v24 = vadd.f32 %v4052_v45, %v8605_v53  ;;  %v1478_v3 = vadd.f32 %v8608_v57, %v1338_v11  ;;  %v1336_v53 = vadd.f32 %v8610_v44, %v1134_v39  ;;  %v8611_v45 = vld [vmem:[#allocation105_spill] sm:$0xff]  ;;  %v5807_v11 = vsel %vm965_vm2, %v2492_v20, %v2494_v31  ;;  %v8615_v57 = vld [vmem:[#allocation92_spill] sm:$0xff]  ;;  %v8617_v44 = vld [vmem:[#allocation94_spill] sm:$0xff] }
 0x314   : > { %8600 = vst [vmem:[#allocation57_spill] sm:$0xff] %v5779_v50  ;;  %v8612_v50 = vld [vmem:[#allocation90_spill] sm:$0xff]  ;;  %v2496_v39 = vrot.slane %v2385_v26, 1  ;;  %v2498_v19 = vrot.slane %v2386_v43, 1  ;;  %v5822_v42 = vadd.f32 %v8617_v44, %v1483_v9  ;;  %v8619_v20 = vld [vmem:[#allocation96_spill] sm:$0xff] }
 0x315   : > { %8606 = vst [vmem:[#allocation58_spill] sm:$0xff] %v5787_v32  ;;  %v1339_v56 = vadd.f32 %v8611_v45, %v1137_v24  ;;  %v1346_v59 = vadd.f32 %v8612_v50, %v1144_v36  ;;  %v5813_v24 = vadd.f32 %v8615_v57, %v1473_v18  ;;  %v1898_v50 = vadd.f32 %v5486_v22, %v1758_v16  ;;  %v580_v36 = vpop.f32.mrf.mxu3  ;;  %v8620_v18 = vld [vmem:[#allocation19_spill] sm:$0xff]  ;;  %v8622_v43 = vld [vmem:[#allocation98_spill] sm:$0xff] }
 0x316   : > { %843 = vst [vmem:[#allocation2 + $0x2d0] sm:$0xff] %v5787_v32  ;;  %v5825_v26 = vadd.f32 %v8619_v20, %v1345_v12  ;;  %v5828_v45 = vadd.f32 %v8620_v18, %v1478_v3  ;;  %v2139_v22 = vsel %vm1165_vm3, %v8163_v40, %v8162_v63  ;;  %v1615_v9 = vadd.f32 %v8622_v43, %v1475_v49  ;;  %v8623_v16 = vld [vmem:[#allocation31_spill] sm:$0xff]  ;;  %v5847_v44 = vld [vmem:[#allocation2 + $0xb8] sm:$0xff]  ;;  %v5849_v20 = vld [vmem:[#allocation2 + $0xc8] sm:$0xff] }
 0x317   : > { %8613 = vst [vmem:[#allocation61_spill] sm:$0xff] %v5807_v11  ;;  %v1479_v57 = vadd.f32 %v8623_v16, %v1339_v56  ;;  %v5843_v12 = vld [vmem:[%s8112_s2] ss:$0 sm:$0xff]  ;;  %v2038_v3 = vadd.f32 %v1942_v60, %v1898_v50  ;;  %v2500_v18 = vrot.slane %v2387_v25, 1  ;;  %v8627_v60 = vld [vmem:[#allocation101_spill] sm:$0xff]  ;;  %v8628_v16 = vld [vmem:[#allocation28_spill] sm:$0xff]  ;;  %v5871_v41 = vsel %vm965_vm2, %v2496_v39, %v2498_v19  ;;  %2546 = vrot.lane.b32.xlu1 %v5713_v14, %s4115_s21 }
 0x318   : > { %8614 = vst [vmem:[#allocation62_spill] sm:$0xff] %v5810_v48  ;;  %v8625_v49 = vld [vmem:[#allocation99_spill] sm:$0xff]  ;;  %v1487_v43 = vadd.f32 %v8627_v60, %v1347_v51  ;;  %v5865_v63 = vadd.f32 %v8628_v16, %v1477_v62  ;;  %v8171_v40 = vmov 0.0   ;;  %v8631_v60 = vld [vmem:[#allocation104_spill] sm:$0xff]  ;;  %v5884_v16 = vpop.f32.mrf.mxu0  ;;  %2542 = vrot.lane.b32.xlu2 %v5689_v47, %s4115_s21  ;;  %2544 = vrot.lane.b32.xlu0 %v5717_v27, %s4115_s21  ;;  %v4055_v27 = vld [vmem:[#allocation2 + $0x170] sm:$0xff] }
 0x319   : > { %8618 = vst [vmem:[#allocation63_spill] sm:$0xff] %v5822_v42  ;;  %v1476_v56 = vadd.f32 %v8625_v49, %v1336_v53  ;;  %v2235_v25 = vadd.f32 %v2139_v22, %v2038_v3  ;;  %v2389_v53 = vld [vmem:[#allocation2 + $0x230] sm:$0xff]  ;;  %v5873_v49 = vld [vmem:[#allocation2 + $0x240] sm:$0xff]  ;;  %v8647_v32 = vld [vmem:[#allocation116_spill] sm:$0xff] }
 0x31a   : > { %8621 = vst [vmem:[#allocation65_spill] sm:$0xff] %v5830_v1  ;;  %v4053_v51 = vld [vmem:[#allocation2 + $0x140] sm:$0xff]  ;;  %v5944_v42 = vld [vmem:[#allocation2 + $0x78] sm:$0xfe] }
 0x31b   : > { %624 = vst.msk [vmem:[#allocation2 + $0x228] sm:$0xff] %vm365_vm4, %v580_v36  ;;  %v5860_v36 = vsel %vm965_vm2, %v2494_v31, %v2496_v39  ;;  %v8630_v31 = vld [vmem:[#allocation103_spill] sm:$0xff]  ;;  %v1148_v62 = vadd.f32 %v4053_v51, %v8631_v60  ;;  %v1761_v39 = vadd.f32 %v5317_v5, %v1615_v9  ;;  %v8634_v51 = vld [vmem:[#allocation106_spill] sm:$0xff]  ;;  %v2504_v5 = vrot.slane %v2389_v53, 1  ;;  %v8639_v9 = vld [vmem:[#allocation108_spill] sm:$0xff] }
 0x31c   : > { %8624 = vst [vmem:[#allocation66_spill] sm:$0xff] %v5845_v35  ;;  %v5876_v50 = vadd.f32 %v8630_v31, %v1474_v46  ;;  %v8632_v35 = vld [vmem:[#allocation49_spill] sm:$0xff]  ;;  %v2271_v46 = vadd.f32 %v5843_v12, %v2235_v25  ;;  %v5895_v31 = vsel %vm965_vm2, %v2498_v19, %v2500_v18  ;;  %v1486_v60 = vadd.f32 %v8634_v51, %v1346_v59 }
 0x31d   : > { %8626 = vst [vmem:[#allocation67_spill] sm:$0xff] %v5860_v36  ;;  %v5888_v1 = vadd.f32 %v8632_v35, %v1479_v57  ;;  %v8635_v57 = vrot.slane %v5819_v61, 1  ;;  %v8637_v35 = vld [vmem:[#allocation107_spill] sm:$0xff]  ;;  %v4054_v25 = vld [vmem:[#allocation2 + $0x130] sm:$0xff]  ;;  %v1901_v3 = vadd.f32 %v5499_v28, %v1761_v39  ;;  %v582_v53 = vpop.f32.mrf.mxu3  ;;  %v5920_v14 = vadd.f32 %v8639_v9, %v1476_v56  ;;  %v8645_v56 = vld [vmem:[#allocation112_spill] sm:$0xff] }
 0x31e   : > { %3867 = vst.msk [vmem:[%s5856_s4] sm:$0xff] %vm365_vm4, %v8171_v40  ;;  %v1350_v59 = vadd.f32 %v8637_v35, %v1148_v62  ;;  %v8638_v51 = vld [vmem:[#allocation109_spill] sm:$0xff]  ;;  %v2304_v47 = vmax.f32 %v2271_v46, 0.0  ;;  %v8641_v62 = vld [vmem:[#allocation111_spill] sm:$0xff]  ;;  %v8643_v28 = vrot.slane %v5849_v20, 2  ;;  %v8644_v39 = vrot.slane %v5847_v44, 2 }
 0x31f   : > { %8629 = vst [vmem:[#allocation71_spill] sm:$0xff] %v5871_v41  ;;  %v5909_v19 = vsel %vm965_vm2, %v2500_v18, %v8635_v57  ;;  %v1147_v22 = vadd.f32 %v4054_v25, %v8638_v51  ;;  %v8640_v18 = vld [vmem:[#allocation110_spill] sm:$0xff]  ;;  %v1146_v35 = vadd.f32 %v5352_v30, %v8641_v62  ;;  %v5927_v25 = vpop.permute.xlu1 %1859  ;;  %v1948_v51 = vpop.permute.xlu2 %1947  ;;  %v1151_v30 = vadd.f32 %v4055_v27, %v8647_v32 }
 0x320   : > { %3868 = vst.msk [vmem:[%s5856_s4 + $0x8] sm:$0xff] %vm365_vm4, %v8171_v40  ;;  %v5923_v57 = vadd.f32 %v8640_v18, %v1487_v43  ;;  %v2145_v46 = vsel %vm1165_vm3, %v8644_v39, %v8643_v28  ;;  %v8646_v43 = vld [vmem:[#allocation113_spill] sm:$0xff]  ;;  %v2041_v62 = vadd.f32 %v1948_v51, %v1901_v3  ;;  %v5946_v28 = vld [vmem:[#allocation2 + $0xe8] sm:$0xff]  ;;  %v5948_v39 = vld [vmem:[#allocation2 + $0xf8] sm:$0xff]  ;;  %v8653_v27 = vmov 0.0   ;;  %2552 = vrot.lane.b32.xlu1 %v5761_v6, %s4115_s21 }
 0x321   : > { %3869 = vst.msk [vmem:[%s5856_s4 + $0x10] sm:$0xff] %vm365_vm4, %v8171_v40  ;;  %v1349_v9 = vadd.f32 %v8645_v56, %v1147_v22  ;;  %v1490_v18 = vadd.f32 %v8646_v43, %v1350_v59  ;;  %v8650_v22 = vld [vmem:[#allocation115_spill] sm:$0xff]  ;;  %v8651_v59 = vld [vmem:[#allocation117_spill] sm:$0xff]  ;;  %v8656_v3 = vld [vmem:[#allocation118_spill] sm:$0xff]  ;;  %2548 = vrot.lane.b32.xlu2 %v5738_v17, %s4115_s21  ;;  %2550 = vrot.lane.b32.xlu0 %v5749_v10, %s4115_s21 }
 0x322   : > { %8633 = vst [vmem:[#allocation91_spill] sm:$0xff] %v5895_v31  ;;  %v5952_v56 = vadd.f32 %v8650_v22, %v1486_v60  ;;  %v5956_v43 = vadd.f32 %v8651_v59, %v5825_v26  ;;  %v8657_v60 = vrot.slane %v5819_v61, 1  ;;  %v2135_v59 = vrot.slane %v5944_v42, 2  ;;  %v8661_v42 = vld [vmem:[#allocation121_spill] sm:$0xff] }
 0x323   : > { %3870 = vst.msk [vmem:[%s5856_s4 + $0x18] sm:$0xff] %vm365_vm4, %v8171_v40  ;;  %v1489_v51 = vadd.f32 %v8656_v3, %v1349_v9  ;;  %v8660_v9 = vld [vmem:[#allocation120_spill] sm:$0xff]  ;;  %v1757_v61 = vadd.f32 %v5315_v34, %v5743_v54  ;;  %v4057_v3 = vld [vmem:[#allocation2 + $0x150] sm:$0xff] }
 0x324   : > { %8636 = vst [vmem:[#allocation69_spill] sm:$0xff] %v5909_v19  ;;  %v5974_v26 = vsel %vm965_vm2, %v8657_v60, %v2504_v5  ;;  %v8662_v60 = vld [vmem:[#allocation122_spill] sm:$0xff] }
 0x325   : > { %3871 = vst.msk [vmem:[%s5856_s4 + $0x1a0] sm:$0xff] %vm365_vm4, %v8171_v40 }
 0x326   : > { %8642 = vst [vmem:[#allocation70_spill] sm:$0xff] %v5927_v25  ;;  %v5942_v25 = vpop.permute.xlu0 %1857 }
 0x327   : > { %3872 = vst.msk [vmem:[%s5856_s4 + $0x1a8] sm:$0xff] %vm365_vm4, %v8171_v40  ;;  %v8649_v40 = vld [vmem:[#allocation114_spill] sm:$0xff] }
 0x328   : > { %2338 = vst.msk [vmem:[%s5856_s4 + $0x29] sm:$0xff] %vm365_vm4, %v2304_v47  ;;  %v1348_v19 = vadd.f32 %v8649_v40, %v1146_v35  ;;  %v8654_v47 = vrot.slane %v5873_v49, 1  ;;  %v2238_v40 = vadd.f32 %v2145_v46, %v2041_v62  ;;  %v8659_v35 = vld [vmem:[#allocation119_spill] sm:$0xff]  ;;  %v5991_v62 = vadd.f32 %v8661_v42, %v1490_v18  ;;  %v6023_v42 = vld [vmem:[#allocation2 + $0x118] sm:$0xff]  ;;  %2558 = vrot.lane.b32.xlu1 %v5807_v11, %s4115_s21 }
 0x329   : > { %8648 = vst [vmem:[#allocation74_spill] sm:$0xff] %v5942_v25  ;;  %v1353_v25 = vadd.f32 %v5043_v52, %v1151_v30  ;;  %v5981_v52 = vpop.f32.mrf.mxu0  ;;  %v4056_v46 = vld [vmem:[#allocation2 + $0x160] sm:$0xff]  ;;  %2554 = vrot.lane.b32.xlu2 %v5776_v23, %s4115_s21  ;;  %2556 = vrot.lane.b32.xlu0 %v5810_v48, %s4115_s21 }
 0x32a   : > { %8652 = vst [vmem:[#allocation75_spill] sm:$0xff] %v5956_v43  ;;  %v5964_v32 = vsel %vm965_vm2, %v2504_v5, %v8654_v47  ;;  %v1488_v22 = vadd.f32 %v8659_v35, %v1348_v19  ;;  %v8175_v43 = vrot.slane %v5948_v39, 2  ;;  %v1150_v30 = vadd.f32 %v4056_v46, %v8660_v9  ;;  %v1954_v9 = vpop.permute.xlu2 %1953 }
 0x32b   : > { %3873 = vst.msk [vmem:[%s5856_s4 + $0x1b0] sm:$0xff] %vm365_vm4, %v8653_v27  ;;  %v1764_v5 = vadd.f32 %v5342_v33, %v5828_v45  ;;  %v2274_v19 = vadd.f32 %v5843_v12, %v2238_v40  ;;  %v1149_v35 = vadd.f32 %v4057_v3, %v8662_v60  ;;  %v1756_v47 = vadd.f32 %v5344_v55, %v5702_v37  ;;  %v585_v55 = vpop.f32.mrf.mxu3  ;;  %v8663_v37 = vld [vmem:[#allocation123_spill] sm:$0xff]  ;;  %v6025_v3 = vld [vmem:[#allocation2 + $0x128] sm:$0xff]  ;;  %v775_v60 = vpop.f32.mrf.mxu1 }
 0x32c   : > { %8655 = vst [vmem:[#allocation76_spill] sm:$0xff] %v5964_v32  ;;  %v1352_v34 = vadd.f32 %v5074_v7, %v1150_v30  ;;  %v1897_v33 = vadd.f32 %v5510_v38, %v1757_v61  ;;  %v6007_v18 = vadd.f32 %v8663_v37, %v1353_v25  ;;  %v8664_v46 = vrot.slane %v5771_v2, 2  ;;  %v1940_v7 = vpop.permute.xlu1 %1939  ;;  %v8666_v30 = vld [vmem:[#allocation124_spill] sm:$0xff]  ;;  %v4058_v25 = vld [vmem:[#allocation2 + $0x1a0] sm:$0xff] }
 0x32d   : > { %3874 = vst.msk [vmem:[%s5856_s4 + $0x1b8] sm:$0xff] %vm365_vm4, %v8653_v27  ;;  %v1904_v54 = vadd.f32 %v5512_v13, %v1764_v5  ;;  %v2307_v45 = vmax.f32 %v2274_v19, 0.0  ;;  %v1896_v40 = vadd.f32 %v5514_v58, %v1756_v47  ;;  %v8665_v38 = vrot.slane %v5946_v28, 2  ;;  %v2072_v19 = vld [vmem:[#allocation2 + $0xa8] sm:$0xff] }
 0x32e   : > { %8658 = vst [vmem:[#allocation95_spill] sm:$0xff] %v5974_v26  ;;  %v1351_v61 = vadd.f32 %v8666_v30, %v1149_v35  ;;  %v1154_v5 = vadd.f32 %v4058_v25, %v5093_v29  ;;  %v2037_v58 = vadd.f32 %v1940_v7, %v1897_v33  ;;  %v1938_v47 = vpop.permute.xlu0 %1937  ;;  %v6028_v37 = vadd.f32 %v5091_v15, %v1489_v51  ;;  %v8671_v25 = vld [vmem:[#allocation164_spill] sm:$0xff] }
 0x32f   : > { %845 = vst [vmem:[#allocation2 + $0x2e0] sm:$0xff] %v5884_v16  ;;  %v2151_v13 = vsel %vm1165_vm3, %v8665_v38, %v8175_v43  ;;  %v2044_v2 = vadd.f32 %v1954_v9, %v1904_v54  ;;  %v6034_v35 = vadd.f32 %v5112_v0, %v1352_v34  ;;  %v2036_v29 = vadd.f32 %v1938_v47, %v1896_v40  ;;  %v8668_v54 = vld [vmem:[#allocation8_spill] sm:$0xff]  ;;  %v8669_v0 = vld [vmem:[#allocation34_spill] sm:$0xff]  ;;  %v8670_v34 = vld [vmem:[#allocation163_spill] sm:$0xff] }
 0x330   : > { %847 = vst [vmem:[#allocation2 + $0x2f0] sm:$0xff] %v5981_v52  ;;  %v1356_v33 = vadd.f32 %v5114_v21, %v1154_v5  ;;  %v2140_v30 = vrot.slane %v2072_v19, 2  ;;  %v8176_v15 = vrot.slane %v6023_v42, 2  ;;  %v8174_v51 = vrot.slane %v6025_v3, 2  ;;  %v8673_v5 = vld [vmem:[#allocation4_spill] sm:$0xff]  ;;  %2564 = vrot.lane.b32.xlu1 %v5895_v31, %s4115_s21 }
 0x331   : > { %626 = vst.msk [vmem:[#allocation2 + $0x238] sm:$0xff] %vm365_vm4, %v582_v53  ;;  %v2137_v53 = vsel %vm1165_vm3, %v2135_v59, %v8664_v46  ;;  %v2241_v38 = vadd.f32 %v2151_v13, %v2044_v2  ;;  %v2233_v9 = vadd.f32 %v2135_v59, %v2036_v29  ;;  %v1767_v40 = vadd.f32 %v8670_v34, %v8669_v0  ;;  %v4059_v59 = vld [vmem:[#allocation2 + $0x190] sm:$0xff] }
 0x332   : > { %628 = vst.msk [vmem:[#allocation2 + $0x248] sm:$0xff] %vm365_vm4, %v585_v55  ;;  %v8667_v55 = vld [vmem:[#allocation125_spill] sm:$0xff]  ;;  %v2234_v7 = vadd.f32 %v2137_v53, %v2037_v58  ;;  %v1759_v47 = vadd.f32 %v8671_v25, %v5813_v24  ;;  %v8672_v53 = vld [vmem:[#allocation127_spill] sm:$0xff]  ;;  %v2157_v34 = vsel %vm1165_vm3, %v8176_v15, %v8174_v51  ;;  %2560 = vrot.lane.b32.xlu2 %v5860_v36, %s4115_s21 }
 0x333   : > { %2341 = vst.msk [vmem:[%s5856_s4 + $0x41] sm:$0xff] %vm365_vm4, %v2307_v45  ;;  %v6031_v46 = vadd.f32 %v8667_v55, %v1488_v22  ;;  %v1760_v45 = vadd.f32 %v8668_v54, %v5876_v50  ;;  %v6042_v22 = vpop.f32.mrf.mxu0  ;;  %v2277_v50 = vadd.f32 %v5843_v12, %v2241_v38  ;;  %v1153_v13 = vadd.f32 %v4059_v59, %v8672_v53  ;;  %v8674_v24 = vld [vmem:[#allocation5_spill] sm:$0xff]  ;;  %v4060_v25 = vld [vmem:[#allocation2 + $0x180] sm:$0xff] }
 0x334   : > { %826 = vst.msk [vmem:[#allocation2 + $0x248] sm:$0xff] %vm365_vm4, %v775_v60  ;;  %v2270_v21 = vadd.f32 %v5843_v12, %v2234_v7  ;;  %v2269_v2 = vadd.f32 %v5843_v12, %v2233_v9  ;;  %v1907_v19 = vadd.f32 %v8674_v24, %v1767_v40  ;;  %v8675_v60 = vld [vmem:[#allocation22_spill] sm:$0xff]  ;;  %v587_v7 = vpop.f32.mrf.mxu3  ;;  %v8676_v38 = vrot.slane %v5847_v44, 2  ;;  %v1946_v0 = vpop.permute.xlu1 %1945  ;;  %v6077_v24 = vld [vmem:[#allocation2 + $0x148] sm:$0xff]  ;;  %2562 = vrot.lane.b32.xlu0 %v5871_v41, %s4115_s21 }
 0x335   : > { %849 = vst [vmem:[#allocation2 + $0x300] sm:$0xff] %v6042_v22  ;;  %v1900_v58 = vadd.f32 %v8673_v5, %v1760_v45  ;;  %v1899_v55 = vadd.f32 %v8675_v60, %v1759_v47  ;;  %v2310_v54 = vmax.f32 %v2277_v50, 0.0  ;;  %v1960_v40 = vpop.permute.xlu2 %1959  ;;  %v8677_v47 = vld [vmem:[#allocation129_spill] sm:$0xff]  ;;  %v8678_v59 = vrot.slane %v5773_v8, 2  ;;  %v6079_v60 = vld [vmem:[#allocation2 + $0x158] sm:$0xff] }
 0x336   : > { %v2303_v29 = vmax.f32 %v2270_v21, 0.0  ;;  %v2302_v45 = vmax.f32 %v2269_v2, 0.0  ;;  %v2143_v9 = vsel %vm1165_vm3, %v2140_v30, %v8676_v38  ;;  %630 = vst.msk [vmem:[#allocation2 + $0x258] sm:$0xff] %vm365_vm4, %v587_v7  ;;  %v1152_v21 = vadd.f32 %v4060_v25, %v8677_v47  ;;  %v1944_v5 = vpop.permute.xlu0 %1943  ;;  %v2075_v2 = vld [vmem:[#allocation2 + $0xd8] sm:$0xff]  ;;  %v777_v38 = vpop.f32.mrf.mxu1  ;;  %v8680_v25 = vld [vmem:[#allocation128_spill] sm:$0xff] }
 0x337   : > { %v2040_v44 = vadd.f32 %v1946_v0, %v1900_v58  ;;  %v2047_v50 = vadd.f32 %v1960_v40, %v1907_v19  ;;  %v2141_v53 = vsel %vm1165_vm3, %v8678_v59, %v2140_v30  ;;  %v8679_v7 = vld [vmem:[#allocation126_spill] sm:$0xff]  ;;  %v6084_v47 = vadd.f32 %v8680_v25, %v6007_v18  ;;  %2344 = vst.msk [vmem:[%s5856_s4 + $0x59] sm:$0xff] %vm365_vm4, %v2310_v54  ;;  %v8682_v19 = vld [vmem:[#allocation131_spill] sm:$0xff]  ;;  %v8683_v0 = vld [vmem:[#allocation132_spill] sm:$0xff] }
 0x338   : > { %2337 = vst.msk [vmem:[%s5856_s4 + $0x21] sm:$0xff] %vm365_vm4, %v2303_v29  ;;  %v1491_v51 = vadd.f32 %v8679_v7, %v1351_v61  ;;  %v8681_v29 = vld [vmem:[#allocation130_spill] sm:$0xff]  ;;  %v2039_v8 = vadd.f32 %v1944_v5, %v1899_v55  ;;  %v1496_v30 = vadd.f32 %v8682_v19, %v1356_v33  ;;  %v1354_v40 = vadd.f32 %v8683_v0, %v1152_v21  ;;  %v8685_v33 = vld [vmem:[#allocation35_spill] sm:$0xff] }
 0x339   : > { %v1355_v58 = vadd.f32 %v8681_v29, %v1153_v13  ;;  %2336 = vst.msk [vmem:[%s5856_s4 + $0x19] sm:$0x80] %vm2335_vm5, %v2302_v45  ;;  %v2237_v59 = vadd.f32 %v2143_v9, %v2040_v44  ;;  %v2244_v43 = vadd.f32 %v2157_v34, %v2047_v50  ;;  %v2146_v48 = vrot.slane %v2075_v2, 2  ;;  %v8684_v13 = vld [vmem:[#allocation20_spill] sm:$0xff]  ;;  %v4061_v9 = vld [vmem:[#allocation2 + $0x1d0] sm:$0xff]  ;;  %v8686_v34 = vld [vmem:[#allocation134_spill] sm:$0xff]  ;;  %2570 = vrot.lane.b32.xlu1 %v5964_v32, %s4115_s21 }
 0x33a   : > { %v2236_v15 = vadd.f32 %v2141_v53, %v2039_v8  ;;  %v8182_v61 = vrot.slane %v6077_v24, 2  ;;  %v8180_v18 = vrot.slane %v6079_v60, 2  ;;  %828 = vst.msk [vmem:[#allocation2 + $0x258] sm:$0xff] %vm365_vm4, %v777_v38  ;;  %v1763_v55 = vadd.f32 %v8684_v13, %v5865_v63  ;;  %v8687_v50 = vld [vmem:[#allocation13_spill] sm:$0xff]  ;;  %v8688_v63 = vld [vmem:[#allocation7_spill] sm:$0xff] }
 0x33b   : > { %v748_v7 = vpop.f32.mrf.mxu0  ;;  %v1770_v54 = vadd.f32 %v8685_v33, %v5796_v4  ;;  %v2273_v21 = vadd.f32 %v5843_v12, %v2237_v59  ;;  %v2280_v45 = vadd.f32 %v5843_v12, %v2244_v43  ;;  %v1157_v44 = vadd.f32 %v4061_v9, %v8686_v34  ;;  %v8689_v2 = vld [vmem:[#allocation9_spill] sm:$0xff]  ;;  %v2078_v34 = vld [vmem:[#allocation2 + $0x108] sm:$0xff] }
 0x33c   : > { %851 = vst [vmem:[#allocation2 + $0x310] sm:$0xff] %v748_v7  ;;  %v1762_v53 = vadd.f32 %v8687_v50, %v5920_v14  ;;  %v2272_v5 = vadd.f32 %v5843_v12, %v2236_v15  ;;  %v1903_v4 = vadd.f32 %v8688_v63, %v1763_v55  ;;  %v590_v29 = vpop.f32.mrf.mxu3  ;;  %v8690_v14 = vld [vmem:[#allocation54_spill] sm:$0xff]  ;;  %v8691_v19 = vrot.slane %v5946_v28, 2  ;;  %v1952_v59 = vpop.permute.xlu1 %1951  ;;  %v8692_v55 = vld [vmem:[#allocation133_spill] sm:$0xff]  ;;  %v8694_v63 = vld [vmem:[#allocation135_spill] sm:$0xff]  ;;  %2568 = vrot.lane.b32.xlu0 %v5974_v26, %s4115_s21 }
 0x33d   : > { %v1910_v43 = vadd.f32 %v8689_v2, %v1770_v54  ;;  %v2306_v38 = vmax.f32 %v2273_v21, 0.0  ;;  %v2313_v25 = vmax.f32 %v2280_v45, 0.0  ;;  %v2163_v7 = vsel %vm1165_vm3, %v8182_v61, %v8180_v18  ;;  %v1966_v13 = vpop.permute.xlu2 %1965  ;;  %632 = vst.msk [vmem:[#allocation2 + $0x268] sm:$0xff] %vm365_vm4, %v590_v29  ;;  %v6133_v50 = vld [vmem:[#allocation2 + $0x178] sm:$0xff]  ;;  %v8695_v2 = vld [vmem:[#allocation136_spill] sm:$0xff] }
 0x33e   : > { %v1902_v8 = vadd.f32 %v8690_v14, %v1762_v53  ;;  %v2305_v15 = vmax.f32 %v2272_v5, 0.0  ;;  %v2149_v0 = vsel %vm1165_vm3, %v2146_v48, %v8691_v19  ;;  %v6126_v33 = vadd.f32 %v8692_v55, %v6034_v35  ;;  %v1950_v9 = vpop.permute.xlu0 %1949  ;;  %v6135_v53 = vld [vmem:[#allocation2 + $0x188] sm:$0xff]  ;;  %v780_v5 = vpop.f32.mrf.mxu1  ;;  %v8699_v55 = vld [vmem:[#allocation43_spill] sm:$0xff]  ;;  %v8714_v18 = vld [vmem:[#allocation30_spill] sm:$0xff] }
 0x33f   : > { %2340 = vst.msk [vmem:[%s5856_s4 + $0x39] sm:$0xff] %vm365_vm4, %v2306_v38  ;;  %v2043_v28 = vadd.f32 %v1952_v59, %v1903_v4  ;;  %v2050_v54 = vadd.f32 %v1966_v13, %v1910_v43  ;;  %v8693_v21 = vrot.slane %v5849_v20, 2  ;;  %v6138_v35 = vadd.f32 %v8694_v63, %v1491_v51  ;;  %v8696_v4 = vld [vmem:[#allocation137_spill] sm:$0xff]  ;;  %v8698_v14 = vld [vmem:[#allocation140_spill] sm:$0xff] }
 0x340   : > { %v6141_v38 = vadd.f32 %v8695_v2, %v1355_v58  ;;  %v1359_v43 = vadd.f32 %v8696_v4, %v1157_v44  ;;  %2347 = vst.msk [vmem:[%s5856_s4 + $0x71] sm:$0xff] %vm365_vm4, %v2313_v25  ;;  %v2042_v20 = vadd.f32 %v1950_v9, %v1902_v8  ;;  %v6150_v19 = vadd.f32 %v8698_v14, %v1496_v30  ;;  %v6154_v51 = vld [vmem:[#allocation2 + $0x250] sm:$0xff]  ;;  %v8700_v30 = vld [vmem:[#allocation26_spill] sm:$0xff]  ;;  %v8705_v4 = vld [vmem:[#allocation55_spill] sm:$0xff] }
 0x341   : > { %v2147_v45 = vsel %vm1165_vm3, %v8693_v21, %v2146_v48  ;;  %v8697_v48 = vld [vmem:[#allocation138_spill] sm:$0xff]  ;;  %2339 = vst.msk [vmem:[%s5856_s4 + $0x31] sm:$0xff] %vm365_vm4, %v2305_v15  ;;  %v2240_v59 = vadd.f32 %v2149_v0, %v2043_v28  ;;  %v2247_v13 = vadd.f32 %v2163_v7, %v2050_v54  ;;  %v2152_v44 = vrot.slane %v2078_v34, 2  ;;  %v8701_v15 = vld [vmem:[#allocation53_spill] sm:$0xff]  ;;  %v8702_v54 = vld [vmem:[#allocation40_spill] sm:$0xff] }
 0x342   : > { %v6147_v29 = vadd.f32 %v8697_v48, %v1354_v40  ;;  %3875 = vst.msk [vmem:[%s5856_s4 + $0x30] sm:$0xff] %vm365_vm4, %v8653_v27  ;;  %v2239_v58 = vadd.f32 %v2147_v45, %v2042_v20  ;;  %v8181_v25 = vrot.slane %v6133_v50, 2  ;;  %v8179_v8 = vrot.slane %v6135_v53, 2  ;;  %v8703_v34 = vld [vmem:[#allocation69_spill] sm:$0xff]  ;;  %v8716_v61 = vld [vmem:[#allocation68_spill] sm:$0xff] }
 0x343   : > { %v6161_v40 = vpop.f32.mrf.mxu0  ;;  %v1766_v21 = vadd.f32 %v8700_v30, %v8699_v55  ;;  %v1773_v0 = vadd.f32 %v8701_v15, %v5923_v57  ;;  %v2276_v7 = vadd.f32 %v5843_v12, %v2240_v59  ;;  %v2283_v28 = vadd.f32 %v5843_v12, %v2247_v13  ;;  %2566 = vrot.lane.b32.xlu2 %v8703_v34, %s4115_s21  ;;  %v8704_v57 = vld [vmem:[#allocation27_spill] sm:$0xff]  ;;  %v8706_v13 = vld [vmem:[#allocation72_spill] sm:$0xff] }
 0x344   : > { %853 = vst [vmem:[#allocation2 + $0x320] sm:$0xff] %v6161_v40  ;;  %v1765_v45 = vadd.f32 %v8702_v54, %v5888_v1  ;;  %v2275_v9 = vadd.f32 %v5843_v12, %v2239_v58  ;;  %v2508_v63 = vrot.slane %v6154_v51, 1  ;;  %v6183_v1 = vld [vmem:[#allocation2 + $0x260] sm:$0xff]  ;;  %v592_v59 = vpop.f32.mrf.mxu3  ;;  %v8707_v30 = vrot.slane %v6023_v42, 2 }
 0x345   : > { %830 = vst.msk [vmem:[#allocation2 + $0x268] sm:$0xff] %vm365_vm4, %v780_v5  ;;  %v1906_v2 = vadd.f32 %v8704_v57, %v1766_v21  ;;  %v1913_v20 = vadd.f32 %v8705_v4, %v1773_v0  ;;  %v2309_v48 = vmax.f32 %v2276_v7, 0.0  ;;  %v2316_v14 = vmax.f32 %v2283_v28, 0.0  ;;  %v1958_v5 = vpop.permute.xlu1 %1957  ;;  %v1972_v0 = vpop.permute.xlu2 %1971  ;;  %v2081_v4 = vld [vmem:[#allocation2 + $0x138] sm:$0xff] }
 0x346   : > { %v1905_v58 = vadd.f32 %v8706_v13, %v1765_v45  ;;  %v2308_v55 = vmax.f32 %v2275_v9, 0.0  ;;  %v2155_v15 = vsel %vm1165_vm3, %v2152_v44, %v8707_v30  ;;  %v2169_v21 = vsel %vm1165_vm3, %v8181_v25, %v8179_v8  ;;  %634 = vst.msk [vmem:[#allocation2 + $0x278] sm:$0xff] %vm365_vm4, %v592_v59  ;;  %v1956_v45 = vpop.permute.xlu0 %1955  ;;  %v6200_v9 = vld [vmem:[#allocation2 + $0x270] sm:$0xff]  ;;  %v6203_v13 = vld [vmem:[#allocation2 + $0x1a8] sm:$0xff]  ;;  %v6205_v30 = vld [vmem:[#allocation2 + $0x1b8] sm:$0xff] }
 0x347   : > { %2343 = vst.msk [vmem:[%s5856_s4 + $0x51] sm:$0xff] %vm365_vm4, %v2309_v48  ;;  %v2046_v7 = vadd.f32 %v1958_v5, %v1906_v2  ;;  %v2053_v28 = vadd.f32 %v1972_v0, %v1913_v20  ;;  %v8708_v54 = vrot.slane %v5948_v39, 2  ;;  %v8709_v59 = vld [vmem:[#allocation143_spill] sm:$0xff]  ;;  %v2510_v2 = vrot.slane %v6183_v1, 1  ;;  %v782_v5 = vpop.f32.mrf.mxu1 }
 0x348   : > { %v6208_v48 = vadd.f32 %v8709_v59, %v1359_v43  ;;  %2350 = vst.msk [vmem:[%s5856_s4 + $0x89] sm:$0xff] %vm365_vm4, %v2316_v14  ;;  %v2045_v39 = vadd.f32 %v1956_v45, %v1905_v58  ;;  %v8712_v0 = vld [vmem:[#allocation63_spill] sm:$0xff]  ;;  %v1776_v25 = vadd.f32 %v8714_v18, %v5991_v62  ;;  %v2158_v58 = vrot.slane %v2081_v4, 2  ;;  %v8721_v4 = vld [vmem:[#allocation88_spill] sm:$0xff] }
 0x349   : > { %v2153_v42 = vsel %vm1165_vm3, %v8708_v54, %v2152_v44  ;;  %v8710_v44 = vrot.slane %v5873_v49, 1  ;;  %v8713_v54 = vld [vmem:[#allocation46_spill] sm:$0xff]  ;;  %2342 = vst.msk [vmem:[%s5856_s4 + $0x49] sm:$0xff] %vm365_vm4, %v2308_v55  ;;  %v2243_v43 = vadd.f32 %v2155_v15, %v2046_v7  ;;  %v2250_v59 = vadd.f32 %v2169_v21, %v2053_v28  ;;  %v8719_v15 = vld [vmem:[#allocation73_spill] sm:$0xff]  ;;  %v6248_v28 = vld [vmem:[#allocation2 + $0x280] sm:$0xff] }
 0x34a   : > { %v1769_v8 = vadd.f32 %v8713_v54, %v8712_v0  ;;  %3876 = vst.msk [vmem:[%s5856_s4 + $0x48] sm:$0xff] %vm365_vm4, %v8653_v27  ;;  %v2242_v14 = vadd.f32 %v2153_v42, %v2045_v39  ;;  %v8188_v49 = vrot.slane %v6203_v13, 2  ;;  %v8187_v45 = vrot.slane %v6205_v30, 2 }
 0x34b   : > { %v6216_v20 = vsel %vm965_vm2, %v8710_v44, %v2508_v63  ;;  %v8715_v44 = vld [vmem:[#allocation57_spill] sm:$0xff]  ;;  %v2279_v0 = vadd.f32 %v5843_v12, %v2243_v43  ;;  %v2286_v62 = vadd.f32 %v5843_v12, %v2250_v59  ;;  %v8717_v18 = vrot.slane %v6200_v9, 1  ;;  %832 = vst.msk [vmem:[#allocation2 + $0x278] sm:$0xff] %vm365_vm4, %v782_v5  ;;  %v8722_v5 = vld [vmem:[#allocation78_spill] sm:$0xff]  ;;  %v898_v59 = vld [vmem:[#allocation2 + $0x200] sm:$0x7f] }
 0x34c   : > { %8711 = vst [vmem:[#allocation79_spill] sm:$0xff] %v6216_v20  ;;  %v1768_v57 = vadd.f32 %v8716_v61, %v8715_v44  ;;  %v1909_v21 = vadd.f32 %v8719_v15, %v1769_v8  ;;  %v2278_v7 = vadd.f32 %v5843_v12, %v2242_v14  ;;  %2572 = vrot.lane.b32.xlu2 %v6216_v20, %s4115_s21  ;;  %v2514_v42 = vrot.slane %v6248_v28, 1  ;;  %v6270_v20 = vld [vmem:[#allocation2 + $0x1d8] sm:$0xff] }
 0x34d   : > { %v6236_v55 = vsel %vm965_vm2, %v2510_v2, %v8717_v18  ;;  %v6246_v61 = vsel %vm965_vm2, %v2508_v63, %v2510_v2  ;;  %v1916_v39 = vadd.f32 %v8721_v4, %v1776_v25  ;;  %v2312_v54 = vmax.f32 %v2279_v0, 0.0  ;;  %v1964_v2 = vpop.permute.xlu1 %1963  ;;  %v8724_v0 = vld [vmem:[#allocation59_spill] sm:$0xff] }
 0x34e   : > { %8718 = vst [vmem:[#allocation80_spill] sm:$0xff] %v6236_v55  ;;  %2576 = vrot.lane.b32.xlu1 %v6236_v55, %s4115_s21  ;;  %v1908_v8 = vadd.f32 %v8722_v5, %v1768_v57  ;;  %v2319_v43 = vmax.f32 %v2286_v62, 0.0  ;;  %2574 = vrot.lane.b32.xlu0 %v6246_v61, %s4115_s21  ;;  %v2311_v14 = vmax.f32 %v2278_v7, 0.0  ;;  %v8723_v44 = vrot.slane %v6077_v24, 2  ;;  %v1978_v57 = vpop.permute.xlu2 %1977  ;;  %v1962_v4 = vpop.permute.xlu0 %1961  ;;  %v8726_v5 = vld [vmem:[#allocation89_spill] sm:$0xff] }
 0x34f   : > { %8720 = vst [vmem:[#allocation97_spill] sm:$0xff] %v6246_v61  ;;  %v2175_v25 = vsel %vm1165_vm3, %v8188_v49, %v8187_v45  ;;  %v2516_v62 = vrot.slane %v8724_v0, 1  ;;  %v2049_v18 = vadd.f32 %v1964_v2, %v1909_v21  ;;  %v2056_v15 = vadd.f32 %v1978_v57, %v1916_v39  ;;  %v2084_v61 = vld [vmem:[#allocation2 + $0x168] sm:$0xff]  ;;  %v8727_v49 = vld [vmem:[#allocation146_spill] sm:$0xff]  ;;  %v8730_v2 = vld [vmem:[#allocation75_spill] sm:$0xff] }
 0x350   : > { %v2161_v63 = vsel %vm1165_vm3, %v2158_v58, %v8723_v44  ;;  %2346 = vst.msk [vmem:[%s5856_s4 + $0x69] sm:$0xff] %vm365_vm4, %v2312_v54  ;;  %v8725_v24 = vrot.slane %v6025_v3, 2  ;;  %v6272_v45 = vld [vmem:[#allocation2 + $0x1e8] sm:$0xff]  ;;  %v6275_v0 = vadd.f32 %v8727_v49, %v898_v59  ;;  %v8731_v57 = vld [vmem:[#allocation77_spill] sm:$0xff]  ;;  %v8732_v26 = vrot.slane %v6200_v9, 1 }
 0x351   : > { %v8728_v54 = vld [vmem:[#allocation60_spill] sm:$0xff]  ;;  %2353 = vst.msk [vmem:[%s5856_s4 + $0xa1] sm:$0xff] %vm365_vm4, %v2319_v43  ;;  %v2246_v44 = vadd.f32 %v2161_v63, %v2049_v18  ;;  %v2253_v55 = vadd.f32 %v2175_v25, %v2056_v15  ;;  %v8194_v43 = vrot.slane %v6270_v20, 2  ;;  %v8734_v59 = vld [vmem:[#allocation165_spill] sm:$0xff]  ;;  %v8735_v25 = vrot.slane %v8726_v5, 1 }
 0x352   : > { %v2159_v7 = vsel %vm1165_vm3, %v8725_v24, %v2158_v58  ;;  %v1772_v21 = vadd.f32 %v8728_v54, %v5952_v56  ;;  %v8729_v39 = vld [vmem:[#allocation64_spill] sm:$0xff]  ;;  %v2048_v58 = vadd.f32 %v1962_v4, %v1908_v8  ;;  %v1771_v24 = vadd.f32 %v8731_v57, %v8730_v2  ;;  %2345 = vst.msk [vmem:[%s5856_s4 + $0x61] sm:$0xff] %vm365_vm4, %v2311_v14  ;;  %v8737_v18 = vld [vmem:[#allocation93_spill] sm:$0xff] }
 0x353   : > { %v1779_v3 = vadd.f32 %v8729_v39, %v6084_v47  ;;  %v6290_v49 = vsel %vm965_vm2, %v8732_v26, %v2514_v42  ;;  %3877 = vst.msk [vmem:[%s5856_s4 + $0x60] sm:$0xff] %vm365_vm4, %v8653_v27  ;;  %v2164_v47 = vrot.slane %v2084_v61, 2  ;;  %v8193_v8 = vrot.slane %v6272_v45, 2 }
 0x354   : > { %8733 = vst [vmem:[#allocation81_spill] sm:$0xff] %v6290_v49  ;;  %v2245_v56 = vadd.f32 %v2159_v7, %v2048_v58  ;;  %v1775_v4 = vadd.f32 %v8734_v59, %v6028_v37  ;;  %v2282_v14 = vadd.f32 %v5843_v12, %v2246_v44  ;;  %v2289_v63 = vadd.f32 %v5843_v12, %v2253_v55  ;;  %v8739_v55 = vld [vmem:[#allocation172_spill] sm:$0xff]  ;;  %v8740_v44 = vld [vmem:[#allocation173_spill] sm:$0xff] }
 0x355   : > { %v6304_v26 = vsel %vm965_vm2, %v2516_v62, %v8735_v25  ;;  %v1912_v15 = vadd.f32 %v8737_v18, %v1772_v21  ;;  %2578 = vrot.lane.b32.xlu2 %v6290_v49, %s4115_s21  ;;  %v6313_v37 = vsel %vm965_vm2, %v2514_v42, %v2516_v62  ;;  %v1919_v7 = vadd.f32 %v8739_v55, %v1779_v3  ;;  %v8742_v3 = vld [vmem:[#allocation177_spill] sm:$0xff]  ;;  %v8744_v18 = vld [vmem:[#allocation58_spill] sm:$0xff] }
 0x356   : > { %8736 = vst [vmem:[#allocation82_spill] sm:$0xff] %v6304_v26  ;;  %v2281_v61 = vadd.f32 %v5843_v12, %v2245_v56  ;;  %2582 = vrot.lane.b32.xlu1 %v6304_v26, %s4115_s21  ;;  %v1911_v54 = vadd.f32 %v8740_v44, %v1771_v24  ;;  %v2315_v39 = vmax.f32 %v2282_v14, 0.0  ;;  %v2322_v58 = vmax.f32 %v2289_v63, 0.0  ;;  %2580 = vrot.lane.b32.xlu0 %v6313_v37, %s4115_s21  ;;  %v1970_v56 = vpop.permute.xlu1 %1969  ;;  %v1984_v62 = vpop.permute.xlu2 %1983  ;;  %v2087_v55 = vld [vmem:[#allocation2 + $0x198] sm:$0xff]  ;;  %v6334_v44 = vld [vmem:[#allocation2 + $0x208] sm:$0xff] }
 0x357   : > { %8738 = vst [vmem:[#allocation83_spill] sm:$0xff] %v6313_v37  ;;  %v8741_v2 = vrot.slane %v6133_v50, 2  ;;  %v2181_v42 = vsel %vm1165_vm3, %v8194_v43, %v8193_v8  ;;  %v2520_v24 = vrot.slane %v8742_v3, 1  ;;  %v2052_v59 = vadd.f32 %v1970_v56, %v1912_v15  ;;  %v1968_v25 = vpop.permute.xlu0 %1967  ;;  %v8745_v3 = vld [vmem:[#allocation152_spill] sm:$0xff]  ;;  %v8748_v56 = vld [vmem:[#allocation167_spill] sm:$0xff] }
 0x358   : > { %v2314_v21 = vmax.f32 %v2281_v61, 0.0  ;;  %2349 = vst.msk [vmem:[%s5856_s4 + $0x81] sm:$0xff] %vm365_vm4, %v2315_v39  ;;  %v2059_v14 = vadd.f32 %v1984_v62, %v1919_v7  ;;  %v8743_v50 = vrot.slane %v6079_v60, 2  ;;  %v1639_v8 = vadd.f32 %v8745_v3, %v6208_v48  ;;  %v8746_v39 = vld [vmem:[#allocation166_spill] sm:$0xff]  ;;  %v8747_v7 = vld [vmem:[#allocation39_spill] sm:$0xff] }
 0x359   : > { %v2167_v57 = vsel %vm1165_vm3, %v2164_v47, %v8741_v2  ;;  %v6336_v2 = vld [vmem:[#allocation2 + $0x218] sm:$0xff]  ;;  %v1782_v15 = vadd.f32 %v8746_v39, %v6150_v19  ;;  %2356 = vst.msk [vmem:[%s5856_s4 + $0xb9] sm:$0xff] %vm365_vm4, %v2322_v58  ;;  %v2051_v60 = vadd.f32 %v1968_v25, %v1911_v54  ;;  %v1774_v62 = vadd.f32 %v8748_v56, %v6031_v46 }
 0x35a   : > { %v2165_v63 = vsel %vm1165_vm3, %v8743_v50, %v2164_v47  ;;  %v2522_v47 = vrot.slane %v8747_v7, 1  ;;  %v8749_v50 = vld [vmem:[#allocation12_spill] sm:$0xff]  ;;  %2348 = vst.msk [vmem:[%s5856_s4 + $0x79] sm:$0xff] %vm365_vm4, %v2314_v21  ;;  %v2249_v61 = vadd.f32 %v2167_v57, %v2052_v59  ;;  %v2256_v37 = vadd.f32 %v2181_v42, %v2059_v14  ;;  %v8754_v42 = vld [vmem:[#allocation37_spill] sm:$0xff] }
 0x35b   : > { %v1915_v43 = vadd.f32 %v8749_v50, %v1775_v4  ;;  %3878 = vst.msk [vmem:[%s5856_s4 + $0x78] sm:$0xff] %vm365_vm4, %v8653_v27  ;;  %v2248_v48 = vadd.f32 %v2165_v63, %v2051_v60  ;;  %v2170_v3 = vrot.slane %v2087_v55, 2  ;;  %v8200_v19 = vrot.slane %v6334_v44, 2  ;;  %v8756_v63 = vld [vmem:[#allocation15_spill] sm:$0xff] }
 0x35c   : > { %v8197_v54 = vrot.slane %v6336_v2, 2  ;;  %v2285_v58 = vadd.f32 %v5843_v12, %v2249_v61  ;;  %v2292_v25 = vadd.f32 %v5843_v12, %v2256_v37  ;;  %v8750_v46 = vrot.slane %v8744_v18, 1 }
 0x35d   : > { %v8752_v21 = vrot.slane %v8726_v5, 1  ;;  %v1922_v59 = vadd.f32 %v8754_v42, %v1782_v15  ;;  %v2284_v14 = vadd.f32 %v5843_v12, %v2248_v48  ;;  %v6374_v37 = vsel %vm965_vm2, %v2520_v24, %v2522_v47  ;;  %v6399_v42 = vld [vmem:[#allocation2 + $0x248] sm:$0xff] }
 0x35e   : > { %v6360_v4 = vsel %vm965_vm2, %v2522_v47, %v8750_v46  ;;  %8755 = vst [vmem:[#allocation102_spill] sm:$0xff] %v6374_v37  ;;  %v1914_v61 = vadd.f32 %v8756_v63, %v1774_v62  ;;  %v2318_v5 = vmax.f32 %v2285_v58, 0.0  ;;  %v2325_v55 = vmax.f32 %v2292_v25, 0.0  ;;  %2586 = vrot.lane.b32.xlu0 %v6374_v37, %s4115_s21  ;;  %v1976_v56 = vpop.permute.xlu1 %1975  ;;  %v1990_v47 = vpop.permute.xlu2 %1989  ;;  %v2090_v46 = vld [vmem:[#allocation2 + $0x1c8] sm:$0xff] }
 0x35f   : > { %8751 = vst [vmem:[#allocation84_spill] sm:$0xff] %v6360_v4  ;;  %v6365_v57 = vsel %vm965_vm2, %v8752_v21, %v2520_v24  ;;  %2588 = vrot.lane.b32.xlu1 %v6360_v4, %s4115_s21  ;;  %v2526_v39 = vrot.slane %v5884_v16, 1  ;;  %v2317_v15 = vmax.f32 %v2284_v14, 0.0  ;;  %v8757_v60 = vrot.slane %v6203_v13, 2  ;;  %v1974_v58 = vpop.permute.xlu0 %1973  ;;  %v6397_v21 = vld [vmem:[#allocation2 + $0x238] sm:$0xff]  ;;  %v8759_v14 = vld [vmem:[#allocation139_spill] sm:$0xff] }
 0x360   : > { %8753 = vst [vmem:[#allocation100_spill] sm:$0xff] %v6365_v57  ;;  %2584 = vrot.lane.b32.xlu2 %v6365_v57, %s4115_s21  ;;  %v2187_v24 = vsel %vm1165_vm3, %v8200_v19, %v8197_v54  ;;  %v2528_v62 = vrot.slane %v5981_v52, 1  ;;  %v2055_v50 = vadd.f32 %v1976_v56, %v1915_v43  ;;  %v2062_v16 = vadd.f32 %v1990_v47, %v1922_v59  ;;  %v4064_v52 = vld [vmem:[#allocation2 + $0x1c0] sm:$0xff]  ;;  %v8760_v43 = vld [vmem:[#allocation145_spill] sm:$0xff] }
 0x361   : > { %v2173_v7 = vsel %vm1165_vm3, %v2170_v3, %v8757_v60  ;;  %2352 = vst.msk [vmem:[%s5856_s4 + $0x99] sm:$0xff] %vm365_vm4, %v2318_v5  ;;  %v8758_v13 = vrot.slane %v6135_v53, 2  ;;  %v6395_v25 = vrot.slane %v6042_v22, 1  ;;  %v1156_v63 = vadd.f32 %v4064_v52, %v8759_v14  ;;  %v8761_v53 = vld [vmem:[#allocation149_spill] sm:$0xff]  ;;  %v8762_v22 = vld [vmem:[#allocation168_spill] sm:$0xff]  ;;  %v8781_v19 = vld [vmem:[#allocation171_spill] sm:$0xff] }
 0x362   : > { %v1635_v59 = vadd.f32 %v8760_v43, %v6141_v38  ;;  %v1362_v5 = vadd.f32 %v8761_v53, %v6275_v0  ;;  %2359 = vst.msk [vmem:[%s5856_s4 + $0xd1] sm:$0xff] %vm365_vm4, %v2325_v55  ;;  %v1778_v60 = vadd.f32 %v8762_v22, %v6126_v33  ;;  %v8763_v56 = vld [vmem:[#allocation169_spill] sm:$0xff]  ;;  %v2259_v54 = vadd.f32 %v2187_v24, %v2062_v16  ;;  %v8769_v16 = vld [vmem:[#allocation24_spill] sm:$0xff] }
 0x363   : > { %v2171_v48 = vsel %vm1165_vm3, %v8758_v13, %v2170_v3  ;;  %v2054_v3 = vadd.f32 %v1974_v58, %v1914_v61  ;;  %v1785_v47 = vadd.f32 %v8763_v56, %v1639_v8  ;;  %2351 = vst.msk [vmem:[%s5856_s4 + $0x91] sm:$0xff] %vm365_vm4, %v2317_v15  ;;  %v2252_v13 = vadd.f32 %v2173_v7, %v2055_v50  ;;  %v8767_v7 = vld [vmem:[#allocation170_spill] sm:$0xff] }
 0x364   : > { %3879 = vst.msk [vmem:[%s5856_s4 + $0x90] sm:$0xff] %vm365_vm4, %v8653_v27  ;;  %v2176_v38 = vrot.slane %v2090_v46, 2  ;;  %v8199_v14 = vrot.slane %v6397_v21, 2  ;;  %v8198_v0 = vrot.slane %v6399_v42, 2  ;;  %v2295_v55 = vadd.f32 %v5843_v12, %v2259_v54 }
 0x365   : > { %v2251_v52 = vadd.f32 %v2171_v48, %v2054_v3  ;;  %v2288_v61 = vadd.f32 %v5843_v12, %v2252_v13  ;;  %v6422_v33 = vsel %vm965_vm2, %v2528_v62, %v6395_v25  ;;  %v8765_v8 = vrot.slane %v8744_v18, 1  ;;  %v8770_v48 = vld [vmem:[#allocation23_spill] sm:$0xff] }
 0x366   : > { %8764 = vst [vmem:[#allocation85_spill] sm:$0xff] %v6422_v33  ;;  %v1777_v24 = vadd.f32 %v8767_v7, %v6138_v35  ;;  %v6437_v54 = vsel %vm965_vm2, %v2526_v39, %v2528_v62  ;;  %v1918_v18 = vadd.f32 %v8769_v16, %v1778_v60  ;;  %v1925_v58 = vadd.f32 %v8770_v48, %v1785_v47  ;;  %v8771_v35 = vld [vmem:[#allocation38_spill] sm:$0xff]  ;;  %v1982_v13 = vpop.permute.xlu1 %1981  ;;  %v1996_v62 = vpop.permute.xlu2 %1995  ;;  %v8773_v60 = vld [vmem:[#allocation157_spill] sm:$0xff] }
 0x367   : > { %v6427_v15 = vsel %vm965_vm2, %v8765_v8, %v2526_v39  ;;  %v2287_v50 = vadd.f32 %v5843_v12, %v2251_v52  ;;  %2594 = vrot.lane.b32.xlu1 %v6422_v33, %s4115_s21  ;;  %8768 = vst [vmem:[#allocation86_spill] sm:$0xff] %v6437_v54  ;;  %v2321_v46 = vmax.f32 %v2288_v61, 0.0  ;;  %v2328_v43 = vmax.f32 %v2295_v55, 0.0  ;;  %2592 = vrot.lane.b32.xlu0 %v6437_v54, %s4115_s21  ;;  %v1980_v8 = vpop.permute.xlu0 %1979  ;;  %v2093_v7 = vld [vmem:[#allocation2 + $0x1f8] sm:$0xff]  ;;  %v4065_v16 = vld [vmem:[#allocation2 + $0x1b0] sm:$0xff] }
 0x368   : > { %8766 = vst [vmem:[#allocation10_spill] sm:$0xff] %v6427_v15  ;;  %2590 = vrot.lane.b32.xlu2 %v6427_v15, %s4115_s21  ;;  %v1917_v53 = vadd.f32 %v8771_v35, %v1777_v24  ;;  %v8772_v22 = vrot.slane %v6270_v20, 2  ;;  %v2193_v39 = vsel %vm1165_vm3, %v8199_v14, %v8198_v0  ;;  %v1502_v47 = vadd.f32 %v8773_v60, %v1362_v5  ;;  %v6458_v24 = vld [vmem:[#allocation2 + $0x268] sm:$0xff]  ;;  %v8775_v48 = vld [vmem:[#allocation141_spill] sm:$0xff]  ;;  %v8777_v5 = vld [vmem:[#allocation147_spill] sm:$0xff] }
 0x369   : > { %v2320_v3 = vmax.f32 %v2287_v50, 0.0  ;;  %2355 = vst.msk [vmem:[%s5856_s4 + $0xb1] sm:$0xff] %vm365_vm4, %v2321_v46  ;;  %v2058_v52 = vadd.f32 %v1982_v13, %v1918_v18  ;;  %v2065_v61 = vadd.f32 %v1996_v62, %v1925_v58  ;;  %v8774_v20 = vrot.slane %v6205_v30, 2  ;;  %v2101_v50 = vld [vmem:[#allocation2 + $0x278] sm:$0x1]  ;;  %v8778_v58 = vld [vmem:[#allocation160_spill] sm:$0xff] }
 0x36a   : > { %v2179_v56 = vsel %vm1165_vm3, %v2176_v38, %v8772_v22  ;;  %v1155_v35 = vadd.f32 %v4065_v16, %v8775_v48  ;;  %v8776_v22 = vld [vmem:[#allocation142_spill] sm:$0xff]  ;;  %v1634_v46 = vadd.f32 %v8777_v5, %v6147_v29  ;;  %2362 = vst.msk [vmem:[%s5856_s4 + $0xe9] sm:$0xff] %vm365_vm4, %v2328_v43  ;;  %v2057_v18 = vadd.f32 %v1980_v8, %v1917_v53  ;;  %v8779_v13 = vld [vmem:[#allocation36_spill] sm:$0xff] }
 0x36b   : > { %v2177_v55 = vsel %vm1165_vm3, %v8774_v20, %v2176_v38  ;;  %v1358_v0 = vadd.f32 %v8776_v22, %v1156_v63  ;;  %v1642_v30 = vadd.f32 %v8778_v58, %v1502_v47  ;;  %v1781_v38 = vadd.f32 %v8779_v13, %v1635_v59  ;;  %2354 = vst.msk [vmem:[%s5856_s4 + $0xa9] sm:$0xff] %vm365_vm4, %v2320_v3  ;;  %v8780_v63 = vld [vmem:[#allocation17_spill] sm:$0xff]  ;;  %v8782_v59 = vld [vmem:[#allocation144_spill] sm:$0xff]  ;;  %v651_v58 = vld [vmem:[%s4165_s19 + $0x1a0] sm:$0xff] }
 0x36c   : > { %v2255_v62 = vadd.f32 %v2179_v56, %v2058_v52  ;;  %v2262_v60 = vadd.f32 %v2193_v39, %v2065_v61  ;;  %v2254_v20 = vadd.f32 %v2177_v55, %v2057_v18  ;;  %v2182_v14 = vrot.slane %v2093_v7, 2  ;;  %v8783_v3 = vld [vmem:[#allocation48_spill] sm:$0xff]  ;;  %v6482_v61 = vld [vmem:[#allocation2 + $0x150] sm:$0xff]  ;;  %v8786_v55 = vld [vmem:[#allocation50_spill] sm:$0xff] }
 0x36d   : > { %v2196_v16 = vrot.slane %v6458_v24, 2  ;;  %v2198_v48 = vrot.slane %v2101_v50, 2  ;;  %v1788_v22 = vadd.f32 %v8780_v63, %v1642_v30  ;;  %v1780_v29 = vadd.f32 %v8781_v19, %v1634_v46  ;;  %v8784_v52 = vld [vmem:[#allocation16_spill] sm:$0xff]  ;;  %8785 = vst [vmem:[#allocation87_spill] sm:$0xff] %v6482_v61  ;;  %v8788_v46 = vld [vmem:[#allocation174_spill] sm:$0xff] }
 0x36e   : > { %v2291_v43 = vadd.f32 %v5843_v12, %v2255_v62  ;;  %v2298_v53 = vadd.f32 %v5843_v12, %v2262_v60  ;;  %v1357_v47 = vadd.f32 %v8782_v59, %v1155_v35  ;;  %v1921_v56 = vadd.f32 %v8783_v3, %v1781_v38  ;;  %v8787_v7 = vld [vmem:[#allocation52_spill] sm:$0xff]  ;;  %v1988_v60 = vpop.permute.xlu1 %1987  ;;  %v2002_v63 = vpop.permute.xlu2 %2001 }
 0x36f   : > { %v2290_v39 = vadd.f32 %v5843_v12, %v2254_v20  ;;  %2735 = vrot.lane.b32.xlu1 %v8784_v52, %s4116_s22  ;;  %v6485_v19 = vrot.slane %v6482_v61, 2  ;;  %v1928_v8 = vadd.f32 %v8786_v55, %v1788_v22  ;;  %v1920_v50 = vadd.f32 %v8787_v7, %v1780_v29  ;;  %v652_v30 = vld [vmem:[%s4165_s19 + $0x1a8] sm:$0xff]  ;;  %v8793_v55 = vld [vmem:[#allocation150_spill] sm:$0xff] }
 0x370   : > { %2596 = vrot.lane.b32.xlu2 %v6395_v25, %s4115_s21  ;;  %v2324_v35 = vmax.f32 %v2291_v43, 0.0  ;;  %v2331_v5 = vmax.f32 %v2298_v53, 0.0  ;;  %v8789_v18 = vrot.slane %v8788_v46, 2  ;;  %v8790_v38 = vrot.slane %v6334_v44, 2  ;;  %v8791_v29 = vld [vmem:[#allocation148_spill] sm:$0xff]  ;;  %v6509_v46 = vld [vmem:[#allocation2 + $0x160] sm:$0xff] }
 0x371   : > { %v2323_v13 = vmax.f32 %v2290_v39, 0.0  ;;  %v2199_v20 = vsel %vm1165_vm3, %v2196_v16, %v2198_v48  ;;  %v663_v22 = vpack.c.bf16 %v652_v30, %v651_v58  ;;  %v1498_v43 = vadd.f32 %v8791_v29, %v1358_v0  ;;  %v1986_v39 = vpop.permute.xlu0 %1985  ;;  %v2096_v52 = vld [vmem:[#allocation2 + $0x228] sm:$0xff]  ;;  %v8798_v30 = vld [vmem:[#allocation161_spill] sm:$0xff]  ;;  %v4069_v29 = vld [vmem:[#allocation2 + $0x1e0] sm:$0xff] }
 0x372   : > { %2733 = vrot.lane.b32.xlu0 %v8789_v18, %s4116_s22  ;;  %v2185_v62 = vsel %vm1165_vm3, %v2182_v14, %v8790_v38  ;;  %2358 = vst.msk [vmem:[%s5856_s4 + $0xc9] sm:$0xff] %vm365_vm4, %v2324_v35  ;;  %v2061_v53 = vadd.f32 %v1988_v60, %v1921_v56  ;;  %v2068_v59 = vadd.f32 %v2002_v63, %v1928_v8  ;;  %v8792_v3 = vrot.slane %v6272_v45, 2  ;;  %v8794_v0 = vld [vmem:[#allocation156_spill] sm:$0xff]  ;;  %v8795_v8 = vld [vmem:[#allocation175_spill] sm:$0xff] }
 0x373   : > { %v1497_v7 = vadd.f32 %v8793_v55, %v1357_v47  ;;  %2365 = vst.msk [vmem:[%s5856_s4 + $0x101] sm:$0xff] %vm365_vm4, %v2331_v5  ;;  %v2060_v48 = vadd.f32 %v1986_v39, %v1920_v50  ;;  %v2677_v18 = vrot.slane %v6509_v46, 2  ;;  %4001 = vmatmul.msk.bf16.gmra.mxu0 %vm208_vm1, %v663_v22  ;;  %4011 = vmatmul.msk.bf16.gmra.mxu1 %vm208_vm1, %v663_v22  ;;  %v8796_v47 = vrot.slane %v8795_v8, 2  ;;  %v4068_v50 = vld [vmem:[#allocation2 + $0x1f0] sm:$0xff]  ;;  %v8797_v5 = vld [vmem:[#allocation151_spill] sm:$0xff] }
 0x374   : > { %v2183_v44 = vsel %vm1165_vm3, %v8792_v3, %v2182_v14  ;;  %v1638_v56 = vadd.f32 %v8794_v0, %v1498_v43  ;;  %2357 = vst.msk [vmem:[%s5856_s4 + $0xc1] sm:$0xff] %vm365_vm4, %v2323_v13  ;;  %v2258_v45 = vadd.f32 %v2185_v62, %v2061_v53  ;;  %v2265_v14 = vadd.f32 %v2199_v20, %v2068_v59  ;;  %v8799_v22 = vld [vmem:[#allocation153_spill] sm:$0xff]  ;;  %v8800_v43 = vld [vmem:[#allocation3_spill] sm:$0xff]  ;;  %v8801_v20 = vld [vmem:[#allocation154_spill] sm:$0xff] }
 0x375   : > { %v2676_v35 = vsel %vm1165_vm3, %v8796_v47, %v6485_v19  ;;  %v1159_v58 = vadd.f32 %v4068_v50, %v8797_v5  ;;  %v1637_v38 = vadd.f32 %v8798_v30, %v1497_v7  ;;  %v2257_v60 = vadd.f32 %v2183_v44, %v2060_v48  ;;  %v8802_v59 = vld [vmem:[#allocation41_spill] sm:$0xff]  ;;  %v8803_v44 = vld [vmem:[#allocation18_spill] sm:$0xff]  ;;  %v8806_v47 = vld [vmem:[#allocation155_spill] sm:$0xff] }
 0x376   : > { %v2188_v63 = vrot.slane %v2096_v52, 2  ;;  %v1158_v3 = vadd.f32 %v4069_v29, %v8799_v22  ;;  %v1784_v39 = vadd.f32 %v8800_v43, %v1638_v56  ;;  %v2294_v13 = vadd.f32 %v5843_v12, %v2258_v45  ;;  %v6533_v52 = vld [vmem:[#allocation2 + $0x170] sm:$0xff]  ;;  %v8810_v29 = vld [vmem:[#allocation159_spill] sm:$0xff] }
 0x377   : > { %v2301_v62 = vadd.f32 %v5843_v12, %v2265_v14  ;;  %v1361_v53 = vadd.f32 %v8801_v20, %v1159_v58  ;;  %v1783_v55 = vadd.f32 %v8802_v59, %v1637_v38  ;;  %v2293_v0 = vadd.f32 %v5843_v12, %v2257_v60  ;;  %2741 = vrot.lane.b32.xlu1 %v2676_v35, %s4116_s22  ;;  %v8804_v48 = vld [vmem:[#allocation65_spill] sm:$0xff]  ;;  %v8807_v35 = vld [vmem:[#allocation66_spill] sm:$0xff]  ;;  %v1994_v38 = vpop.permute.xlu1 %1993  ;;  %v6544_v60 = vpop.permute.xlu2 %2536 }
 0x378   : > { %2737 = vrot.lane.b32.xlu2 %v8803_v44, %s4116_s22  ;;  %v2679_v7 = vrot.slane %v6533_v52, 2  ;;  %v1924_v56 = vadd.f32 %v8804_v48, %v1784_v39  ;;  %v2327_v45 = vmax.f32 %v2294_v13, 0.0  ;;  %v8805_v8 = vld [vmem:[#allocation21_spill] sm:$0xff]  ;;  %v1360_v12 = vadd.f32 %v8806_v47, %v1158_v3  ;;  %8809 = vst [vmem:[#allocation105_spill] sm:$0xff] %v6544_v60  ;;  %v2099_v20 = vld [vmem:[#allocation2 + $0x258] sm:$0xff]  ;;  %v8814_v44 = vld [vmem:[#allocation11_spill] sm:$0xff] }
 0x379   : > { %v2334_v14 = vmax.f32 %v2301_v62, 0.0  ;;  %v1923_v50 = vadd.f32 %v8807_v35, %v1783_v55  ;;  %v2326_v5 = vmax.f32 %v2293_v0, 0.0  ;;  %v8808_v58 = vrot.slane %v6397_v21, 2  ;;  %v1992_v13 = vpop.permute.xlu0 %1991  ;;  %v6552_v62 = vld [vmem:[#allocation2 + $0x180] sm:$0xff]  ;;  %v8813_v59 = vld [vmem:[#allocation158_spill] sm:$0xff] }
 0x37a   : > { %2739 = vrot.lane.b32.xlu0 %v8805_v8, %s4116_s22  ;;  %v1501_v22 = vadd.f32 %v8810_v29, %v1361_v53  ;;  %2361 = vst.msk [vmem:[%s5856_s4 + $0xe1] sm:$0xff] %vm365_vm4, %v2327_v45  ;;  %v2064_v43 = vadd.f32 %v1994_v38, %v1924_v56  ;;  %v8811_v39 = vrot.slane %v6336_v2, 2  ;;  %v2681_v21 = vrot.slane %v6552_v62, 2  ;;  %v8815_v56 = vld [vmem:[#allocation162_spill] sm:$0xff]  ;;  %v4072_v35 = vld [vmem:[%s8112_s2] ss:$0 sm:$0xff] }
 0x37b   : > { %v2191_v30 = vsel %vm1165_vm3, %v2188_v63, %v8808_v58  ;;  %8812 = vst [vmem:[#allocation90_spill] sm:$0xff] %v6552_v62  ;;  %v1500_v55 = vadd.f32 %v8813_v59, %v1360_v12  ;;  %v2063_v0 = vadd.f32 %v1992_v13, %v1923_v50  ;;  %v8816_v8 = vld [vmem:[#allocation42_spill] sm:$0xff]  ;;  %v6573_v12 = vsel %vm1165_vm3, %v6485_v19, %v2677_v18 }
 0x37c   : > { %v2189_v3 = vsel %vm1165_vm3, %v8811_v39, %v2188_v63  ;;  %2369 = vst.msk [vmem:[%s5856_s4 + $0x119] sm:$0x7f] %vm2368_vm6, %v2334_v14  ;;  %v1641_v53 = vadd.f32 %v8814_v44, %v1501_v22  ;;  %v2261_v48 = vadd.f32 %v2191_v30, %v2064_v43  ;;  %v2194_v63 = vrot.slane %v2099_v20, 2  ;;  %v8817_v50 = vld [vmem:[#allocation6_spill] sm:$0xff] }
 0x37d   : > { %2360 = vst.msk [vmem:[%s5856_s4 + $0xd9] sm:$0xff] %vm365_vm4, %v2326_v5  ;;  %v1640_v2 = vadd.f32 %v8815_v56, %v1500_v55  ;;  %v2260_v45 = vadd.f32 %v2189_v3, %v2063_v0  ;;  %v6567_v14 = vsel %vm1165_vm3, %v2679_v7, %v2681_v21  ;;  %v6583_v38 = vsel %vm1165_vm3, %v2677_v18, %v2679_v7  ;;  %v8818_v29 = vld [vmem:[#allocation70_spill] sm:$0xff]  ;;  %v6602_v56 = vld [vmem:[#allocation2 + $0x190] sm:$0xff] }
 0x37e   : > { %v1787_v47 = vadd.f32 %v8816_v8, %v1641_v53  ;;  %v2297_v58 = vadd.f32 %v4072_v35, %v2261_v48  ;;  %v8819_v39 = vld [vmem:[#allocation74_spill] sm:$0xff]  ;;  %v2197_v20 = vsel %vm1165_vm3, %v2194_v63, %v2196_v16  ;;  %v8821_v7 = vrot.slane %v6399_v42, 2  ;;  %v6599_v53 = vld [vmem:[#allocation2 + $0x1b0] sm:$0xff]  ;;  %8823 = vst [vmem:[#allocation94_spill] sm:$0xff] %v6602_v56 }
 0x37f   : > { %v1786_v5 = vadd.f32 %v8817_v50, %v1640_v2  ;;  %v2296_v30 = vadd.f32 %v4072_v35, %v2260_v45  ;;  %2747 = vrot.lane.b32.xlu1 %v6567_v14, %s4116_s22  ;;  %v2000_v59 = vpop.permute.xlu1 %1999  ;;  %v6592_v55 = vpop.permute.xlu2 %2542  ;;  %8822 = vst [vmem:[#allocation14_spill] sm:$0xff] %v6599_v53  ;;  %v2687_v48 = vrot.slane %v6599_v53, 2  ;;  %v2683_v24 = vrot.slane %v6602_v56, 2  ;;  %v6607_v2 = vld [vmem:[#allocation2 + $0x1a0] sm:$0xff] }
 0x380   : > { %2743 = vrot.lane.b32.xlu2 %v6573_v12, %s4116_s22  ;;  %v1927_v22 = vadd.f32 %v8818_v29, %v1787_v47  ;;  %v2330_v43 = vmax.f32 %v2297_v58, 0.0  ;;  %8820 = vst [vmem:[#allocation92_spill] sm:$0xff] %v6592_v55  ;;  %v2195_v0 = vsel %vm1165_vm3, %v8821_v7, %v2194_v63  ;;  %v2685_v45 = vrot.slane %v6607_v2, 2 }
 0x381   : > { %v1926_v3 = vadd.f32 %v8819_v39, %v1786_v5  ;;  %v2329_v13 = vmax.f32 %v2296_v30, 0.0  ;;  %v1998_v44 = vpop.permute.xlu0 %1997  ;;  %8824 = vst [vmem:[#allocation96_spill] sm:$0xff] %v6607_v2  ;;  %v6614_v58 = vsel %vm1165_vm3, %v2681_v21, %v2683_v24  ;;  %v2707_v60 = vrot.slane %v6154_v51, 2 }
 0x382   : > { %2745 = vrot.lane.b32.xlu0 %v6583_v38, %s4116_s22  ;;  %2364 = vst.msk [vmem:[%s5856_s4 + $0xf9] sm:$0xff] %vm365_vm4, %v2330_v43  ;;  %v2067_v18 = vadd.f32 %v2000_v59, %v1927_v22  ;;  %v6611_v47 = vsel %vm1165_vm3, %v2685_v45, %v2687_v48  ;;  %v6621_v5 = vsel %vm1165_vm3, %v2683_v24, %v2685_v45  ;;  %v6633_v43 = vld [vmem:[#allocation2 + $0x1d0] sm:$0xff] }
 0x383   : > { %2363 = vst.msk [vmem:[%s5856_s4 + $0xf1] sm:$0xff] %vm365_vm4, %v2329_v13  ;;  %v2066_v16 = vadd.f32 %v1998_v44, %v1926_v3  ;;  %v2691_v39 = vrot.slane %v6633_v43, 2  ;;  %v6636_v3 = vld [vmem:[#allocation2 + $0x1e0] sm:$0xff] }
 0x384   : > { %v2264_v42 = vadd.f32 %v2197_v20, %v2067_v18  ;;  %8825 = vst [vmem:[#allocation19_spill] sm:$0xff] %v6611_v47  ;;  %v2693_v13 = vrot.slane %v6636_v3, 2  ;;  %v6639_v20 = vld [vmem:[#allocation2 + $0x1c0] sm:$0xff] }
 0x385   : > { %v2263_v8 = vadd.f32 %v2195_v0, %v2066_v16  ;;  %8826 = vst [vmem:[#allocation98_spill] sm:$0xff] %v6614_v58  ;;  %v2689_v59 = vrot.slane %v6639_v20, 2 }
 0x386   : > { %v2300_v63 = vadd.f32 %v4072_v35, %v2264_v42  ;;  %8827 = vst [vmem:[#allocation31_spill] sm:$0xff] %v6621_v5  ;;  %v6645_v18 = vsel %vm1165_vm3, %v2691_v39, %v2693_v13  ;;  %v6668_v42 = vld [vmem:[#allocation2 + $0x1f0] sm:$0xff] }
 0x387   : > { %v2299_v50 = vadd.f32 %v4072_v35, %v2263_v8  ;;  %2753 = vrot.lane.b32.xlu1 %v6611_v47, %s4116_s22  ;;  %v6625_v22 = vpop.permute.xlu1 %2534  ;;  %v6627_v21 = vpop.permute.xlu2 %2548  ;;  %8831 = vst [vmem:[#allocation103_spill] sm:$0xff] %v6633_v43  ;;  %v6648_v7 = vsel %vm1165_vm3, %v2687_v48, %v2689_v59  ;;  %v6655_v0 = vsel %vm1165_vm3, %v2689_v59, %v2691_v39  ;;  %v6665_v48 = vld [vmem:[#allocation2 + $0x210] sm:$0xff]  ;;  %v2695_v8 = vrot.slane %v6668_v42, 2  ;;  %v6842_v47 = vld [vmem:[#allocation2 + $0x140] sm:$0xff] }
 0x388   : > { %2749 = vrot.lane.b32.xlu2 %v6614_v58, %s4116_s22  ;;  %v2333_v30 = vmax.f32 %v2300_v63, 0.0  ;;  %8828 = vst [vmem:[#allocation99_spill] sm:$0xff] %v6625_v22  ;;  %v2699_v45 = vrot.slane %v6665_v48, 2  ;;  %v6671_v63 = vld [vmem:[#allocation2 + $0x200] sm:$0xff] }
 0x389   : > { %v2332_v29 = vmax.f32 %v2299_v50, 0.0  ;;  %8829 = vst [vmem:[#allocation101_spill] sm:$0xff] %v6627_v21  ;;  %v6631_v35 = vpop.permute.xlu0 %2532  ;;  %v2697_v50 = vrot.slane %v6671_v63, 2  ;;  %v6701_v21 = vld [vmem:[#allocation2 + $0x220] sm:$0xff] }
 0x38a   : > { %2751 = vrot.lane.b32.xlu0 %v6621_v5, %s4116_s22  ;;  %2367 = vst.msk [vmem:[%s5856_s4 + $0x111] sm:$0xff] %vm365_vm4, %v2333_v30 }
 0x38b   : > { %8830 = vst [vmem:[#allocation28_spill] sm:$0xff] %v6631_v35  ;;  %v6675_v30 = vsel %vm1165_vm3, %v2697_v50, %v2699_v45  ;;  %v6685_v39 = vsel %vm1165_vm3, %v2695_v8, %v2697_v50 }
 0x38c   : > { %8832 = vst [vmem:[#allocation104_spill] sm:$0xff] %v6636_v3 }
 0x38d   : > { %8833 = vst [vmem:[#allocation49_spill] sm:$0xff] %v6639_v20 }
 0x38e   : > { %2366 = vst.msk [vmem:[%s5856_s4 + $0x109] sm:$0xff] %vm365_vm4, %v2332_v29  ;;  %v6678_v29 = vsel %vm1165_vm3, %v2693_v13, %v2695_v8  ;;  %v6695_v13 = vld [vmem:[#allocation2 + $0x230] sm:$0xff]  ;;  %v2701_v8 = vrot.slane %v6701_v21, 2 }
 0x38f   : > { %8834 = vst [vmem:[#allocation106_spill] sm:$0xff] %v6645_v18  ;;  %2759 = vrot.lane.b32.xlu1 %v6645_v18, %s4116_s22  ;;  %v6659_v44 = vpop.permute.xlu1 %2540  ;;  %v6661_v24 = vpop.permute.xlu2 %2554 }
 0x390   : > { %8835 = vst [vmem:[#allocation107_spill] sm:$0xff] %v6648_v7  ;;  %2755 = vrot.lane.b32.xlu2 %v6648_v7, %s4116_s22 }
 0x391   : > { %8836 = vst [vmem:[#allocation109_spill] sm:$0xff] %v6655_v0  ;;  %v6663_v16 = vpop.permute.xlu0 %2538 }
 0x392   : > { %2757 = vrot.lane.b32.xlu0 %v6655_v0, %s4116_s22  ;;  %8837 = vst [vmem:[#allocation108_spill] sm:$0xff] %v6659_v44  ;;  %v6698_v44 = vld [vmem:[#allocation2 + $0x240] sm:$0xff] }
 0x393   : > { %8838 = vst [vmem:[#allocation110_spill] sm:$0xff] %v6661_v24  ;;  %v2703_v24 = vrot.slane %v6695_v13, 2  ;;  %v2705_v35 = vrot.slane %v6698_v44, 2 }
 0x394   : > { %8839 = vst [vmem:[#allocation111_spill] sm:$0xff] %v6663_v16 }
 0x395   : > { %8840 = vst [vmem:[#allocation112_spill] sm:$0xff] %v6665_v48  ;;  %v6705_v50 = vsel %vm1165_vm3, %v2703_v24, %v2705_v35 }
 0x396   : > { %8841 = vst [vmem:[#allocation113_spill] sm:$0xff] %v6668_v42 }
 0x397   : > { %8842 = vst [vmem:[#allocation116_spill] sm:$0xff] %v6671_v63  ;;  %2765 = vrot.lane.b32.xlu1 %v6675_v30, %s4116_s22  ;;  %v6689_v59 = vpop.permute.xlu1 %2546  ;;  %v6691_v27 = vpop.permute.xlu2 %2560 }
 0x398   : > { %8843 = vst [vmem:[#allocation114_spill] sm:$0xff] %v6675_v30  ;;  %2761 = vrot.lane.b32.xlu2 %v6678_v29, %s4116_s22  ;;  %v6783_v30 = vld [vmem:[#allocation2 + $0x2c0] sm:$0xff] }
 0x399   : > { %8844 = vst [vmem:[#allocation115_spill] sm:$0xff] %v6678_v29  ;;  %v6693_v16 = vpop.permute.xlu0 %2544 }
 0x39a   : > { %8845 = vst [vmem:[#allocation117_spill] sm:$0xff] %v6685_v39  ;;  %2763 = vrot.lane.b32.xlu0 %v6685_v39, %s4116_s22 }
 0x39b   : > { %8846 = vst [vmem:[#allocation118_spill] sm:$0xff] %v6689_v59  ;;  %v6708_v59 = vsel %vm1165_vm3, %v2699_v45, %v2701_v8  ;;  %v2711_v45 = vrot.slane %v6200_v9, 2 }
 0x39c   : > { %8847 = vst [vmem:[#allocation119_spill] sm:$0xff] %v6691_v27 }
 0x39d   : > { %8848 = vst [vmem:[#allocation120_spill] sm:$0xff] %v6693_v16  ;;  %v6715_v16 = vsel %vm1165_vm3, %v2701_v8, %v2703_v24  ;;  %v6732_v24 = vsel %vm1165_vm3, %v2705_v35, %v2707_v60  ;;  %v6749_v35 = vld [vmem:[#allocation2 + $0x290] sm:$0xff] }
 0x39e   : > { %8849 = vst [vmem:[#allocation121_spill] sm:$0xff] %v6705_v50 }
 0x39f   : > { %8850 = vst [vmem:[#allocation122_spill] sm:$0xff] %v6708_v59  ;;  %2771 = vrot.lane.b32.xlu1 %v6705_v50, %s4116_s22  ;;  %v6719_v27 = vpop.permute.xlu1 %2552  ;;  %v6721_v22 = vpop.permute.xlu2 %2566  ;;  %v2709_v50 = vrot.slane %v6183_v1, 2 }
 0x3a0   : > { %2767 = vrot.lane.b32.xlu2 %v6708_v59, %s4116_s22  ;;  %8851 = vst [vmem:[#allocation123_spill] sm:$0xff] %v6715_v16 }
 0x3a1   : > { %8852 = vst [vmem:[#allocation124_spill] sm:$0xff] %v6719_v27  ;;  %v6723_v55 = vpop.permute.xlu0 %2550  ;;  %v6729_v59 = vsel %vm1165_vm3, %v2709_v50, %v2711_v45  ;;  %v6739_v8 = vsel %vm1165_vm3, %v2707_v60, %v2709_v50  ;;  %v2713_v60 = vrot.slane %v6248_v28, 2 }
 0x3a2   : > { %2769 = vrot.lane.b32.xlu0 %v6715_v16, %s4116_s22  ;;  %8853 = vst [vmem:[#allocation125_spill] sm:$0xff] %v6721_v22  ;;  %v2715_v16 = vrot.slane %v6749_v35, 2 }
 0x3a3   : > { %8854 = vst [vmem:[#allocation8_spill] sm:$0xff] %v6723_v55 }
 0x3a4   : > { %8855 = vst [vmem:[#allocation34_spill] sm:$0xff] %v6729_v59 }
 0x3a5   : > { %8856 = vst [vmem:[#allocation163_spill] sm:$0xff] %v6732_v24 }
 0x3a6   : > { %8857 = vst [vmem:[#allocation164_spill] sm:$0xff] %v6739_v8 }
 0x3a7   : > { %2777 = vrot.lane.b32.xlu1 %v6729_v59, %s4116_s22  ;;  %v6743_v55 = vpop.permute.xlu1 %2558  ;;  %v6745_v22 = vpop.permute.xlu2 %2572  ;;  %v6752_v59 = vld [vmem:[#allocation2 + $0x2a0] sm:$0xff]  ;;  %8879 = vst [vmem:[#allocation138_spill] sm:$0xff] %v6842_v47 }
 0x3a8   : > { %2773 = vrot.lane.b32.xlu2 %v6732_v24, %s4116_s22  ;;  %8858 = vst [vmem:[#allocation127_spill] sm:$0xff] %v6743_v55  ;;  %v2717_v24 = vrot.slane %v6752_v59, 2 }
 0x3a9   : > { %8859 = vst [vmem:[#allocation4_spill] sm:$0xff] %v6745_v22  ;;  %v6747_v27 = vpop.permute.xlu0 %2556 }
 0x3aa   : > { %2775 = vrot.lane.b32.xlu0 %v6739_v8, %s4116_s22  ;;  %8860 = vst [vmem:[#allocation5_spill] sm:$0xff] %v6747_v27  ;;  %v6757_v50 = vsel %vm1165_vm3, %v2715_v16, %v2717_v24  ;;  %v6760_v8 = vsel %vm1165_vm3, %v2711_v45, %v2713_v60  ;;  %v6767_v27 = vsel %vm1165_vm3, %v2713_v60, %v2715_v16  ;;  %v6777_v45 = vld [vmem:[#allocation2 + $0x2d0] sm:$0xff]  ;;  %v2721_v16 = vrot.slane %v6783_v30, 2 }
 0x3ab   : > { %8861 = vst [vmem:[#allocation22_spill] sm:$0xff] %v6757_v50  ;;  %v2723_v29 = vrot.slane %v6777_v45, 2 }
 0x3ac   : > { %8862 = vst [vmem:[#allocation129_spill] sm:$0xff] %v6760_v8 }
 0x3ad   : > { %8863 = vst [vmem:[#allocation126_spill] sm:$0xff] %v6767_v27  ;;  %v6787_v60 = vsel %vm1165_vm3, %v2721_v16, %v2723_v29 }
 0x3ae   : > { %8867 = vst [vmem:[#allocation132_spill] sm:$0xff] %v6787_v60 }
 0x3af   : > { %2783 = vrot.lane.b32.xlu1 %v6757_v50, %s4116_s22  ;;  %v6771_v55 = vpop.permute.xlu1 %2564  ;;  %v6773_v22 = vpop.permute.xlu2 %2578  ;;  %v6780_v50 = vld [vmem:[#allocation2 + $0x2b0] sm:$0xff] }
 0x3b0   : > { %2779 = vrot.lane.b32.xlu2 %v6760_v8, %s4116_s22  ;;  %8864 = vst [vmem:[#allocation128_spill] sm:$0xff] %v6771_v55  ;;  %v2719_v8 = vrot.slane %v6780_v50, 2 }
 0x3b1   : > { %8865 = vst [vmem:[#allocation130_spill] sm:$0xff] %v6773_v22  ;;  %v6775_v39 = vpop.permute.xlu0 %2562 }
 0x3b2   : > { %2781 = vrot.lane.b32.xlu0 %v6767_v27, %s4116_s22  ;;  %8866 = vst [vmem:[#allocation131_spill] sm:$0xff] %v6775_v39  ;;  %v6790_v55 = vsel %vm1165_vm3, %v2717_v24, %v2719_v8  ;;  %v6797_v39 = vsel %vm1165_vm3, %v2719_v8, %v2721_v16  ;;  %v6807_v24 = vld [vmem:[#allocation2 + $0x2f0] sm:$0xff]  ;;  %v6815_v8 = vld [vmem:[#allocation2 + $0x2e0] sm:$0xff] }
 0x3b3   : > { %8868 = vst [vmem:[#allocation20_spill] sm:$0xff] %v6790_v55  ;;  %v2727_v7 = vrot.slane %v6807_v24, 2  ;;  %v2725_v16 = vrot.slane %v6815_v8, 2 }
 0x3b4   : > { %8869 = vst [vmem:[#allocation35_spill] sm:$0xff] %v6797_v39 }
 0x3b5   : > { %8873 = vst [vmem:[#allocation9_spill] sm:$0xff] %v6807_v24 }
 0x3b6   : > { %8875 = vst [vmem:[#allocation133_spill] sm:$0xff] %v6815_v8 }
 0x3b7   : > { %2789 = vrot.lane.b32.xlu1 %v6787_v60, %s4116_s22  ;;  %v6801_v22 = vpop.permute.xlu1 %2570  ;;  %v6810_v60 = vld [vmem:[#allocation2 + $0x300] sm:$0xff] }
 0x3b8   : > { %2785 = vrot.lane.b32.xlu2 %v6790_v55, %s4116_s22  ;;  %8870 = vst [vmem:[#allocation134_spill] sm:$0xff] %v6801_v22  ;;  %v6813_v55 = vrot.slane %v6810_v60, 2 }
 0x3b9   : > { %v6805_v0 = vpop.permute.xlu0 %2568  ;;  %8874 = vst [vmem:[#allocation54_spill] sm:$0xff] %v6810_v60 }
 0x3ba   : > { %2787 = vrot.lane.b32.xlu0 %v6797_v39, %s4116_s22  ;;  %v6803_v27 = vpop.permute.xlu2 %2584  ;;  %8872 = vst [vmem:[#allocation7_spill] sm:$0xff] %v6805_v0  ;;  %v6820_v22 = vsel %vm1165_vm3, %v2727_v7, %v6813_v55  ;;  %v6830_v0 = vsel %vm1165_vm3, %v2725_v16, %v2727_v7  ;;  %v2665_v39 = vld [vmem:[#allocation2 + $0x310] sm:$0x1]  ;;  %v2865_v7 = vld [vmem:[#allocation2 + $0x130] sm:$0x80] }
 0x3bb   : > { %8871 = vst [vmem:[#allocation13_spill] sm:$0xff] %v6803_v27  ;;  %v6823_v27 = vsel %vm1165_vm3, %v2723_v29, %v2725_v16  ;;  %v2731_v29 = vrot.slane %v2665_v39, 2 }
 0x3bc   : > { %8876 = vst [vmem:[#allocation135_spill] sm:$0xff] %v6820_v22 }
 0x3bf   : > { %2795 = vrot.lane.b32.xlu1 %v6820_v22, %s4116_s22  ;;  %v2732_v22 = vsel %vm1165_vm3, %v6813_v55, %v2731_v29 }
 0x3c0   : > { %2791 = vrot.lane.b32.xlu2 %v6823_v27, %s4116_s22  ;;  %v6834_v18 = vpop.permute.xlu1 %2576 }
 0x3c1   : > { %8877 = vst [vmem:[#allocation136_spill] sm:$0xff] %v6834_v18  ;;  %v6838_v58 = vpop.permute.xlu0 %2574 }
 0x3c2   : > { %2793 = vrot.lane.b32.xlu0 %v6830_v0, %s4116_s22  ;;  %v6836_v5 = vpop.permute.xlu2 %2590 }
 0x3c3   : > { %8878 = vst [vmem:[#allocation137_spill] sm:$0xff] %v6836_v5 }
 0x3c7   : > { %2875 = vrot.lane.b32.xlu1 %v6842_v47, %s4114_s20 }
 0x3c8   : > { %2797 = vrot.lane.b32.xlu2 %v2732_v22, %s4116_s22  ;;  %v6848_v16 = vpop.permute.xlu1 %2582 }
 0x3c9   : > { %v6852_v5 = vpop.permute.xlu0 %2580 }
 0x3ca   : > { %2873 = vrot.lane.b32.xlu0 %v2865_v7, %s4114_s20  ;;  %v6850_v18 = vpop.permute.xlu2 %2596 }
 0x3cf   : > { %2881 = vrot.lane.b32.xlu1 %v6533_v52, %s4114_s20 }
 0x3d0   : > { %2877 = vrot.lane.b32.xlu2 %v6482_v61, %s4114_s20 }
 0x3d1   : > { %v6860_v39 = vpop.permute.xlu1 %2588  ;;  %v6864_v29 = vpop.permute.xlu0 %2586 }
 0x3d2   : > { %2879 = vrot.lane.b32.xlu0 %v6509_v46, %s4114_s20  ;;  %v6862_v22 = vpop.permute.xlu2 %2737 }
 0x3d7   : > { %2887 = vrot.lane.b32.xlu1 %v6607_v2, %s4114_s20 }
 0x3d8   : > { %2883 = vrot.lane.b32.xlu2 %v6552_v62, %s4114_s20 }
 0x3d9   : > { %v6872_v7 = vpop.permute.xlu1 %2594  ;;  %v6876_v46 = vpop.permute.xlu0 %2592 }
 0x3da   : > { %2885 = vrot.lane.b32.xlu0 %v6602_v56, %s4114_s20  ;;  %8880 = vst [vmem:[#allocation140_spill] sm:$0xff] %v6872_v7  ;;  %v6874_v47 = vpop.permute.xlu2 %2743  ;;  %v654_v7 = vld [vmem:[%s4165_s19 + $0x1b8] sm:$0xff] }
 0x3db   : > { %8881 = vst [vmem:[#allocation43_spill] sm:$0xff] %v6874_v47 }
 0x3dc   : > { %8882 = vst [vmem:[#allocation26_spill] sm:$0xff] %v6876_v46  ;;  %v6894_v46 = vpop.f32.mrf.mxu0 }
 0x3dd   : > { %855 = vst [vmem:[#allocation2 + $0x330] sm:$0xff] %v6894_v46 }
 0x3df   : > { %2893 = vrot.lane.b32.xlu1 %v6633_v43, %s4114_s20  ;;  %v8902_v43 = vld [vmem:[#allocation44_spill] sm:$0xff] }
 0x3e0   : > { %2889 = vrot.lane.b32.xlu2 %v6599_v53, %s4114_s20 }
 0x3e1   : > { %v6884_v61 = vpop.permute.xlu1 %2735 }
 0x3e2   : > { %2891 = vrot.lane.b32.xlu0 %v6639_v20, %s4114_s20  ;;  %8883 = vst [vmem:[#allocation53_spill] sm:$0xff] %v6884_v61  ;;  %v6886_v62 = vpop.permute.xlu2 %2749 }
 0x3e3   : > { %8884 = vst [vmem:[#allocation40_spill] sm:$0xff] %v6886_v62 }
 0x3e4   : > { %v6888_v56 = vpop.permute.xlu0 %2733 }
 0x3e5   : > { %8885 = vst [vmem:[#allocation27_spill] sm:$0xff] %v6888_v56 }
 0x3e7   : > { %2899 = vrot.lane.b32.xlu1 %v6671_v63, %s4114_s20 }
 0x3e8   : > { %2895 = vrot.lane.b32.xlu2 %v6636_v3, %s4114_s20 }
 0x3e9   : > { %v6899_v20 = vpop.permute.xlu1 %2741 }
 0x3ea   : > { %2897 = vrot.lane.b32.xlu0 %v6668_v42, %s4114_s20  ;;  %8886 = vst [vmem:[#allocation55_spill] sm:$0xff] %v6899_v20  ;;  %v6901_v61 = vpop.permute.xlu2 %2755  ;;  %v8900_v20 = vld [vmem:[#allocation29_spill] sm:$0xff] }
 0x3eb   : > { %8887 = vst [vmem:[#allocation72_spill] sm:$0xff] %v6901_v61 }
 0x3ec   : > { %v6903_v62 = vpop.permute.xlu0 %2739 }
 0x3ed   : > { %8888 = vst [vmem:[#allocation143_spill] sm:$0xff] %v6903_v62 }
 0x3ef   : > { %2905 = vrot.lane.b32.xlu1 %v6695_v13, %s4114_s20 }
 0x3f0   : > { %2901 = vrot.lane.b32.xlu2 %v6665_v48, %s4114_s20  ;;  %v6911_v3 = vpop.f32.mrf.mxu0 }
 0x3f1   : > { %8889 = vst [vmem:[#allocation63_spill] sm:$0xff] %v6911_v3  ;;  %v6913_v42 = vpop.permute.xlu1 %2747 }
 0x3f2   : > { %2903 = vrot.lane.b32.xlu0 %v6701_v21, %s4114_s20  ;;  %8890 = vst [vmem:[#allocation46_spill] sm:$0xff] %v6913_v42  ;;  %v6915_v63 = vpop.permute.xlu2 %2761 }
 0x3f3   : > { %8891 = vst [vmem:[#allocation30_spill] sm:$0xff] %v6915_v63  ;;  %v2868_v63 = vld [vmem:[#allocation2 + $0x330] sm:$0x7f] }
 0x3f4   : > { %857 = vst [vmem:[#allocation2 + $0x340] sm:$0xff] %v6911_v3  ;;  %v6918_v61 = vpop.permute.xlu0 %2745 }
 0x3f5   : > { %8892 = vst [vmem:[#allocation57_spill] sm:$0xff] %v6918_v61 }
 0x3f7   : > { %2911 = vrot.lane.b32.xlu1 %v6183_v1, %s4114_s20 }
 0x3f8   : > { %2907 = vrot.lane.b32.xlu2 %v6698_v44, %s4114_s20 }
 0x3f9   : > { %v6926_v48 = vpop.permute.xlu1 %2753 }
 0x3fa   : > { %2909 = vrot.lane.b32.xlu0 %v6154_v51, %s4114_s20  ;;  %8893 = vst [vmem:[#allocation68_spill] sm:$0xff] %v6926_v48  ;;  %v6928_v62 = vpop.permute.xlu2 %2767 }
 0x3fb   : > { %8894 = vst [vmem:[#allocation73_spill] sm:$0xff] %v6928_v62 }
 0x3fc   : > { %v6930_v42 = vpop.permute.xlu0 %2751 }
 0x3fd   : > { %8895 = vst [vmem:[#allocation88_spill] sm:$0xff] %v6930_v42 }
 0x3ff   : > { %2917 = vrot.lane.b32.xlu1 %v6749_v35, %s4114_s20 }
 0x400   : > { %2913 = vrot.lane.b32.xlu2 %v6200_v9, %s4114_s20 }
 0x401   : > { %v6938_v1 = vpop.permute.xlu1 %2759 }
 0x402   : > { %2915 = vrot.lane.b32.xlu0 %v6248_v28, %s4114_s20  ;;  %8896 = vst [vmem:[#allocation78_spill] sm:$0xff] %v6938_v1  ;;  %v6940_v3 = vpop.permute.xlu2 %2773 }
 0x404   : > { %v6942_v51 = vpop.permute.xlu0 %2757 }
 0x405   : > { %8897 = vst [vmem:[#allocation59_spill] sm:$0xff] %v6942_v51 }
 0x407   : > { %2923 = vrot.lane.b32.xlu1 %v6783_v30, %s4114_s20 }
 0x408   : > { %2919 = vrot.lane.b32.xlu2 %v6752_v59, %s4114_s20 }
 0x409   : > { %v6950_v42 = vpop.permute.xlu1 %2765 }
 0x40a   : > { %2921 = vrot.lane.b32.xlu0 %v6780_v50, %s4114_s20  ;;  %8898 = vst [vmem:[#allocation89_spill] sm:$0xff] %v6950_v42  ;;  %v6952_v9 = vpop.permute.xlu2 %2779 }
 0x40c   : > { %v6954_v28 = vpop.permute.xlu0 %2763 }
 0x40d   : > { %8899 = vst [vmem:[#allocation146_spill] sm:$0xff] %v6954_v28  ;;  %v6972_v28 = vld [vmem:[#allocation2 + $0x310] sm:$0xff] }
 0x40f   : > { %2929 = vrot.lane.b32.xlu1 %v6807_v24, %s4114_s20  ;;  %v653_v24 = vld [vmem:[%s4165_s19 + $0x1b0] sm:$0xff] }
 0x410   : > { %2925 = vrot.lane.b32.xlu2 %v6777_v45, %s4114_s20  ;;  %v664_v2 = vpack.c.bf16 %v654_v7, %v653_v24 }
 0x411   : > { %v6962_v51 = vpop.permute.xlu1 %2771 }
 0x412   : > { %2927 = vrot.lane.b32.xlu0 %v6815_v8, %s4114_s20  ;;  %v6964_v1 = vpop.permute.xlu2 %2785  ;;  %v8903_v8 = vld [vmem:[#allocation32_spill] sm:$0xff]  ;;  %4002 = vmatmul.msk.bf16.gmra.mxu0 %vm208_vm1, %v664_v2 }
 0x413   : > { %4012 = vmatmul.msk.bf16.gmra.mxu1 %vm208_vm1, %v664_v2 }
 0x414   : > { %v6966_v62 = vpop.permute.xlu0 %2769 }
 0x417   : > { %2935 = vrot.lane.b32.xlu1 %v6161_v40, %s4114_s20  ;;  %v8901_v40 = vld [vmem:[#allocation176_spill] sm:$0xff] }
 0x418   : > { %2931 = vrot.lane.b32.xlu2 %v6810_v60, %s4114_s20 }
 0x419   : > { %v6976_v42 = vpop.permute.xlu1 %2777 }
 0x41a   : > { %2933 = vrot.lane.b32.xlu0 %v6972_v28, %s4114_s20  ;;  %v6978_v48 = vpop.permute.xlu2 %2791 }
 0x41c   : > { %v6980_v61 = vpop.permute.xlu0 %2775 }
 0x41f   : > { %3015 = vrot.lane.b32.xlu1 %v8900_v20, %s4117_s23  ;;  %v8904_v20 = vld [vmem:[#allocation33_spill] sm:$0xff] }
 0x420   : > { %2937 = vrot.lane.b32.xlu2 %v2868_v63, %s4114_s20 }
 0x421   : > { %v6987_v60 = vpop.permute.xlu1 %2783 }
 0x422   : > { %3013 = vrot.lane.b32.xlu0 %v8901_v40, %s4117_s23  ;;  %v6989_v56 = vpop.permute.xlu2 %2797 }
 0x424   : > { %v6991_v53 = vpop.permute.xlu0 %2781 }
 0x427   : > { %3021 = vrot.lane.b32.xlu1 %v8902_v43, %s4117_s23 }
 0x428   : > { %3017 = vrot.lane.b32.xlu2 %v8903_v8, %s4117_s23 }
 0x429   : > { %v6999_v63 = vpop.permute.xlu1 %2789 }
 0x42a   : > { %3019 = vrot.lane.b32.xlu0 %v8904_v20, %s4117_s23  ;;  %v7001_v40 = vpop.permute.xlu2 %2877 }
 0x42c   : > { %v7003_v47 = vpop.permute.xlu0 %2787 }
 0x42f   : > { %3027 = vrot.lane.b32.xlu1 %v5761_v6, %s4117_s23 }
 0x430   : > { %3023 = vrot.lane.b32.xlu2 %v5738_v17, %s4117_s23 }
 0x431   : > { %v7011_v43 = vpop.permute.xlu1 %2795 }
 0x432   : > { %3025 = vrot.lane.b32.xlu0 %v5749_v10, %s4117_s23  ;;  %v7013_v8 = vpop.permute.xlu2 %2883  ;;  %v8906_v10 = vld [vmem:[#allocation62_spill] sm:$0xff] }
 0x434   : > { %v7015_v20 = vpop.permute.xlu0 %2793 }
 0x435   : > { %8905 = vst [vmem:[#allocation60_spill] sm:$0xff] %v7015_v20 }
 0x437   : > { %3033 = vrot.lane.b32.xlu1 %v5807_v11, %s4117_s23  ;;  %v8918_v11 = vld [vmem:[#allocation79_spill] sm:$0xff] }
 0x438   : > { %3029 = vrot.lane.b32.xlu2 %v5776_v23, %s4117_s23  ;;  %v8917_v23 = vld [vmem:[#allocation80_spill] sm:$0xff] }
 0x439   : > { %v7027_v17 = vpop.permute.xlu1 %2875 }
 0x43a   : > { %3031 = vrot.lane.b32.xlu0 %v8906_v10, %s4117_s23  ;;  %8907 = vst [vmem:[#allocation64_spill] sm:$0xff] %v7027_v17  ;;  %v7029_v6 = vpop.permute.xlu2 %2889 }
 0x43b   : > { %8908 = vst [vmem:[#allocation75_spill] sm:$0xff] %v7029_v6  ;;  %v8944_v6 = vld [vmem:[#allocation115_spill] sm:$0xff] }
 0x43c   : > { %v7031_v20 = vpop.permute.xlu0 %2873 }
 0x43d   : > { %8909 = vst [vmem:[#allocation77_spill] sm:$0xff] %v7031_v20  ;;  %v8943_v20 = vld [vmem:[#allocation114_spill] sm:$0xff] }
 0x43f   : > { %3039 = vrot.lane.b32.xlu1 %v5895_v31, %s4117_s23  ;;  %v8913_v31 = vld [vmem:[#allocation95_spill] sm:$0xff] }
 0x440   : > { %3035 = vrot.lane.b32.xlu2 %v5860_v36, %s4117_s23 }
 0x441   : > { %v7039_v2 = vpop.permute.xlu1 %2881 }
 0x442   : > { %3037 = vrot.lane.b32.xlu0 %v5871_v41, %s4117_s23  ;;  %8910 = vst [vmem:[#allocation165_spill] sm:$0xff] %v7039_v2  ;;  %v7041_v24 = vpop.permute.xlu2 %2895 }
 0x443   : > { %8911 = vst [vmem:[#allocation93_spill] sm:$0xff] %v7041_v24  ;;  %v8938_v24 = vld [vmem:[#allocation107_spill] sm:$0xff] }
 0x444   : > { %v7043_v7 = vpop.permute.xlu0 %2879 }
 0x445   : > { %8912 = vst [vmem:[#allocation172_spill] sm:$0xff] %v7043_v7 }
 0x447   : > { %3045 = vrot.lane.b32.xlu1 %v5964_v32, %s4117_s23  ;;  %v8919_v32 = vld [vmem:[#allocation97_spill] sm:$0xff] }
 0x448   : > { %3041 = vrot.lane.b32.xlu2 %v8703_v34, %s4117_s23 }
 0x449   : > { %v7051_v10 = vpop.permute.xlu1 %2887 }
 0x44a   : > { %3043 = vrot.lane.b32.xlu0 %v8913_v31, %s4117_s23  ;;  %8914 = vst [vmem:[#allocation173_spill] sm:$0xff] %v7051_v10  ;;  %v7053_v36 = vpop.permute.xlu2 %2901  ;;  %v8937_v10 = vld [vmem:[#allocation106_spill] sm:$0xff] }
 0x44b   : > { %8915 = vst [vmem:[#allocation177_spill] sm:$0xff] %v7053_v36 }
 0x44c   : > { %v7055_v41 = vpop.permute.xlu0 %2885 }
 0x44d   : > { %8916 = vst [vmem:[#allocation58_spill] sm:$0xff] %v7055_v41 }
 0x44f   : > { %3051 = vrot.lane.b32.xlu1 %v8917_v23, %s4117_s23  ;;  %v8923_v23 = vld [vmem:[#allocation83_spill] sm:$0xff] }
 0x450   : > { %3047 = vrot.lane.b32.xlu2 %v8918_v11, %s4117_s23 }
 0x451   : > { %v7063_v7 = vpop.permute.xlu1 %2893 }
 0x452   : > { %3049 = vrot.lane.b32.xlu0 %v8919_v32, %s4117_s23  ;;  %8920 = vst [vmem:[#allocation152_spill] sm:$0xff] %v7063_v7  ;;  %v7065_v34 = vpop.permute.xlu2 %2907 }
 0x453   : > { %8921 = vst [vmem:[#allocation166_spill] sm:$0xff] %v7065_v34 }
 0x454   : > { %v7067_v31 = vpop.permute.xlu0 %2891 }
 0x455   : > { %8922 = vst [vmem:[#allocation39_spill] sm:$0xff] %v7067_v31  ;;  %v3145_v31 = vld [vmem:[#allocation2 + $0x140] sm:$0xfe] }
 0x457   : > { %3057 = vrot.lane.b32.xlu1 %v6304_v26, %s4117_s23 }
 0x458   : > { %3053 = vrot.lane.b32.xlu2 %v6290_v49, %s4117_s23 }
 0x459   : > { %v7075_v41 = vpop.permute.xlu1 %2899 }
 0x45a   : > { %3055 = vrot.lane.b32.xlu0 %v8923_v23, %s4117_s23  ;;  %8924 = vst [vmem:[#allocation167_spill] sm:$0xff] %v7075_v41  ;;  %v7077_v11 = vpop.permute.xlu2 %2913 }
 0x45c   : > { %v7079_v32 = vpop.permute.xlu0 %2897 }
 0x45d   : > { %8925 = vst [vmem:[#allocation12_spill] sm:$0xff] %v7079_v32  ;;  %v7107_v32 = vrot.slane %v6894_v46, 1 }
 0x45f   : > { %3063 = vrot.lane.b32.xlu1 %v6360_v4, %s4117_s23  ;;  %8928 = vst [vmem:[#allocation139_spill] sm:$0xff] %v7107_v32 }
 0x460   : > { %3059 = vrot.lane.b32.xlu2 %v6365_v57, %s4117_s23 }
 0x461   : > { %v7087_v26 = vpop.permute.xlu1 %2905 }
 0x462   : > { %3061 = vrot.lane.b32.xlu0 %v6374_v37, %s4117_s23  ;;  %8926 = vst [vmem:[#allocation37_spill] sm:$0xff] %v7087_v26  ;;  %v7089_v49 = vpop.permute.xlu2 %2919  ;;  %v3007_v37 = vrot.slane %v6972_v28, 1 }
 0x464   : > { %v7091_v23 = vpop.permute.xlu0 %2903 }
 0x465   : > { %8927 = vst [vmem:[#allocation15_spill] sm:$0xff] %v7091_v23  ;;  %v7109_v23 = vld [vmem:[#allocation2 + $0x320] sm:$0xff] }
 0x467   : > { %3069 = vrot.lane.b32.xlu1 %v6422_v33, %s4117_s23  ;;  %v3009_v33 = vrot.slane %v7109_v23, 1 }
 0x468   : > { %3065 = vrot.lane.b32.xlu2 %v6427_v15, %s4117_s23 }
 0x469   : > { %v7099_v4 = vpop.permute.xlu1 %2911  ;;  %v7114_v15 = vsel %vm965_vm2, %v3009_v33, %v7107_v32  ;;  %v7125_v41 = vsel %vm965_vm2, %v3007_v37, %v3009_v33 }
 0x46a   : > { %3067 = vrot.lane.b32.xlu0 %v6437_v54, %s4117_s23  ;;  %v7101_v57 = vpop.permute.xlu2 %2925  ;;  %8929 = vst [vmem:[#allocation145_spill] sm:$0xff] %v7114_v15  ;;  %v7118_v54 = vsel %vm965_vm2, %v6395_v25, %v3007_v37  ;;  %v3149_v25 = vrot.slane %v3145_v31, 2 }
 0x46b   : > { %8930 = vst [vmem:[#allocation149_spill] sm:$0xff] %v7118_v54 }
 0x46c   : > { %v7104_v26 = vpop.permute.xlu0 %2909  ;;  %8931 = vst [vmem:[#allocation168_spill] sm:$0xff] %v7125_v41 }
 0x46f   : > { %3075 = vrot.lane.b32.xlu1 %v7114_v15, %s4117_s23  ;;  %v3150_v15 = vsel %vm1165_vm3, %v3149_v25, %v6485_v19 }
 0x470   : > { %3071 = vrot.lane.b32.xlu2 %v7118_v54, %s4117_s23  ;;  %v8933_v54 = vld [vmem:[#allocation98_spill] sm:$0xff] }
 0x471   : > { %v7129_v34 = vpop.permute.xlu1 %2917 }
 0x472   : > { %3073 = vrot.lane.b32.xlu0 %v7125_v41, %s4117_s23  ;;  %v7131_v7 = vpop.permute.xlu2 %2931 }
 0x474   : > { %v7133_v36 = vpop.permute.xlu0 %2915 }
 0x477   : > { %3161 = vrot.lane.b32.xlu1 %v3150_v15, %s4118_s24 }
 0x478   : > { %3077 = vrot.lane.b32.xlu2 %v7107_v32, %s4117_s23 }
 0x479   : > { %v7141_v37 = vpop.permute.xlu1 %2923 }
 0x47a   : > { %3159 = vrot.lane.b32.xlu0 %v3149_v25, %s4118_s24  ;;  %v7143_v33 = vpop.permute.xlu2 %2937  ;;  %v8932_v25 = vld [vmem:[#allocation19_spill] sm:$0xff] }
 0x47c   : > { %v7145_v41 = vpop.permute.xlu0 %2921 }
 0x47f   : > { %3167 = vrot.lane.b32.xlu1 %v6567_v14, %s4118_s24  ;;  %v8934_v14 = vld [vmem:[#allocation31_spill] sm:$0xff] }
 0x480   : > { %3163 = vrot.lane.b32.xlu2 %v6573_v12, %s4118_s24 }
 0x481   : > { %v7153_v31 = vpop.permute.xlu1 %2929 }
 0x482   : > { %3165 = vrot.lane.b32.xlu0 %v6583_v38, %s4118_s24  ;;  %v7155_v15 = vpop.permute.xlu2 %3017 }
 0x484   : > { %v7157_v19 = vpop.permute.xlu0 %2927 }
 0x487   : > { %3173 = vrot.lane.b32.xlu1 %v8932_v25, %s4118_s24  ;;  %v8939_v25 = vld [vmem:[#allocation109_spill] sm:$0xff] }
 0x488   : > { %3169 = vrot.lane.b32.xlu2 %v8933_v54, %s4118_s24 }
 0x489   : > { %v7165_v32 = vpop.permute.xlu1 %2935 }
 0x48a   : > { %3171 = vrot.lane.b32.xlu0 %v8934_v14, %s4118_s24  ;;  %v7167_v12 = vpop.permute.xlu2 %3023 }
 0x48b   : > { %8935 = vst [vmem:[#allocation169_spill] sm:$0xff] %v7167_v12 }
 0x48c   : > { %v7169_v38 = vpop.permute.xlu0 %2933 }
 0x48d   : > { %8936 = vst [vmem:[#allocation170_spill] sm:$0xff] %v7169_v38 }
 0x48f   : > { %3179 = vrot.lane.b32.xlu1 %v8937_v10, %s4118_s24  ;;  %v8945_v10 = vld [vmem:[#allocation117_spill] sm:$0xff] }
 0x490   : > { %3175 = vrot.lane.b32.xlu2 %v8938_v24, %s4118_s24 }
 0x491   : > { %v7177_v2 = vpop.permute.xlu1 %3015 }
 0x492   : > { %3177 = vrot.lane.b32.xlu0 %v8939_v25, %s4118_s24  ;;  %8940 = vst [vmem:[#allocation24_spill] sm:$0xff] %v7177_v2  ;;  %v7179_v54 = vpop.permute.xlu2 %3029  ;;  %v8949_v2 = vld [vmem:[#allocation121_spill] sm:$0xff] }
 0x493   : > { %8941 = vst [vmem:[#allocation23_spill] sm:$0xff] %v7179_v54 }
 0x494   : > { %v7181_v14 = vpop.permute.xlu0 %3013 }
 0x495   : > { %8942 = vst [vmem:[#allocation38_spill] sm:$0xff] %v7181_v14  ;;  %v8950_v14 = vld [vmem:[#allocation122_spill] sm:$0xff] }
 0x497   : > { %3185 = vrot.lane.b32.xlu1 %v8943_v20, %s4118_s24  ;;  %v8951_v20 = vld [vmem:[#allocation123_spill] sm:$0xff] }
 0x498   : > { %3181 = vrot.lane.b32.xlu2 %v8944_v6, %s4118_s24 }
 0x499   : > { %v7189_v17 = vpop.permute.xlu1 %3021 }
 0x49a   : > { %3183 = vrot.lane.b32.xlu0 %v8945_v10, %s4118_s24  ;;  %8946 = vst [vmem:[#allocation157_spill] sm:$0xff] %v7189_v17  ;;  %v7191_v24 = vpop.permute.xlu2 %3035  ;;  %v8955_v17 = vld [vmem:[#allocation34_spill] sm:$0xff] }
 0x49b   : > { %8947 = vst [vmem:[#allocation141_spill] sm:$0xff] %v7191_v24 }
 0x49c   : > { %v7193_v25 = vpop.permute.xlu0 %3019 }
 0x49d   : > { %8948 = vst [vmem:[#allocation142_spill] sm:$0xff] %v7193_v25  ;;  %v8956_v25 = vld [vmem:[#allocation163_spill] sm:$0xff] }
 0x49f   : > { %3191 = vrot.lane.b32.xlu1 %v8949_v2, %s4118_s24  ;;  %v8957_v2 = vld [vmem:[#allocation164_spill] sm:$0xff] }
 0x4a0   : > { %3187 = vrot.lane.b32.xlu2 %v8950_v14, %s4118_s24 }
 0x4a1   : > { %v7201_v54 = vpop.permute.xlu1 %3027 }
 0x4a2   : > { %3189 = vrot.lane.b32.xlu0 %v8951_v20, %s4118_s24  ;;  %8952 = vst [vmem:[#allocation147_spill] sm:$0xff] %v7201_v54  ;;  %v7203_v6 = vpop.permute.xlu2 %3041  ;;  %v7219_v54 = vpop.f32.mrf.mxu0 }
 0x4a3   : > { %8953 = vst [vmem:[#allocation160_spill] sm:$0xff] %v7203_v6  ;;  %v8962_v6 = vld [vmem:[#allocation4_spill] sm:$0xff] }
 0x4a4   : > { %v7205_v10 = vpop.permute.xlu0 %3025  ;;  %8961 = vst [vmem:[#allocation48_spill] sm:$0xff] %v7219_v54 }
 0x4a5   : > { %8954 = vst [vmem:[#allocation36_spill] sm:$0xff] %v7205_v10  ;;  %v2651_v10 = vadd.f32 %v6698_v44, %v8962_v6 }
 0x4a7   : > { %3197 = vrot.lane.b32.xlu1 %v8955_v17, %s4118_s24  ;;  %v2852_v38 = vadd.f32 %v6940_v3, %v2651_v10  ;;  %v8963_v17 = vld [vmem:[#allocation22_spill] sm:$0xff]  ;;  %v7239_v3 = vld [vmem:[#allocation2 + $0x270] sm:$0xff] }
 0x4a8   : > { %3193 = vrot.lane.b32.xlu2 %v8956_v25, %s4118_s24  ;;  %v8964_v25 = vld [vmem:[#allocation129_spill] sm:$0xff]  ;;  %v8970_v10 = vld [vmem:[#allocation130_spill] sm:$0xff] }
 0x4a9   : > { %v7213_v24 = vpop.permute.xlu1 %3033 }
 0x4aa   : > { %3195 = vrot.lane.b32.xlu0 %v8957_v2, %s4118_s24  ;;  %8958 = vst [vmem:[#allocation17_spill] sm:$0xff] %v7213_v24  ;;  %v7215_v14 = vpop.permute.xlu2 %3047  ;;  %v2992_v2 = vadd.f32 %v7077_v11, %v2852_v38  ;;  %v8965_v24 = vld [vmem:[#allocation126_spill] sm:$0xff]  ;;  %v7237_v6 = vpop.f32.mrf.mxu0  ;;  %v8971_v38 = vld [vmem:[#allocation132_spill] sm:$0xff] }
 0x4ab   : > { %8959 = vst [vmem:[#allocation171_spill] sm:$0xff] %v7215_v14 }
 0x4ac   : > { %v7217_v20 = vpop.permute.xlu0 %3031  ;;  %8969 = vst [vmem:[#allocation174_spill] sm:$0xff] %v7237_v6 }
 0x4ad   : > { %8960 = vst [vmem:[#allocation144_spill] sm:$0xff] %v7217_v20 }
 0x4ae   : > { %861 = vst [vmem:[#allocation2 + $0x360] sm:$0xff] %v7237_v6  ;;  %v8974_v6 = vld [vmem:[#allocation134_spill] sm:$0xff] }
 0x4af   : > { %3203 = vrot.lane.b32.xlu1 %v8963_v17, %s4118_s24  ;;  %v2654_v17 = vadd.f32 %v7239_v3, %v8970_v10 }
 0x4b0   : > { %3199 = vrot.lane.b32.xlu2 %v8964_v25, %s4118_s24  ;;  %v8973_v25 = vld [vmem:[#allocation35_spill] sm:$0xff] }
 0x4b1   : > { %v7231_v14 = vpop.permute.xlu1 %3039  ;;  %v2855_v11 = vadd.f32 %v6952_v9, %v2654_v17  ;;  %v2650_v9 = vadd.f32 %v6695_v13, %v8974_v6  ;;  %v8975_v17 = vld [vmem:[#allocation13_spill] sm:$0xff] }
 0x4b2   : > { %3201 = vrot.lane.b32.xlu0 %v8965_v24, %s4118_s24  ;;  %8966 = vst [vmem:[#allocation16_spill] sm:$0xff] %v7231_v14  ;;  %v3054_v20 = vpop.permute.xlu2 %3053  ;;  %v8972_v24 = vld [vmem:[#allocation20_spill] sm:$0xff]  ;;  %v8976_v14 = vld [vmem:[#allocation7_spill] sm:$0xff] }
 0x4b3   : > { %v7233_v54 = vadd.f32 %v3054_v20, %v2992_v2  ;;  %v2995_v20 = vadd.f32 %v7089_v49, %v2855_v11  ;;  %v2851_v49 = vadd.f32 %v6962_v51, %v2650_v9 }
 0x4b4   : > { %v7235_v12 = vpop.permute.xlu0 %3037 }
 0x4b5   : > { %8967 = vst [vmem:[#allocation50_spill] sm:$0xff] %v7233_v54  ;;  %v2991_v6 = vadd.f32 %v7099_v4, %v2851_v49  ;;  %v3153_v4 = vrot.slane %v7109_v23, 2  ;;  %v8979_v49 = vld [vmem:[#allocation137_spill] sm:$0xff] }
 0x4b6   : > { %8968 = vst [vmem:[#allocation52_spill] sm:$0xff] %v7235_v12 }
 0x4b7   : > { %3209 = vrot.lane.b32.xlu1 %v8971_v38, %s4118_s24  ;;  %v2657_v38 = vadd.f32 %v6752_v59, %v8975_v17 }
 0x4b8   : > { %3205 = vrot.lane.b32.xlu2 %v8972_v24, %s4118_s24  ;;  %v2649_v24 = vadd.f32 %v6701_v21, %v8976_v14 }
 0x4b9   : > { %v7252_v2 = vpop.permute.xlu1 %3045  ;;  %v2858_v11 = vadd.f32 %v6964_v1, %v2657_v38  ;;  %v3151_v1 = vrot.slane %v6972_v28, 2 }
 0x4ba   : > { %3207 = vrot.lane.b32.xlu0 %v8973_v25, %s4118_s24  ;;  %v3060_v54 = vpop.permute.xlu2 %3059  ;;  %v2850_v25 = vadd.f32 %v6966_v62, %v2649_v24 }
 0x4bb   : > { %v7254_v12 = vadd.f32 %v3060_v54, %v2995_v20  ;;  %v8977_v54 = vld [vmem:[#allocation135_spill] sm:$0xff]  ;;  %v2998_v20 = vadd.f32 %v7101_v57, %v2858_v11  ;;  %v2660_v11 = vadd.f32 %v6777_v45, %v8979_v49 }
 0x4bc   : > { %v7256_v10 = vpop.permute.xlu0 %3043  ;;  %v2990_v14 = vadd.f32 %v7104_v26, %v2850_v25  ;;  %v7285_v57 = vld [vmem:[#allocation2 + $0x260] sm:$0xff]  ;;  %v7291_v25 = vld [vmem:[#allocation2 + $0x250] sm:$0xff] }
 0x4bf   : > { %3215 = vrot.lane.b32.xlu1 %v8977_v54, %s4118_s24  ;;  %v2652_v54 = vadd.f32 %v7291_v25, %v6838_v58 }
 0x4c0   : > { %3211 = vrot.lane.b32.xlu2 %v6823_v27, %s4118_s24  ;;  %v3155_v27 = vrot.slane %v6894_v46, 2 }
 0x4c1   : > { %v3052_v51 = vpop.permute.xlu1 %3051 }
 0x4c2   : > { %3213 = vrot.lane.b32.xlu0 %v6830_v0, %s4118_s24  ;;  %v3066_v9 = vpop.permute.xlu2 %3065  ;;  %v7277_v62 = vadd.f32 %v3052_v51, %v2991_v6  ;;  %v8978_v0 = vld [vmem:[#allocation136_spill] sm:$0xff]  ;;  %v3152_v51 = vsel %vm1165_vm3, %v6813_v55, %v3151_v1 }
 0x4c3   : > { %v7279_v17 = vadd.f32 %v3066_v9, %v2998_v20  ;;  %v2653_v26 = vadd.f32 %v7285_v57, %v8978_v0  ;;  %v2861_v20 = vadd.f32 %v6978_v48, %v2660_v11  ;;  %v2853_v9 = vadd.f32 %v6980_v61, %v2652_v54  ;;  %v3146_v0 = vld [vmem:[#allocation2 + $0x340] sm:$0x1] }
 0x4c4   : > { %v3050_v38 = vpop.permute.xlu0 %3049  ;;  %v3157_v54 = vrot.slane %v3146_v0, 2  ;;  %v4100_v0 = vld [vmem:[#allocation2 + $0x120] sm:$0xff] }
 0x4c5   : > { %v7283_v24 = vadd.f32 %v3050_v38, %v2990_v14  ;;  %v2854_v6 = vadd.f32 %v6976_v42, %v2653_v26  ;;  %v3156_v14 = vsel %vm1165_vm3, %v3153_v4, %v3155_v27  ;;  %v3154_v38 = vsel %vm1165_vm3, %v3151_v1, %v3153_v4  ;;  %v7317_v1 = vld [vmem:[#allocation2 + $0x280] sm:$0xff] }
 0x4c6   : > { %v3001_v42 = vadd.f32 %v7131_v7, %v2861_v20  ;;  %v2993_v48 = vadd.f32 %v7133_v36, %v2853_v9  ;;  %v2655_v36 = vadd.f32 %v7317_v1, %v6852_v5  ;;  %v3158_v20 = vsel %vm1165_vm3, %v3155_v27, %v3157_v54  ;;  %v8980_v27 = vld [vmem:[#allocation105_spill] sm:$0xff]  ;;  %v8981_v54 = vld [vmem:[#allocation96_spill] sm:$0xff] }
 0x4c7   : > { %3221 = vrot.lane.b32.xlu1 %v3156_v14, %s4118_s24  ;;  %v2994_v58 = vadd.f32 %v7129_v34, %v2854_v6  ;;  %v2402_v14 = vld [vmem:[#allocation2 + $0x300] sm:$0x7f]  ;;  %v2656_v34 = vadd.f32 %v6749_v35, %v6848_v16  ;;  %v3291_v16 = vld [vmem:[#allocation2 + $0x160] sm:$0x80] }
 0x4c8   : > { %3217 = vrot.lane.b32.xlu2 %v3152_v51, %s4118_s24  ;;  %v2663_v7 = vadd.f32 %v6850_v18, %v2402_v14  ;;  %v2856_v9 = vadd.f32 %v6991_v53, %v2655_v36  ;;  %v8982_v14 = vld [vmem:[#allocation90_spill] sm:$0xff]  ;;  %v8985_v36 = vld [vmem:[#allocation87_spill] sm:$0xff] }
 0x4c9   : > { %v3058_v26 = vpop.permute.xlu1 %3057  ;;  %v2857_v4 = vadd.f32 %v6987_v60, %v2656_v34 }
 0x4ca   : > { %3219 = vrot.lane.b32.xlu0 %v3154_v38, %s4118_s24  ;;  %v3072_v49 = vpop.permute.xlu2 %3071  ;;  %v7308_v55 = vadd.f32 %v3058_v26, %v2994_v58  ;;  %v2864_v6 = vadd.f32 %v6989_v56, %v2663_v7  ;;  %v2996_v5 = vadd.f32 %v7145_v41, %v2856_v9  ;;  %v2633_v58 = vadd.f32 %v4100_v0, %v8980_v27  ;;  %v8991_v27 = vld [vmem:[#allocation60_spill] sm:$0xff] }
 0x4cb   : > { %v7310_v61 = vadd.f32 %v3072_v49, %v3001_v42  ;;  %v2997_v18 = vadd.f32 %v7141_v37, %v2857_v4  ;;  %v2659_v37 = vadd.f32 %v6783_v30, %v6860_v39  ;;  %v2658_v41 = vadd.f32 %v6780_v50, %v6864_v29 }
 0x4cc   : > { %v3056_v11 = vpop.permute.xlu0 %3055  ;;  %v3004_v38 = vadd.f32 %v7143_v33, %v2864_v6  ;;  %v2834_v33 = vadd.f32 %v6862_v22, %v2633_v58  ;;  %v8983_v22 = vld [vmem:[#allocation94_spill] sm:$0xff] }
 0x4cd   : > { %v7312_v51 = vadd.f32 %v3056_v11, %v2993_v48  ;;  %v2860_v26 = vadd.f32 %v6999_v63, %v2659_v37  ;;  %v2859_v11 = vadd.f32 %v7003_v47, %v2658_v41  ;;  %v8993_v37 = vld [vmem:[#allocation14_spill] sm:$0xff]  ;;  %v8994_v41 = vld [vmem:[#allocation169_spill] sm:$0xff] }
 0x4ce   : > { %v2974_v49 = vadd.f32 %v7001_v40, %v2834_v33  ;;  %v8984_v40 = vld [vmem:[#allocation92_spill] sm:$0xff] }
 0x4cf   : > { %3301 = vrot.lane.b32.xlu1 %v6533_v52, %s4119_s25  ;;  %v3000_v34 = vadd.f32 %v7153_v31, %v2860_v26  ;;  %v2999_v29 = vadd.f32 %v7157_v19, %v2859_v11  ;;  %v2636_v47 = vadd.f32 %v8985_v36, %v8984_v40  ;;  %v8986_v31 = vld [vmem:[#allocation140_spill] sm:$0xff]  ;;  %v8996_v11 = vld [vmem:[#allocation170_spill] sm:$0xff]  ;;  %v2370_v36 = vld [vmem:[#allocation2 + $0x100] sm:$0x80] }
 0x4d0   : > { %3223 = vrot.lane.b32.xlu2 %v3158_v20, %s4118_s24  ;;  %v3114_v39 = vadd.f32 %v7155_v15, %v2974_v49  ;;  %v8995_v49 = vld [vmem:[#allocation49_spill] sm:$0xff] }
 0x4d1   : > { %v3064_v60 = vpop.permute.xlu1 %3063 }
 0x4d2   : > { %3299 = vrot.lane.b32.xlu0 %v3291_v16, %s4119_s25  ;;  %v3078_v56 = vpop.permute.xlu2 %3077  ;;  %v7333_v53 = vadd.f32 %v3064_v60, %v2997_v18  ;;  %v8987_v16 = vld [vmem:[#allocation9_spill] sm:$0xff]  ;;  %v8988_v18 = vld [vmem:[#allocation43_spill] sm:$0xff] }
 0x4d3   : > { %v7335_v42 = vadd.f32 %v3078_v56, %v3004_v38  ;;  %v2662_v15 = vadd.f32 %v8987_v16, %v8986_v31  ;;  %v2837_v38 = vadd.f32 %v8988_v18, %v2636_v47  ;;  %v8990_v60 = vld [vmem:[#allocation133_spill] sm:$0xff]  ;;  %v9001_v31 = vld [vmem:[#allocation28_spill] sm:$0xff] }
 0x4d4   : > { %v3062_v52 = vpop.permute.xlu0 %3061 }
 0x4d5   : > { %v7337_v48 = vadd.f32 %v3062_v52, %v2996_v5  ;;  %v8989_v5 = vld [vmem:[#allocation26_spill] sm:$0xff]  ;;  %v2863_v56 = vadd.f32 %v7011_v43, %v2662_v15  ;;  %v2977_v0 = vadd.f32 %v7013_v8, %v2837_v38  ;;  %v8992_v52 = vld [vmem:[#allocation103_spill] sm:$0xff]  ;;  %v4101_v8 = vld [vmem:[#allocation2 + $0x110] sm:$0xff]  ;;  %v2631_v15 = vadd.f32 %v9001_v31, %v2370_v36 }
 0x4d6   : > { %v2661_v19 = vadd.f32 %v8990_v60, %v8989_v5  ;;  %v9003_v38 = vld [vmem:[#allocation53_spill] sm:$0xff] }
 0x4d7   : > { %3307 = vrot.lane.b32.xlu1 %v8981_v54, %s4119_s25  ;;  %v3003_v33 = vadd.f32 %v7165_v32, %v2863_v56  ;;  %v3117_v26 = vadd.f32 %v8994_v41, %v2977_v0  ;;  %v9005_v0 = vld [vmem:[#allocation27_spill] sm:$0xff] }
 0x4d8   : > { %3303 = vrot.lane.b32.xlu2 %v8982_v14, %s4119_s25  ;;  %v2862_v58 = vadd.f32 %v8991_v27, %v2661_v19  ;;  %v9004_v19 = vld [vmem:[#allocation40_spill] sm:$0xff]  ;;  %v2832_v27 = vadd.f32 %v9005_v0, %v2631_v15 }
 0x4d9   : > { %v3070_v63 = vpop.permute.xlu1 %3069  ;;  %v9015_v15 = vld [vmem:[#allocation108_spill] sm:$0xff] }
 0x4da   : > { %3305 = vrot.lane.b32.xlu0 %v8983_v22, %s4119_s25  ;;  %v3164_v7 = vpop.permute.xlu2 %3163  ;;  %v7358_v4 = vadd.f32 %v3070_v63, %v3000_v34  ;;  %v3002_v34 = vadd.f32 %v8996_v11, %v2862_v58  ;;  %v9006_v58 = vld [vmem:[#allocation64_spill] sm:$0xff]  ;;  %v9007_v11 = vld [vmem:[#allocation75_spill] sm:$0xff] }
 0x4db   : > { %v7360_v6 = vadd.f32 %v3164_v7, %v3114_v39  ;;  %v8998_v7 = vld [vmem:[#allocation101_spill] sm:$0xff] }
 0x4dc   : > { %v3068_v20 = vpop.permute.xlu0 %3067  ;;  %v2639_v40 = vadd.f32 %v8982_v14, %v8998_v7  ;;  %v9013_v7 = vld [vmem:[#allocation113_spill] sm:$0xff] }
 0x4dd   : > { %v7362_v9 = vadd.f32 %v3068_v20, %v2999_v29  ;;  %v8997_v29 = vld [vmem:[#allocation99_spill] sm:$0xff] }
 0x4de   : > { %v2632_v63 = vadd.f32 %v4101_v8, %v8997_v29  ;;  %v2840_v56 = vadd.f32 %v9004_v19, %v2639_v40  ;;  %v9008_v8 = vld [vmem:[#allocation77_spill] sm:$0xff]  ;;  %v9012_v29 = vld [vmem:[#allocation23_spill] sm:$0xff]  ;;  %v9014_v40 = vld [vmem:[#allocation38_spill] sm:$0xff] }
 0x4df   : > { %3313 = vrot.lane.b32.xlu1 %v8992_v52, %s4119_s25  ;;  %v9017_v19 = vld [vmem:[#allocation110_spill] sm:$0xff] }
 0x4e0   : > { %3309 = vrot.lane.b32.xlu2 %v8993_v37, %s4119_s25  ;;  %v2833_v5 = vadd.f32 %v9003_v38, %v2632_v63  ;;  %v2980_v14 = vadd.f32 %v9007_v11, %v2840_v56  ;;  %v9016_v38 = vld [vmem:[#allocation138_spill] sm:$0xff]  ;;  %v2642_v56 = vadd.f32 %v8993_v37, %v9017_v19  ;;  %v9018_v11 = vld [vmem:[#allocation111_spill] sm:$0xff]  ;;  %v9028_v19 = vld [vmem:[#allocation141_spill] sm:$0xff] }
 0x4e1   : > { %v3076_v43 = vpop.permute.xlu1 %3075 }
 0x4e2   : > { %3311 = vrot.lane.b32.xlu0 %v8995_v49, %s4119_s25  ;;  %v3170_v39 = vpop.permute.xlu2 %3169  ;;  %v7384_v47 = vadd.f32 %v3076_v43, %v3003_v33  ;;  %v2973_v41 = vadd.f32 %v9006_v58, %v2833_v5  ;;  %v2972_v33 = vadd.f32 %v9008_v8, %v2832_v27  ;;  %v9010_v43 = vld [vmem:[#allocation104_spill] sm:$0xff]  ;;  %v3120_v63 = vadd.f32 %v9012_v29, %v2980_v14 }
 0x4e3   : > { %v7386_v20 = vadd.f32 %v3170_v39, %v3117_v26  ;;  %v9009_v26 = vld [vmem:[#allocation116_spill] sm:$0xff]  ;;  %v2635_v5 = vadd.f32 %v9016_v38, %v9015_v15  ;;  %v9023_v15 = vld [vmem:[#allocation165_spill] sm:$0xff] }
 0x4e4   : > { %8999 = vst [vmem:[#allocation148_spill] sm:$0xff] %v7384_v47  ;;  %v3074_v32 = vpop.permute.xlu0 %3073  ;;  %v3112_v36 = vadd.f32 %v9014_v40, %v2972_v33  ;;  %v9021_v29 = vld [vmem:[#allocation72_spill] sm:$0xff]  ;;  %v9024_v47 = vld [vmem:[#allocation93_spill] sm:$0xff] }
 0x4e5   : > { %9000 = vst [vmem:[#allocation150_spill] sm:$0xff] %v7386_v20  ;;  %v7389_v18 = vadd.f32 %v3074_v32, %v3002_v34  ;;  %v9011_v34 = vld [vmem:[#allocation24_spill] sm:$0xff]  ;;  %v2843_v40 = vadd.f32 %v9021_v29, %v2642_v56 }
 0x4e6   : > { %v3113_v39 = vadd.f32 %v9011_v34, %v2973_v41  ;;  %v4102_v41 = vld [vmem:[#allocation2 + $0x130] sm:$0xff]  ;;  %v9020_v34 = vld [vmem:[#allocation55_spill] sm:$0xff] }
 0x4e7   : > { %9002 = vst [vmem:[#allocation156_spill] sm:$0xff] %v7389_v18  ;;  %3319 = vrot.lane.b32.xlu1 %v9009_v26, %s4119_s25  ;;  %v2634_v14 = vadd.f32 %v4102_v41, %v9018_v11  ;;  %v2836_v33 = vadd.f32 %v9020_v34, %v2635_v5  ;;  %v9022_v18 = vld [vmem:[#allocation143_spill] sm:$0xff]  ;;  %v2983_v37 = vadd.f32 %v9024_v47, %v2843_v40  ;;  %v4103_v47 = vld [vmem:[#allocation2 + $0x170] sm:$0xff]  ;;  %v9030_v11 = vld [vmem:[#allocation118_spill] sm:$0xff] }
 0x4e8   : > { %3315 = vrot.lane.b32.xlu2 %v9010_v43, %s4119_s25  ;;  %v4104_v40 = vld [vmem:[#allocation2 + $0x160] sm:$0xff] }
 0x4e9   : > { %v3162_v32 = vpop.permute.xlu1 %3161  ;;  %v2835_v20 = vadd.f32 %v9022_v18, %v2634_v14  ;;  %v2976_v38 = vadd.f32 %v9023_v15, %v2836_v33  ;;  %v3123_v5 = vadd.f32 %v9028_v19, %v2983_v37  ;;  %v9029_v18 = vld [vmem:[#allocation142_spill] sm:$0xff]  ;;  %v9031_v14 = vld [vmem:[#allocation119_spill] sm:$0xff]  ;;  %v9032_v15 = vld [vmem:[#allocation120_spill] sm:$0xff] }
 0x4ea   : > { %3317 = vrot.lane.b32.xlu0 %v9013_v7, %s4119_s25  ;;  %v3176_v31 = vpop.permute.xlu2 %3175  ;;  %v7410_v0 = vadd.f32 %v3162_v32, %v3113_v39  ;;  %v9025_v39 = vld [vmem:[#allocation172_spill] sm:$0xff]  ;;  %v9035_v19 = vld [vmem:[#allocation57_spill] sm:$0xff] }
 0x4eb   : > { %v7412_v27 = vadd.f32 %v3176_v31, %v3120_v63  ;;  %v2975_v32 = vadd.f32 %v9025_v39, %v2835_v20  ;;  %v9026_v63 = vld [vmem:[#allocation112_spill] sm:$0xff]  ;;  %v2638_v20 = vadd.f32 %v4103_v47, %v9030_v11  ;;  %v9036_v47 = vld [vmem:[#allocation173_spill] sm:$0xff] }
 0x4ec   : > { %v3160_v58 = vpop.permute.xlu0 %3159 }
 0x4ed   : > { %v7415_v8 = vadd.f32 %v3160_v58, %v3112_v36  ;;  %v9027_v36 = vld [vmem:[#allocation157_spill] sm:$0xff]  ;;  %v3115_v56 = vadd.f32 %v9029_v18, %v2975_v32  ;;  %v9034_v32 = vld [vmem:[#allocation30_spill] sm:$0xff] }
 0x4ee   : > { %v3116_v31 = vadd.f32 %v9027_v36, %v2976_v38  ;;  %v2637_v38 = vadd.f32 %v4104_v40, %v9032_v15 }
 0x4ef   : > { %9019 = vst [vmem:[#allocation175_spill] sm:$0xff] %v7415_v8  ;;  %3325 = vrot.lane.b32.xlu1 %v6695_v13, %s4119_s25  ;;  %v2645_v13 = vadd.f32 %v9010_v43, %v9031_v14  ;;  %v9037_v8 = vld [vmem:[#allocation177_spill] sm:$0xff]  ;;  %v9041_v14 = vld [vmem:[#allocation36_spill] sm:$0xff] }
 0x4f0   : > { %3321 = vrot.lane.b32.xlu2 %v9026_v63, %s4119_s25  ;;  %v2838_v18 = vadd.f32 %v9035_v19, %v2637_v38  ;;  %v9043_v38 = vld [vmem:[#allocation125_spill] sm:$0xff] }
 0x4f1   : > { %v3168_v58 = vpop.permute.xlu1 %3167  ;;  %v2846_v36 = vadd.f32 %v9034_v32, %v2645_v13  ;;  %v9044_v32 = vld [vmem:[#allocation8_spill] sm:$0xff] }
 0x4f2   : > { %3323 = vrot.lane.b32.xlu0 %v6701_v21, %s4119_s25  ;;  %v3182_v41 = vpop.permute.xlu2 %3181  ;;  %v7435_v34 = vadd.f32 %v3168_v58, %v3116_v31  ;;  %v9033_v21 = vld [vmem:[#allocation46_spill] sm:$0xff] }
 0x4f3   : > { %v7437_v33 = vadd.f32 %v3182_v41, %v3123_v5  ;;  %v2839_v39 = vadd.f32 %v9033_v21, %v2638_v20  ;;  %v2986_v43 = vadd.f32 %v9037_v8, %v2846_v36  ;;  %v9038_v31 = vld [vmem:[#allocation58_spill] sm:$0xff]  ;;  %v9039_v5 = vld [vmem:[#allocation147_spill] sm:$0xff]  ;;  %v9040_v41 = vld [vmem:[#allocation160_spill] sm:$0xff]  ;;  %v2640_v36 = vadd.f32 %v8983_v22, %v9044_v32 }
 0x4f4   : > { %v3166_v29 = vpop.permute.xlu0 %3165  ;;  %v2978_v58 = vadd.f32 %v9038_v31, %v2838_v18  ;;  %v9042_v8 = vld [vmem:[#allocation124_spill] sm:$0xff]  ;;  %v9051_v22 = vld [vmem:[#allocation17_spill] sm:$0xff] }
 0x4f5   : > { %v7440_v37 = vadd.f32 %v3166_v29, %v3115_v56  ;;  %v2979_v11 = vadd.f32 %v9036_v47, %v2839_v39  ;;  %v3126_v20 = vadd.f32 %v9040_v41, %v2986_v43  ;;  %v2641_v15 = vadd.f32 %v8981_v54, %v9042_v8  ;;  %v9046_v47 = vld [vmem:[#allocation73_spill] sm:$0xff]  ;;  %v9047_v43 = vld [vmem:[#allocation88_spill] sm:$0xff] }
 0x4f6   : > { %v3118_v13 = vadd.f32 %v9041_v14, %v2978_v58  ;;  %v2841_v31 = vadd.f32 %v9047_v43, %v2640_v36  ;;  %v9048_v54 = vld [vmem:[#allocation152_spill] sm:$0xff]  ;;  %v9052_v14 = vld [vmem:[#allocation171_spill] sm:$0xff] }
 0x4f7   : > { %3331 = vrot.lane.b32.xlu1 %v7285_v57, %s4119_s25  ;;  %v3119_v56 = vadd.f32 %v9039_v5, %v2979_v11  ;;  %v2648_v57 = vadd.f32 %v9026_v63, %v9043_v38  ;;  %v9049_v5 = vld [vmem:[#allocation166_spill] sm:$0xff]  ;;  %v9054_v38 = vld [vmem:[#allocation127_spill] sm:$0xff] }
 0x4f8   : > { %3327 = vrot.lane.b32.xlu2 %v6698_v44, %s4119_s25  ;;  %v9058_v43 = vld [vmem:[#allocation167_spill] sm:$0xff] }
 0x4f9   : > { %v3174_v29 = vpop.permute.xlu1 %3173  ;;  %v2849_v11 = vadd.f32 %v9046_v47, %v2648_v57  ;;  %v2644_v57 = vadd.f32 %v8992_v52, %v9054_v38  ;;  %v9060_v52 = vld [vmem:[#allocation16_spill] sm:$0xff]  ;;  %v9066_v38 = vld [vmem:[#allocation146_spill] sm:$0xff] }
 0x4fa   : > { %3329 = vrot.lane.b32.xlu0 %v7291_v25, %s4119_s25  ;;  %v3188_v40 = vpop.permute.xlu2 %3187  ;;  %v7461_v21 = vadd.f32 %v3174_v29, %v3119_v56  ;;  %v9045_v25 = vld [vmem:[#allocation68_spill] sm:$0xff]  ;;  %v9050_v56 = vld [vmem:[#allocation39_spill] sm:$0xff] }
 0x4fb   : > { %v7463_v44 = vadd.f32 %v3188_v40, %v3126_v20  ;;  %v2842_v18 = vadd.f32 %v9045_v25, %v2641_v15  ;;  %v2989_v63 = vadd.f32 %v9049_v5, %v2849_v11  ;;  %v2981_v41 = vadd.f32 %v9050_v56, %v2841_v31  ;;  %v9053_v29 = vld [vmem:[#allocation144_spill] sm:$0xff] }
 0x4fc   : > { %v3172_v39 = vpop.permute.xlu0 %3171 }
 0x4fd   : > { %v7467_v19 = vadd.f32 %v3172_v39, %v3118_v13  ;;  %v2982_v58 = vadd.f32 %v9048_v54, %v2842_v18  ;;  %v3129_v13 = vadd.f32 %v9052_v14, %v2989_v63  ;;  %v3121_v40 = vadd.f32 %v9053_v29, %v2981_v41  ;;  %v9056_v18 = vld [vmem:[#allocation78_spill] sm:$0xff]  ;;  %v9059_v54 = vld [vmem:[#allocation12_spill] sm:$0xff] }
 0x4fe   : > { %v2845_v47 = vadd.f32 %v9056_v18, %v2644_v57 }
 0x4ff   : > { %3337 = vrot.lane.b32.xlu1 %v6749_v35, %s4119_s25  ;;  %v3122_v20 = vadd.f32 %v9051_v22, %v2982_v58  ;;  %v9062_v22 = vld [vmem:[#allocation128_spill] sm:$0xff] }
 0x500   : > { %3333 = vrot.lane.b32.xlu2 %v7239_v3, %s4119_s25  ;;  %v9055_v3 = vld [vmem:[#allocation5_spill] sm:$0xff]  ;;  %v2985_v31 = vadd.f32 %v9058_v43, %v2845_v47 }
 0x501   : > { %v3180_v8 = vpop.permute.xlu1 %3179  ;;  %v2643_v36 = vadd.f32 %v8995_v49, %v9055_v3  ;;  %v9061_v49 = vld [vmem:[#allocation52_spill] sm:$0xff] }
 0x502   : > { %3335 = vrot.lane.b32.xlu0 %v7317_v1, %s4119_s25  ;;  %v3194_v15 = vpop.permute.xlu2 %3193  ;;  %v7486_v39 = vadd.f32 %v3180_v8, %v3122_v20  ;;  %v9057_v1 = vld [vmem:[#allocation59_spill] sm:$0xff]  ;;  %v3125_v5 = vadd.f32 %v9060_v52, %v2985_v31  ;;  %v2647_v20 = vadd.f32 %v9009_v26, %v9062_v22  ;;  %v763_v26 = vpop.f32.mrf.mxu0 }
 0x503   : > { %v7488_v35 = vadd.f32 %v3194_v15, %v3129_v13  ;;  %v2844_v11 = vadd.f32 %v9057_v1, %v2643_v36  ;;  %v9063_v13 = vld [vmem:[#allocation50_spill] sm:$0xff]  ;;  %v9065_v15 = vld [vmem:[#allocation89_spill] sm:$0xff]  ;;  %v9068_v36 = vld [vmem:[#allocation15_spill] sm:$0xff] }
 0x504   : > { %v3178_v32 = vpop.permute.xlu0 %3177 }
 0x505   : > { %v7492_v25 = vadd.f32 %v3178_v32, %v3121_v40  ;;  %v2984_v58 = vadd.f32 %v9059_v54, %v2844_v11  ;;  %v9064_v40 = vld [vmem:[#allocation131_spill] sm:$0xff]  ;;  %v9067_v32 = vld [vmem:[#allocation37_spill] sm:$0xff] }
 0x507   : > { %3343 = vrot.lane.b32.xlu1 %v6783_v30, %s4119_s25  ;;  %v3124_v63 = vadd.f32 %v9061_v49, %v2984_v58 }
 0x508   : > { %3339 = vrot.lane.b32.xlu2 %v6752_v59, %s4119_s25  ;;  %v2646_v59 = vadd.f32 %v9013_v7, %v9064_v40  ;;  %v9075_v40 = vld [vmem:[#allocation45_spill] sm:$0xff] }
 0x509   : > { %v3186_v56 = vpop.permute.xlu1 %3185 }
 0x50a   : > { %3341 = vrot.lane.b32.xlu0 %v6780_v50, %s4119_s25  ;;  %v3200_v41 = vpop.permute.xlu2 %3199  ;;  %v7508_v14 = vadd.f32 %v3186_v56, %v3125_v5  ;;  %v2848_v50 = vadd.f32 %v9065_v15, %v2647_v20  ;;  %v2847_v57 = vadd.f32 %v9066_v38, %v2646_v59  ;;  %v3294_v56 = vld [vmem:[#allocation2 + $0x360] sm:$0x7f]  ;;  %v785_v59 = vpop.f32.mrf.mxu1 }
 0x50b   : > { %v7511_v29 = vadd.f32 %v3200_v41, %v9063_v13  ;;  %v9072_v41 = vld [vmem:[#allocation44_spill] sm:$0xff]  ;;  %v9076_v15 = vld [vmem:[#allocation47_spill] sm:$0xff]  ;;  %834 = vst.msk [vmem:[#allocation2 + $0x288] sm:$0xff] %vm365_vm4, %v785_v59 }
 0x50c   : > { %v3184_v30 = vpop.permute.xlu0 %3183  ;;  %v2988_v3 = vadd.f32 %v9067_v32, %v2848_v50  ;;  %v2987_v18 = vadd.f32 %v9068_v36, %v2847_v57  ;;  %v9077_v32 = vld [vmem:[#allocation61_spill] sm:$0xff] }
 0x50d   : > { %v7515_v8 = vadd.f32 %v3184_v30, %v3124_v63  ;;  %v9074_v30 = vld [vmem:[#allocation51_spill] sm:$0xff] }
 0x50e   : > { %v3128_v47 = vadd.f32 %v7252_v2, %v2988_v3  ;;  %v3127_v7 = vadd.f32 %v7256_v10, %v2987_v18  ;;  %v9078_v3 = vld [vmem:[#allocation56_spill] sm:$0xff]  ;;  %v9079_v18 = vld [vmem:[#allocation62_spill] sm:$0xff] }
 0x50f   : > { %3349 = vrot.lane.b32.xlu1 %v8987_v16, %s4119_s25 }
 0x510   : > { %3345 = vrot.lane.b32.xlu2 %v6777_v45, %s4119_s25  ;;  %v9069_v45 = vld [vmem:[#allocation54_spill] sm:$0xff] }
 0x511   : > { %v3192_v1 = vpop.permute.xlu1 %3191 }
 0x512   : > { %3347 = vrot.lane.b32.xlu0 %v8990_v60, %s4119_s25  ;;  %v3206_v11 = vpop.permute.xlu2 %3205  ;;  %v7529_v43 = vadd.f32 %v3192_v1, %v3128_v47  ;;  %v787_v36 = vpop.f32.mrf.mxu1 }
 0x513   : > { %v7532_v31 = vadd.f32 %v3206_v11, %v7254_v12  ;;  %836 = vst.msk [vmem:[#allocation2 + $0x298] sm:$0xff] %vm365_vm4, %v787_v36  ;;  %v9082_v11 = vld [vmem:[#allocation156_spill] sm:$0xff]  ;;  %v9092_v36 = vld [vmem:[#allocation97_spill] sm:$0xff] }
 0x514   : > { %v3190_v54 = vpop.permute.xlu0 %3189 }
 0x515   : > { %v7534_v16 = vadd.f32 %v3190_v54, %v3127_v7  ;;  %v9081_v7 = vld [vmem:[#allocation150_spill] sm:$0xff] }
 0x517   : > { %3355 = vrot.lane.b32.xlu1 %v7109_v23, %s4119_s25  ;;  %v9070_v23 = vld [vmem:[#allocation48_spill] sm:$0xff] }
 0x518   : > { %3351 = vrot.lane.b32.xlu2 %v9069_v45, %s4119_s25  ;;  %v9083_v45 = vld [vmem:[#allocation91_spill] sm:$0xff] }
 0x519   : > { %v3198_v2 = vpop.permute.xlu1 %3197 }
 0x51a   : > { %3353 = vrot.lane.b32.xlu0 %v6972_v28, %s4119_s25  ;;  %v3212_v10 = vpop.permute.xlu2 %3211  ;;  %v7543_v60 = vadd.f32 %v3198_v2, %v7277_v62  ;;  %v9071_v28 = vld [vmem:[#allocation63_spill] sm:$0xff] }
 0x51b   : > { %v7546_v12 = vadd.f32 %v3212_v10, %v7279_v17  ;;  %v9084_v2 = vld [vmem:[#allocation67_spill] sm:$0xff]  ;;  %v790_v10 = vpop.f32.mrf.mxu1 }
 0x51c   : > { %v3196_v58 = vpop.permute.xlu0 %3195  ;;  %838 = vst.msk [vmem:[#allocation2 + $0x2a8] sm:$0xff] %vm365_vm4, %v790_v10 }
 0x51d   : > { %v7549_v52 = vadd.f32 %v3196_v58, %v7283_v24  ;;  %v9085_v58 = vld [vmem:[#allocation71_spill] sm:$0xff] }
 0x51f   : > { %3361 = vrot.lane.b32.xlu1 %v9070_v23, %s4119_s25 }
 0x520   : > { %3357 = vrot.lane.b32.xlu2 %v6894_v46, %s4119_s25  ;;  %v9073_v46 = vld [vmem:[#allocation25_spill] sm:$0xff] }
 0x521   : > { %v3204_v5 = vpop.permute.xlu1 %3203 }
 0x522   : > { %3359 = vrot.lane.b32.xlu0 %v9071_v28, %s4119_s25  ;;  %v3218_v49 = vpop.permute.xlu2 %3217  ;;  %v7558_v62 = vadd.f32 %v3204_v5, %v7308_v55 }
 0x523   : > { %v7561_v17 = vadd.f32 %v3218_v49, %v7310_v61 }
 0x524   : > { %v3202_v63 = vpop.permute.xlu0 %3201 }
 0x525   : > { %v7564_v24 = vadd.f32 %v3202_v63, %v7312_v51 }
 0x527   : > { %3441 = vrot.lane.b32.xlu1 %v9072_v41, %s4120_s26 }
 0x528   : > { %3363 = vrot.lane.b32.xlu2 %v3294_v56, %s4119_s25 }
 0x529   : > { %v3210_v22 = vpop.permute.xlu1 %3209 }
 0x52a   : > { %3439 = vrot.lane.b32.xlu0 %v9073_v46, %s4120_s26  ;;  %v3224_v20 = vpop.permute.xlu2 %3223  ;;  %v7572_v55 = vadd.f32 %v3210_v22, %v7333_v53  ;;  %v9086_v46 = vld [vmem:[#allocation175_spill] sm:$0xff] }
 0x52b   : > { %v7575_v61 = vadd.f32 %v3224_v20, %v7335_v42  ;;  %v9087_v20 = vld [vmem:[#allocation76_spill] sm:$0xff] }
 0x52c   : > { %v3208_v13 = vpop.permute.xlu0 %3207 }
 0x52d   : > { %v7578_v51 = vadd.f32 %v3208_v13, %v7337_v48  ;;  %v9088_v13 = vld [vmem:[#allocation69_spill] sm:$0xff] }
 0x52f   : > { %3447 = vrot.lane.b32.xlu1 %v9074_v30, %s4120_s26  ;;  %v792_v30 = vpop.f32.mrf.mxu1 }
 0x530   : > { %3443 = vrot.lane.b32.xlu2 %v9075_v40, %s4120_s26  ;;  %v9089_v40 = vld [vmem:[#allocation95_spill] sm:$0xff]  ;;  %840 = vst.msk [vmem:[#allocation2 + $0x2b8] sm:$0xff] %vm365_vm4, %v792_v30 }
 0x531   : > { %v3216_v53 = vpop.permute.xlu1 %3215 }
 0x532   : > { %3445 = vrot.lane.b32.xlu0 %v9076_v15, %s4120_s26  ;;  %v3304_v50 = vpop.permute.xlu2 %3303  ;;  %v7588_v42 = vadd.f32 %v3216_v53, %v7358_v4 }
 0x533   : > { %v7591_v48 = vadd.f32 %v3304_v50, %v7360_v6  ;;  %v9080_v6 = vld [vmem:[#allocation148_spill] sm:$0xff] }
 0x534   : > { %v3214_v38 = vpop.permute.xlu0 %3213 }
 0x535   : > { %v7594_v57 = vadd.f32 %v3214_v38, %v7362_v9  ;;  %v9090_v38 = vld [vmem:[#allocation80_spill] sm:$0xff] }
 0x537   : > { %3453 = vrot.lane.b32.xlu1 %v9077_v32, %s4120_s26  ;;  %v9091_v32 = vld [vmem:[#allocation79_spill] sm:$0xff] }
 0x538   : > { %3449 = vrot.lane.b32.xlu2 %v9078_v3, %s4120_s26  ;;  %v795_v3 = vpop.f32.mrf.mxu1 }
 0x539   : > { %v3222_v4 = vpop.permute.xlu1 %3221  ;;  %842 = vst.msk [vmem:[#allocation2 + $0x2c8] sm:$0xff] %vm365_vm4, %v795_v3 }
 0x53a   : > { %3451 = vrot.lane.b32.xlu0 %v9079_v18, %s4120_s26  ;;  %v3310_v26 = vpop.permute.xlu2 %3309  ;;  %v7604_v47 = vadd.f32 %v3222_v4, %v9080_v6  ;;  %v9093_v6 = vld [vmem:[#allocation100_spill] sm:$0xff] }
 0x53b   : > { %v7607_v9 = vadd.f32 %v3310_v26, %v9081_v7  ;;  %v9094_v7 = vld [vmem:[#allocation81_spill] sm:$0xff] }
 0x53c   : > { %v3220_v1 = vpop.permute.xlu0 %3219 }
 0x53d   : > { %v7610_v54 = vadd.f32 %v3220_v1, %v9082_v11  ;;  %v9095_v11 = vld [vmem:[#allocation82_spill] sm:$0xff] }
 0x53f   : > { %3459 = vrot.lane.b32.xlu1 %v9083_v45, %s4120_s26 }
 0x540   : > { %3455 = vrot.lane.b32.xlu2 %v9084_v2, %s4120_s26  ;;  %v797_v1 = vpop.f32.mrf.mxu1 }
 0x541   : > { %v3302_v5 = vpop.permute.xlu1 %3301  ;;  %844 = vst.msk [vmem:[#allocation2 + $0x2d8] sm:$0xff] %vm365_vm4, %v797_v1 }
 0x542   : > { %3457 = vrot.lane.b32.xlu0 %v9085_v58, %s4120_s26  ;;  %v3316_v49 = vpop.permute.xlu2 %3315  ;;  %v7620_v63 = vadd.f32 %v3302_v5, %v7410_v0  ;;  %v9096_v58 = vld [vmem:[#allocation85_spill] sm:$0xff]  ;;  %v9097_v5 = vld [vmem:[#allocation84_spill] sm:$0xff] }
 0x543   : > { %v7623_v56 = vadd.f32 %v3316_v49, %v7412_v27 }
 0x544   : > { %v3300_v41 = vpop.permute.xlu0 %3299 }
 0x545   : > { %v7626_v22 = vadd.f32 %v3300_v41, %v9086_v46  ;;  %v9098_v41 = vld [vmem:[#allocation10_spill] sm:$0xff] }
 0x547   : > { %3465 = vrot.lane.b32.xlu1 %v9087_v20, %s4120_s26 }
 0x548   : > { %3461 = vrot.lane.b32.xlu2 %v9088_v13, %s4120_s26  ;;  %v800_v49 = vpop.f32.mrf.mxu1 }
 0x549   : > { %v3308_v0 = vpop.permute.xlu1 %3307  ;;  %846 = vst.msk [vmem:[#allocation2 + $0x2e8] sm:$0xff] %vm365_vm4, %v800_v49 }
 0x54a   : > { %3463 = vrot.lane.b32.xlu0 %v9089_v40, %s4120_s26  ;;  %v3322_v59 = vpop.permute.xlu2 %3321  ;;  %v7636_v27 = vadd.f32 %v3308_v0, %v7435_v34  ;;  %v9099_v40 = vld [vmem:[#allocation139_spill] sm:$0xff] }
 0x54b   : > { %v7639_v15 = vadd.f32 %v3322_v59, %v7437_v33  ;;  %v9100_v59 = vld [vmem:[#allocation149_spill] sm:$0xff] }
 0x54c   : > { %v3306_v53 = vpop.permute.xlu0 %3305 }
 0x54d   : > { %v7642_v50 = vadd.f32 %v3306_v53, %v7440_v37 }
 0x54f   : > { %3471 = vrot.lane.b32.xlu1 %v9090_v38, %s4120_s26  ;;  %v3435_v38 = vrot.slane %v9070_v23, 1 }
 0x550   : > { %3467 = vrot.lane.b32.xlu2 %v9091_v32, %s4120_s26  ;;  %v802_v53 = vpop.f32.mrf.mxu1 }
 0x551   : > { %v3314_v34 = vpop.permute.xlu1 %3313  ;;  %848 = vst.msk [vmem:[#allocation2 + $0x2f8] sm:$0xff] %vm365_vm4, %v802_v53 }
 0x552   : > { %3469 = vrot.lane.b32.xlu0 %v9092_v36, %s4120_s26  ;;  %v3328_v18 = vpop.permute.xlu2 %3327  ;;  %v7652_v33 = vadd.f32 %v3314_v34, %v7461_v21  ;;  %v9102_v36 = vld [vmem:[#allocation174_spill] sm:$0xff] }
 0x553   : > { %v7655_v37 = vadd.f32 %v3328_v18, %v7463_v44  ;;  %v3437_v34 = vrot.slane %v9102_v36, 1 }
 0x554   : > { %v3312_v4 = vpop.permute.xlu0 %3311 }
 0x555   : > { %v7658_v26 = vadd.f32 %v3312_v4, %v7467_v19  ;;  %v3438_v4 = vsel %vm965_vm2, %v3435_v38, %v3437_v34 }
 0x557   : > { %3479 = vrot.lane.b32.xlu1 %v9093_v6, %s4120_s26  ;;  %v9103_v6 = vld [vmem:[#allocation83_spill] sm:$0xff] }
 0x558   : > { %3473 = vrot.lane.b32.xlu2 %v9094_v7, %s4120_s26 }
 0x559   : > { %v3320_v21 = vpop.permute.xlu1 %3319 }
 0x55a   : > { %3477 = vrot.lane.b32.xlu0 %v9095_v11, %s4120_s26  ;;  %v3334_v45 = vpop.permute.xlu2 %3333  ;;  %v7668_v44 = vadd.f32 %v3320_v21, %v7486_v39  ;;  %v9104_v21 = vld [vmem:[#allocation168_spill] sm:$0xff] }
 0x55b   : > { %v7671_v19 = vadd.f32 %v3334_v45, %v7488_v35  ;;  %v3433_v35 = vrot.slane %v9071_v28, 1  ;;  %v9101_v28 = vld [vmem:[#allocation145_spill] sm:$0xff]  ;;  %v9105_v45 = vld [vmem:[#allocation102_spill] sm:$0xff] }
 0x55c   : > { %v3318_v2 = vpop.permute.xlu0 %3317 }
 0x55d   : > { %v7674_v10 = vadd.f32 %v3318_v2, %v7492_v25  ;;  %v3434_v0 = vsel %vm965_vm2, %v9099_v40, %v3433_v35  ;;  %v9106_v2 = vld [vmem:[#allocation86_spill] sm:$0xff] }
 0x55f   : > { %3489 = vrot.lane.b32.xlu1 %v9096_v58, %s4120_s26 }
 0x560   : > { %3483 = vrot.lane.b32.xlu2 %v9097_v5, %s4120_s26 }
 0x561   : > { %v3326_v39 = vpop.permute.xlu1 %3325 }
 0x562   : > { %3485 = vrot.lane.b32.xlu0 %v9098_v41, %s4120_s26  ;;  %v3340_v46 = vpop.permute.xlu2 %3339  ;;  %v7685_v20 = vadd.f32 %v3326_v39, %v7508_v14  ;;  %v3436_v39 = vsel %vm965_vm2, %v3433_v35, %v3435_v38  ;;  %v3572_v35 = vld [vmem:[#allocation2 + $0x188] sm:$0xff] }
 0x563   : > { %v7688_v25 = vadd.f32 %v3340_v46, %v7511_v29 }
 0x564   : > { %v3324_v13 = vpop.permute.xlu0 %3323 }
 0x565   : > { %v7691_v30 = vadd.f32 %v3324_v13, %v7515_v8 }
 0x567   : > { %3497 = vrot.lane.b32.xlu1 %v3434_v0, %s4120_s26 }
 0x568   : > { %3491 = vrot.lane.b32.xlu2 %v9100_v59, %s4120_s26 }
 0x569   : > { %v3332_v14 = vpop.permute.xlu1 %3331 }
 0x56a   : > { %3495 = vrot.lane.b32.xlu0 %v9101_v28, %s4120_s26  ;;  %v3346_v29 = vpop.permute.xlu2 %3345  ;;  %v7703_v8 = vadd.f32 %v3332_v14, %v7529_v43  ;;  %v3638_v14 = vrot.slane %v3572_v35, 2 }
 0x56b   : > { %v7706_v32 = vadd.f32 %v3346_v29, %v7532_v31 }
 0x56c   : > { %v3330_v3 = vpop.permute.xlu0 %3329 }
 0x56d   : > { %v7710_v18 = vadd.f32 %v3330_v3, %v7534_v16  ;;  %v805_v16 = vpop.f32.mrf.mxu1 }
 0x56e   : > { %850 = vst.msk [vmem:[#allocation2 + $0x308] sm:$0xff] %vm365_vm4, %v805_v16 }
 0x56f   : > { %3475 = vrot.lane.b32.xlu1 %v9103_v6, %s4120_s26  ;;  %v7769_v6 = vld [vmem:[#allocation2 + $0x1c8] sm:$0xff] }
 0x570   : > { %3501 = vrot.lane.b32.xlu2 %v3438_v4, %s4120_s26  ;;  %v3575_v4 = vld [vmem:[#allocation2 + $0x1b8] sm:$0xff] }
 0x571   : > { %v3338_v43 = vpop.permute.xlu1 %3337 }
 0x572   : > { %3503 = vrot.lane.b32.xlu0 %v3437_v34, %s4120_s26  ;;  %v3352_v23 = vpop.permute.xlu2 %3351  ;;  %v7718_v31 = vadd.f32 %v3338_v43, %v7543_v60  ;;  %v3644_v43 = vrot.slane %v3575_v4, 2 }
 0x573   : > { %v7721_v7 = vadd.f32 %v3352_v23, %v7546_v12  ;;  %v3646_v23 = vrot.slane %v7769_v6, 2 }
 0x574   : > { %v3336_v1 = vpop.permute.xlu0 %3335 }
 0x575   : > { %v7724_v11 = vadd.f32 %v3336_v1, %v7549_v52  ;;  %v807_v49 = vpop.f32.mrf.mxu1 }
 0x576   : > { %852 = vst.msk [vmem:[#allocation2 + $0x318] sm:$0xff] %vm365_vm4, %v807_v49 }
 0x577   : > { %3493 = vrot.lane.b32.xlu1 %v9104_v21, %s4120_s26 }
 0x578   : > { %3481 = vrot.lane.b32.xlu2 %v9105_v45, %s4120_s26 }
 0x579   : > { %v3344_v60 = vpop.permute.xlu1 %3343 }
 0x57a   : > { %3487 = vrot.lane.b32.xlu0 %v9106_v2, %s4120_s26  ;;  %v3358_v58 = vpop.permute.xlu2 %3357  ;;  %v7734_v12 = vadd.f32 %v3344_v60, %v7558_v62  ;;  %v7783_v2 = vld [vmem:[#allocation2 + $0x1f8] sm:$0xff] }
 0x57b   : > { %v7737_v5 = vadd.f32 %v3358_v58, %v7561_v17  ;;  %v3647_v58 = vsel %vm1165_vm3, %v3644_v43, %v3646_v23 }
 0x57c   : > { %v3342_v52 = vpop.permute.xlu0 %3341 }
 0x57d   : > { %v7740_v41 = vadd.f32 %v3342_v52, %v7564_v24  ;;  %v810_v0 = vpop.f32.mrf.mxu1  ;;  %v7755_v24 = vld [vmem:[#allocation2 + $0x198] sm:$0xff] }
 0x57e   : > { %854 = vst.msk [vmem:[#allocation2 + $0x328] sm:$0xff] %vm365_vm4, %v810_v0  ;;  %v3640_v53 = vrot.slane %v7755_v24, 2 }
 0x580   : > { %3499 = vrot.lane.b32.xlu2 %v3436_v39, %s4120_s26  ;;  %v3571_v39 = vld [vmem:[#allocation2 + $0x178] sm:$0xfe] }
 0x581   : > { %v3350_v46 = vpop.permute.xlu1 %3349 }
 0x582   : > { %v3364_v13 = vpop.permute.xlu2 %3363  ;;  %v7746_v40 = vadd.f32 %v3350_v46, %v7572_v55  ;;  %v7792_v46 = vld [vmem:[#allocation2 + $0x1e8] sm:$0xff] }
 0x583   : > { %v7749_v62 = vadd.f32 %v3364_v13, %v7575_v61  ;;  %v3650_v0 = vrot.slane %v7792_v46, 2  ;;  %v7872_v46 = vld [vmem:[#allocation2 + $0x288] sm:$0xff] }
 0x584   : > { %v3348_v17 = vpop.permute.xlu0 %3347 }
 0x585   : > { %v7752_v59 = vadd.f32 %v3348_v17, %v7578_v51  ;;  %v812_v3 = vpop.f32.mrf.mxu1  ;;  %v3641_v51 = vsel %vm1165_vm3, %v3638_v14, %v3640_v53  ;;  %v3637_v17 = vrot.slane %v3571_v39, 2 }
 0x586   : > { %856 = vst.msk [vmem:[#allocation2 + $0x338] sm:$0xff] %vm365_vm4, %v812_v3 }
 0x589   : > { %v3356_v28 = vpop.permute.xlu1 %3355 }
 0x58a   : > { %v3444_v29 = vpop.permute.xlu2 %3443  ;;  %v7759_v55 = vadd.f32 %v3356_v28, %v7588_v42  ;;  %v7774_v42 = vld [vmem:[%s8112_s2] ss:$0 sm:$0xff] }
 0x58b   : > { %v3540_v61 = vadd.f32 %v3444_v29, %v7591_v48 }
 0x58c   : > { %v3354_v38 = vpop.permute.xlu0 %3353 }
 0x58d   : > { %v7766_v36 = vadd.f32 %v3354_v38, %v7594_v57  ;;  %v3737_v34 = vadd.f32 %v3641_v51, %v3540_v61  ;;  %v815_v60 = vpop.f32.mrf.mxu1  ;;  %v7806_v51 = vld [vmem:[#allocation2 + $0x218] sm:$0xff] }
 0x58e   : > { %858 = vst.msk [vmem:[#allocation2 + $0x348] sm:$0xff] %vm365_vm4, %v815_v60  ;;  %v3574_v60 = vld [vmem:[#allocation2 + $0x1a8] sm:$0xff] }
 0x58f   : > { %v3770_v48 = vadd.f32 %v7774_v42, %v3737_v34  ;;  %v7808_v34 = vld [vmem:[#allocation2 + $0x228] sm:$0xff] }
 0x591   : > { %v3803_v1 = vmax.f32 %v3770_v48, 0.0  ;;  %v7778_v16 = vpop.permute.xlu1 %3361  ;;  %v3639_v48 = vsel %vm1165_vm3, %v3637_v17, %v3638_v14 }
 0x592   : > { %v3450_v57 = vpop.permute.xlu2 %3449 }
 0x593   : > { %3836 = vst.msk [vmem:[%s5856_s4 + $0xa9] sm:$0xff] %vm365_vm4, %v3803_v1  ;;  %v3543_v21 = vadd.f32 %v3450_v57, %v7607_v9  ;;  %v3652_v9 = vrot.slane %v7783_v2, 2 }
 0x594   : > { %v3360_v45 = vpop.permute.xlu0 %3359 }
 0x595   : > { %v7789_v52 = vadd.f32 %v3360_v45, %v7610_v54  ;;  %v3740_v49 = vadd.f32 %v3647_v58, %v3543_v21  ;;  %v3653_v54 = vsel %vm1165_vm3, %v3650_v0, %v3652_v9  ;;  %v817_v4 = vpop.f32.mrf.mxu1 }
 0x596   : > { %860 = vst.msk [vmem:[#allocation2 + $0x358] sm:$0xff] %vm365_vm4, %v817_v4 }
 0x597   : > { %v3773_v13 = vadd.f32 %v7774_v42, %v3740_v49 }
 0x599   : > { %v3806_v35 = vmax.f32 %v3773_v13, 0.0  ;;  %v3442_v28 = vpop.permute.xlu1 %3441  ;;  %v3642_v13 = vrot.slane %v3574_v60, 2  ;;  %v7837_v60 = vld [vmem:[#allocation2 + $0x248] sm:$0xff] }
 0x59a   : > { %v3456_v29 = vpop.permute.xlu2 %3455  ;;  %v3539_v61 = vadd.f32 %v3442_v28, %v7620_v63  ;;  %v3656_v63 = vrot.slane %v7806_v51, 2  ;;  %v7902_v51 = vld [vmem:[#allocation2 + $0x2d8] sm:$0xff] }
 0x59b   : > { %3839 = vst.msk [vmem:[%s5856_s4 + $0xc1] sm:$0xff] %vm365_vm4, %v3806_v35  ;;  %v3546_v38 = vadd.f32 %v3456_v29, %v7623_v56  ;;  %v3658_v56 = vrot.slane %v7808_v34, 2  ;;  %v3645_v4 = vsel %vm1165_vm3, %v3642_v13, %v3644_v43  ;;  %v3680_v2 = vrot.slane %v7902_v51, 2 }
 0x59c   : > { %v3440_v3 = vpop.permute.xlu0 %3439  ;;  %v3736_v57 = vadd.f32 %v3639_v48, %v3539_v61 }
 0x59d   : > { %v3538_v1 = vadd.f32 %v3440_v3, %v7626_v22  ;;  %v3743_v21 = vadd.f32 %v3653_v54, %v3546_v38  ;;  %v9107_v3 = vmov 0.0  }
 0x59e   : > { %v3769_v58 = vadd.f32 %v7774_v42, %v3736_v57 }
 0x59f   : > { %v3735_v45 = vadd.f32 %v3637_v17, %v3538_v1  ;;  %v3776_v49 = vadd.f32 %v7774_v42, %v3743_v21  ;;  %v3659_v17 = vsel %vm1165_vm3, %v3656_v63, %v3658_v56  ;;  %v820_v1 = vpop.f32.mrf.mxu1 }
 0x5a0   : > { %v3802_v22 = vmax.f32 %v3769_v58, 0.0  ;;  %862 = vst.msk [vmem:[#allocation2 + $0x368] sm:$0xff] %vm365_vm4, %v820_v1  ;;  %v7870_v1 = vld [vmem:[#allocation2 + $0x278] sm:$0xff] }
 0x5a1   : > { %v3768_v14 = vadd.f32 %v7774_v42, %v3735_v45  ;;  %v3809_v39 = vmax.f32 %v3776_v49, 0.0  ;;  %v3448_v28 = vpop.permute.xlu1 %3447  ;;  %v3643_v45 = vsel %vm1165_vm3, %v3640_v53, %v3642_v13  ;;  %v3662_v53 = vrot.slane %v7837_v60, 2 }
 0x5a2   : > { %v3462_v54 = vpop.permute.xlu2 %3461  ;;  %3835 = vst.msk [vmem:[%s5856_s4 + $0xa1] sm:$0xff] %vm365_vm4, %v3802_v22  ;;  %v3542_v29 = vadd.f32 %v3448_v28, %v7636_v27  ;;  %v3577_v27 = vld [vmem:[#allocation2 + $0x1d8] sm:$0xff]  ;;  %v3668_v6 = vrot.slane %v7870_v1, 2 }
 0x5a3   : > { %v3801_v35 = vmax.f32 %v3768_v14, 0.0  ;;  %v3549_v61 = vadd.f32 %v3462_v54, %v7639_v15  ;;  %3880 = vst.msk [vmem:[%s5856_s4 + $0xa8] sm:$0xff] %vm365_vm4, %v9107_v3  ;;  %v7839_v15 = vld [vmem:[#allocation2 + $0x258] sm:$0xff]  ;;  %v3648_v49 = vrot.slane %v3577_v27, 2 }
 0x5a4   : > { %v3446_v38 = vpop.permute.xlu0 %3445  ;;  %3842 = vst.msk [vmem:[%s5856_s4 + $0xd9] sm:$0xff] %vm365_vm4, %v3809_v39  ;;  %v3739_v57 = vadd.f32 %v3645_v4, %v3542_v29  ;;  %v3664_v14 = vrot.slane %v7839_v15, 2  ;;  %v3591_v1 = vld [vmem:[#allocation2 + $0x2b8] sm:$0xff] }
 0x5a5   : > { %v3541_v48 = vadd.f32 %v3446_v38, %v7642_v50  ;;  %v3746_v21 = vadd.f32 %v3659_v17, %v3549_v61  ;;  %3834 = vst.msk [vmem:[%s5856_s4 + $0x99] sm:$0x80] %vm2335_vm5, %v3801_v35  ;;  %v3651_v61 = vsel %vm1165_vm3, %v3648_v49, %v3650_v0 }
 0x5a6   : > { %v3772_v50 = vadd.f32 %v7774_v42, %v3739_v57  ;;  %v3665_v38 = vsel %vm1165_vm3, %v3662_v53, %v3664_v14  ;;  %v3580_v57 = vld [vmem:[#allocation2 + $0x208] sm:$0xff] }
 0x5a7   : > { %v3738_v43 = vadd.f32 %v3643_v45, %v3541_v48  ;;  %v3779_v58 = vadd.f32 %v7774_v42, %v3746_v21  ;;  %v3649_v48 = vsel %vm1165_vm3, %v3646_v23, %v3648_v49  ;;  %v3670_v23 = vrot.slane %v7872_v46, 2 }
 0x5a8   : > { %v3805_v22 = vmax.f32 %v3772_v50, 0.0  ;;  %v3654_v50 = vrot.slane %v3580_v57, 2 }
 0x5a9   : > { %v3771_v24 = vadd.f32 %v7774_v42, %v3738_v43  ;;  %v3812_v39 = vmax.f32 %v3779_v58, 0.0  ;;  %v3454_v35 = vpop.permute.xlu1 %3453 }
 0x5aa   : > { %v3468_v28 = vpop.permute.xlu2 %3467  ;;  %3838 = vst.msk [vmem:[%s5856_s4 + $0xb9] sm:$0xff] %vm365_vm4, %v3805_v22  ;;  %v3545_v17 = vadd.f32 %v3454_v35, %v7652_v33  ;;  %v3657_v35 = vsel %vm1165_vm3, %v3654_v50, %v3656_v63 }
 0x5ab   : > { %v3804_v13 = vmax.f32 %v3771_v24, 0.0  ;;  %v3552_v54 = vadd.f32 %v3468_v28, %v7655_v37  ;;  %3881 = vst.msk [vmem:[%s5856_s4 + $0xc0] sm:$0xff] %vm365_vm4, %v9107_v3  ;;  %v3671_v28 = vsel %vm1165_vm3, %v3668_v6, %v3670_v23 }
 0x5ac   : > { %v3452_v29 = vpop.permute.xlu0 %3451  ;;  %3845 = vst.msk [vmem:[%s5856_s4 + $0xf1] sm:$0xff] %vm365_vm4, %v3812_v39  ;;  %v3742_v33 = vadd.f32 %v3651_v61, %v3545_v17 }
 0x5ad   : > { %v3544_v4 = vadd.f32 %v3452_v29, %v7658_v26  ;;  %v3749_v37 = vadd.f32 %v3665_v38, %v3552_v54  ;;  %3837 = vst.msk [vmem:[%s5856_s4 + $0xb1] sm:$0xff] %vm365_vm4, %v3804_v13  ;;  %v3655_v54 = vsel %vm1165_vm3, %v3652_v9, %v3654_v50  ;;  %v3583_v29 = vld [vmem:[#allocation2 + $0x238] sm:$0xff] }
 0x5ae   : > { %v3775_v26 = vadd.f32 %v7774_v42, %v3742_v33  ;;  %v3660_v33 = vrot.slane %v3583_v29, 2 }
 0x5af   : > { %v3741_v0 = vadd.f32 %v3649_v48, %v3544_v4  ;;  %v3782_v21 = vadd.f32 %v7774_v42, %v3749_v37 }
 0x5b0   : > { %v3808_v27 = vmax.f32 %v3775_v26, 0.0  ;;  %v3663_v50 = vsel %vm1165_vm3, %v3660_v33, %v3662_v53  ;;  %v3586_v53 = vld [vmem:[#allocation2 + $0x268] sm:$0xff] }
 0x5b1   : > { %v3774_v45 = vadd.f32 %v7774_v42, %v3741_v0  ;;  %v3815_v43 = vmax.f32 %v3782_v21, 0.0  ;;  %v3460_v24 = vpop.permute.xlu1 %3459 }
 0x5b2   : > { %v3474_v49 = vpop.permute.xlu2 %3473  ;;  %3841 = vst.msk [vmem:[%s5856_s4 + $0xd1] sm:$0xff] %vm365_vm4, %v3808_v27  ;;  %v3548_v22 = vadd.f32 %v3460_v24, %v7668_v44  ;;  %v3661_v27 = vsel %vm1165_vm3, %v3658_v56, %v3660_v33  ;;  %v7934_v24 = vld [vmem:[#allocation2 + $0x318] sm:$0xff]  ;;  %v7952_v33 = vld [vmem:[#allocation2 + $0x368] sm:$0xff] }
 0x5b3   : > { %v3807_v58 = vmax.f32 %v3774_v45, 0.0  ;;  %v3555_v39 = vadd.f32 %v3474_v49, %v7671_v19  ;;  %3882 = vst.msk [vmem:[%s5856_s4 + $0xd8] sm:$0xff] %vm365_vm4, %v9107_v3 }
 0x5b4   : > { %v3458_v13 = vpop.permute.xlu0 %3457  ;;  %3848 = vst.msk [vmem:[%s5856_s4 + $0x109] sm:$0xff] %vm365_vm4, %v3815_v43  ;;  %v3745_v44 = vadd.f32 %v3657_v35, %v3548_v22 }
 0x5b5   : > { %v3547_v17 = vadd.f32 %v3458_v13, %v7674_v10  ;;  %v3752_v19 = vadd.f32 %v3671_v28, %v3555_v39  ;;  %3840 = vst.msk [vmem:[%s5856_s4 + $0xc9] sm:$0xff] %vm365_vm4, %v3807_v58  ;;  %v7908_v10 = vld [vmem:[#allocation2 + $0x2c8] sm:$0xff]  ;;  %v822_v58 = vpop.f32.mrf.mxu1  ;;  %v3688_v13 = vrot.slane %v7934_v24, 2 }
 0x5b6   : > { %v3778_v61 = vadd.f32 %v7774_v42, %v3745_v44  ;;  %v3678_v57 = vrot.slane %v7908_v10, 2  ;;  %v7940_v39 = vld [vmem:[#allocation2 + $0x308] sm:$0xff]  ;;  %864 = vst.msk [vmem:[#allocation2 + $0x378] sm:$0xff] %vm365_vm4, %v822_v58 }
 0x5b7   : > { %v3744_v63 = vadd.f32 %v3655_v54, %v3547_v17  ;;  %v3785_v38 = vadd.f32 %v7774_v42, %v3752_v19  ;;  %v3666_v17 = vrot.slane %v3586_v53, 2  ;;  %v3686_v54 = vrot.slane %v7940_v39, 2  ;;  %v3599_v39 = vld [vmem:[#allocation2 + $0x338] sm:$0xff] }
 0x5b8   : > { %v3811_v9 = vmax.f32 %v3778_v61, 0.0 }
 0x5b9   : > { %v3777_v4 = vadd.f32 %v7774_v42, %v3744_v63  ;;  %v3818_v37 = vmax.f32 %v3785_v38, 0.0  ;;  %v3466_v0 = vpop.permute.xlu1 %3465 }
 0x5ba   : > { %v3484_v26 = vpop.permute.xlu2 %3483  ;;  %3844 = vst.msk [vmem:[%s5856_s4 + $0xe9] sm:$0xff] %vm365_vm4, %v3811_v9  ;;  %v3551_v21 = vadd.f32 %v3466_v0, %v7685_v20  ;;  %v3681_v20 = vsel %vm1165_vm3, %v3678_v57, %v3680_v2  ;;  %v3669_v9 = vsel %vm1165_vm3, %v3666_v17, %v3668_v6  ;;  %v3667_v0 = vsel %vm1165_vm3, %v3664_v14, %v3666_v17 }
 0x5bb   : > { %v3810_v48 = vmax.f32 %v3777_v4, 0.0  ;;  %v3560_v45 = vadd.f32 %v3484_v26, %v7734_v12  ;;  %3883 = vst.msk [vmem:[%s5856_s4 + $0xf0] sm:$0xff] %vm365_vm4, %v9107_v3  ;;  %v7950_v4 = vld [vmem:[#allocation2 + $0x358] sm:$0xff]  ;;  %v3590_v26 = vld [vmem:[#allocation2 + $0x2a8] sm:$0xff] }
 0x5bc   : > { %v3464_v43 = vpop.permute.xlu0 %3463  ;;  %3851 = vst.msk [vmem:[%s5856_s4 + $0x121] sm:$0xff] %vm365_vm4, %v3818_v37  ;;  %v3748_v34 = vadd.f32 %v3663_v50, %v3551_v21  ;;  %v3696_v21 = vrot.slane %v7950_v4, 2  ;;  %v3674_v14 = vrot.slane %v3590_v26, 2  ;;  %v3676_v50 = vrot.slane %v3591_v1, 2 }
 0x5bd   : > { %v3550_v12 = vadd.f32 %v3464_v43, %v7691_v30  ;;  %v3757_v56 = vadd.f32 %v3681_v20, %v3560_v45  ;;  %3843 = vst.msk [vmem:[%s5856_s4 + $0xe1] sm:$0xff] %vm365_vm4, %v3810_v48  ;;  %v3698_v45 = vrot.slane %v7952_v33, 2  ;;  %v3429_v20 = vadd.f32 %v7778_v16, %v7604_v47 }
 0x5be   : > { %v3781_v49 = vadd.f32 %v7774_v42, %v3748_v34  ;;  %v3677_v16 = vsel %vm1165_vm3, %v3674_v14, %v3676_v50 }
 0x5bf   : > { %v3747_v60 = vadd.f32 %v3661_v27, %v3550_v12  ;;  %v3790_v22 = vadd.f32 %v7774_v42, %v3757_v56  ;;  %v7975_v27 = vld [vmem:[#allocation2 + $0x298] sm:$0xff]  ;;  %v3699_v53 = vsel %vm1165_vm3, %v3696_v21, %v3698_v45 }
 0x5c0   : > { %v3814_v35 = vmax.f32 %v3781_v49, 0.0  ;;  %v3672_v34 = vrot.slane %v7975_v27, 2 }
 0x5c1   : > { %v3780_v30 = vadd.f32 %v7774_v42, %v3747_v60  ;;  %v3823_v28 = vmax.f32 %v3790_v22, 0.0  ;;  %v3472_v19 = vpop.permute.xlu1 %3471 }
 0x5c2   : > { %v3492_v29 = vpop.permute.xlu2 %3491  ;;  %3847 = vst.msk [vmem:[%s5856_s4 + $0x101] sm:$0xff] %vm365_vm4, %v3814_v35  ;;  %v3554_v63 = vadd.f32 %v3472_v19, %v7703_v8  ;;  %v3689_v8 = vsel %vm1165_vm3, %v3686_v54, %v3688_v13  ;;  %v8001_v19 = vld [vmem:[#allocation2 + $0x2f8] sm:$0xff] }
 0x5c3   : > { %v3813_v44 = vmax.f32 %v3780_v30, 0.0  ;;  %v3564_v61 = vadd.f32 %v3492_v29, %v7721_v7  ;;  %3884 = vst.msk [vmem:[%s5856_s4 + $0x108] sm:$0xff] %vm365_vm4, %v9107_v3  ;;  %v8005_v29 = vld [vmem:[#allocation2 + $0x2e8] sm:$0xff] }
 0x5c4   : > { %v3470_v38 = vpop.permute.xlu0 %3469  ;;  %3856 = vst.msk [vmem:[%s5856_s4 + $0x149] sm:$0xff] %vm365_vm4, %v3823_v28  ;;  %v3751_v37 = vadd.f32 %v3669_v9, %v3554_v63 }
 0x5c5   : > { %v3553_v7 = vadd.f32 %v3470_v38, %v7710_v18  ;;  %v3761_v48 = vadd.f32 %v3689_v8, %v3564_v61  ;;  %3846 = vst.msk [vmem:[%s5856_s4 + $0xf9] sm:$0xff] %vm365_vm4, %v3813_v44  ;;  %v3675_v44 = vsel %vm1165_vm3, %v3672_v34, %v3674_v14  ;;  %v3684_v38 = vrot.slane %v8001_v19, 2 }
 0x5c6   : > { %v3784_v18 = vadd.f32 %v7774_v42, %v3751_v37 }
 0x5c7   : > { %v3750_v6 = vadd.f32 %v3667_v0, %v3553_v7  ;;  %v3794_v43 = vadd.f32 %v7774_v42, %v3761_v48  ;;  %v3682_v7 = vrot.slane %v8005_v29, 2 }
 0x5c8   : > { %v3817_v12 = vmax.f32 %v3784_v18, 0.0  ;;  %v3687_v18 = vsel %vm1165_vm3, %v3684_v38, %v3686_v54 }
 0x5c9   : > { %v3783_v15 = vadd.f32 %v7774_v42, %v3750_v6  ;;  %v3827_v58 = vmax.f32 %v3794_v43, 0.0  ;;  %v3480_v60 = vpop.permute.xlu1 %3479  ;;  %v3679_v43 = vsel %vm1165_vm3, %v3676_v50, %v3678_v57  ;;  %v3692_v50 = vrot.slane %v3599_v39, 2 }
 0x5ca   : > { %v3502_v49 = vpop.permute.xlu2 %3501  ;;  %3850 = vst.msk [vmem:[%s5856_s4 + $0x119] sm:$0xff] %vm365_vm4, %v3817_v12  ;;  %v3558_v22 = vadd.f32 %v3480_v60, %v7688_v25 }
 0x5cb   : > { %v3816_v56 = vmax.f32 %v3783_v15, 0.0  ;;  %v3569_v30 = vadd.f32 %v3502_v49, %v3429_v20  ;;  %3885 = vst.msk [vmem:[%s5856_s4 + $0x120] sm:$0xff] %vm365_vm4, %v9107_v3  ;;  %v3600_v20 = vld [vmem:[#allocation2 + $0x348] sm:$0xff] }
 0x5cc   : > { %v3478_v47 = vpop.permute.xlu0 %3477  ;;  %3860 = vst.msk [vmem:[%s5856_s4 + $0x169] sm:$0xff] %vm365_vm4, %v3827_v58  ;;  %v3755_v28 = vadd.f32 %v3677_v16, %v3558_v22  ;;  %v3694_v12 = vrot.slane %v3600_v20, 2  ;;  %v3598_v58 = vld [vmem:[#allocation2 + $0x328] sm:$0xff] }
 0x5cd   : > { %v3557_v35 = vadd.f32 %v3478_v47, %v7718_v31  ;;  %v3766_v17 = vadd.f32 %v3699_v53, %v3569_v30  ;;  %3849 = vst.msk [vmem:[%s5856_s4 + $0x111] sm:$0xff] %vm365_vm4, %v3816_v56  ;;  %v3690_v30 = vrot.slane %v3598_v58, 2 }
 0x5ce   : > { %v3788_v63 = vadd.f32 %v7774_v42, %v3755_v28  ;;  %v3695_v16 = vsel %vm1165_vm3, %v3692_v50, %v3694_v12 }
 0x5cf   : > { %v3754_v25 = vadd.f32 %v3675_v44, %v3557_v35  ;;  %v3799_v31 = vadd.f32 %v7774_v42, %v3766_v17  ;;  %v3697_v35 = vsel %vm1165_vm3, %v3694_v12, %v3696_v21  ;;  %v3603_v17 = vld [vmem:[#allocation2 + $0x378] sm:$0x1] }
 0x5d0   : > { %v3821_v9 = vmax.f32 %v3788_v63, 0.0  ;;  %v3700_v21 = vrot.slane %v3603_v17, 2 }
 0x5d1   : > { %v3787_v61 = vadd.f32 %v7774_v42, %v3754_v25  ;;  %v3832_v8 = vmax.f32 %v3799_v31, 0.0  ;;  %v3490_v48 = vpop.permute.xlu1 %3489 }
 0x5d2   : > { %v3482_v0 = vpop.permute.xlu2 %3481  ;;  %3854 = vst.msk [vmem:[%s5856_s4 + $0x139] sm:$0xff] %vm365_vm4, %v3821_v9  ;;  %v3563_v26 = vadd.f32 %v3490_v48, %v7746_v40  ;;  %v3701_v48 = vsel %vm1165_vm3, %v3698_v45, %v3700_v21 }
 0x5d3   : > { %v3820_v37 = vmax.f32 %v3787_v61, 0.0  ;;  %v3559_v1 = vadd.f32 %v3482_v0, %v7740_v41  ;;  %3865 = vst.msk [vmem:[%s5856_s4 + $0x191] sm:$0xff] %vm365_vm4, %v3832_v8  ;;  %v3683_v41 = vsel %vm1165_vm3, %v3680_v2, %v3682_v7 }
 0x5d4   : > { %v3486_v6 = vpop.permute.xlu0 %3485  ;;  %v3760_v40 = vadd.f32 %v3687_v18, %v3563_v26  ;;  %v3673_v26 = vsel %vm1165_vm3, %v3670_v23, %v3672_v34  ;;  %v3691_v34 = vsel %vm1165_vm3, %v3688_v13, %v3690_v30 }
 0x5d5   : > { %v3561_v15 = vadd.f32 %v3486_v6, %v7706_v32  ;;  %3853 = vst.msk [vmem:[%s5856_s4 + $0x131] sm:$0xff] %vm365_vm4, %v3820_v37  ;;  %v3756_v14 = vadd.f32 %v3679_v43, %v3559_v1 }
 0x5d6   : > { %3886 = vst.msk [vmem:[%s5856_s4 + $0x138] sm:$0xff] %vm365_vm4, %v9107_v3  ;;  %v3793_v57 = vadd.f32 %v7774_v42, %v3760_v40  ;;  %v3685_v40 = vsel %vm1165_vm3, %v3682_v7, %v3684_v38 }
 0x5d7   : > { %v3758_v10 = vadd.f32 %v3683_v41, %v3561_v15  ;;  %v3789_v32 = vadd.f32 %v7774_v42, %v3756_v14 }
 0x5d8   : > { %v3826_v51 = vmax.f32 %v3793_v57, 0.0 }
 0x5d9   : > { %v3791_v54 = vadd.f32 %v7774_v42, %v3758_v10  ;;  %v3822_v2 = vmax.f32 %v3789_v32, 0.0  ;;  %v3498_v60 = vpop.permute.xlu1 %3497 }
 0x5da   : > { %v3500_v53 = vpop.permute.xlu2 %3499  ;;  %3859 = vst.msk [vmem:[%s5856_s4 + $0x161] sm:$0xff] %vm365_vm4, %v3826_v51  ;;  %v3567_v49 = vadd.f32 %v3498_v60, %v7737_v5 }
 0x5db   : > { %v3824_v56 = vmax.f32 %v3791_v54, 0.0  ;;  %v3568_v22 = vadd.f32 %v3500_v53, %v7789_v52  ;;  %3888 = vst.msk [vmem:[%s5856_s4 + $0x168] sm:$0xff] %vm365_vm4, %v9107_v3  ;;  %v3693_v52 = vsel %vm1165_vm3, %v3690_v30, %v3692_v50 }
 0x5dc   : > { %v3496_v47 = vpop.permute.xlu0 %3495  ;;  %3855 = vst.msk [vmem:[%s5856_s4 + $0x141] sm:$0xff] %vm365_vm4, %v3822_v2  ;;  %v3764_v5 = vadd.f32 %v3695_v16, %v3567_v49 }
 0x5dd   : > { %v3566_v28 = vadd.f32 %v3496_v47, %v7759_v55  ;;  %v3765_v44 = vadd.f32 %v3697_v35, %v3568_v22  ;;  %3857 = vst.msk [vmem:[%s5856_s4 + $0x151] sm:$0xff] %vm365_vm4, %v3824_v56 }
 0x5de   : > { %3887 = vst.msk [vmem:[%s5856_s4 + $0x150] sm:$0xff] %vm365_vm4, %v9107_v3  ;;  %v3797_v4 = vadd.f32 %v7774_v42, %v3764_v5 }
 0x5df   : > { %v3763_v25 = vadd.f32 %v3693_v52, %v3566_v28  ;;  %v3798_v55 = vadd.f32 %v7774_v42, %v3765_v44 }
 0x5e0   : > { %v3830_v31 = vmax.f32 %v3797_v4, 0.0 }
 0x5e1   : > { %v3796_v63 = vadd.f32 %v7774_v42, %v3763_v25  ;;  %v3831_v61 = vmax.f32 %v3798_v55, 0.0  ;;  %v3476_v8 = vpop.permute.xlu1 %3475 }
 0x5e2   : > { %3863 = vst.msk [vmem:[%s5856_s4 + $0x181] sm:$0xff] %vm365_vm4, %v3830_v31  ;;  %v3556_v37 = vadd.f32 %v3476_v8, %v7724_v11 }
 0x5e3   : > { %v3829_v9 = vmax.f32 %v3796_v63, 0.0  ;;  %3864 = vst.msk [vmem:[%s5856_s4 + $0x189] sm:$0xff] %vm365_vm4, %v3831_v61 }
 0x5e4   : > { %v3504_v0 = vpop.permute.xlu0 %3503  ;;  %v3753_v11 = vadd.f32 %v3673_v26, %v3556_v37 }
 0x5e5   : > { %v3570_v1 = vadd.f32 %v3504_v0, %v7749_v62  ;;  %3862 = vst.msk [vmem:[%s5856_s4 + $0x179] sm:$0xff] %vm365_vm4, %v3829_v9 }
 0x5e6   : > { %3889 = vst.msk [vmem:[%s5856_s4 + $0x180] sm:$0xff] %vm365_vm4, %v9107_v3  ;;  %v3786_v45 = vadd.f32 %v7774_v42, %v3753_v11 }
 0x5e7   : > { %v3767_v33 = vadd.f32 %v3701_v48, %v3570_v1 }
 0x5e8   : > { %v3819_v18 = vmax.f32 %v3786_v45, 0.0 }
 0x5e9   : > { %v3800_v6 = vadd.f32 %v7774_v42, %v3767_v33  ;;  %v3494_v46 = vpop.permute.xlu1 %3493 }
 0x5ea   : > { %3852 = vst.msk [vmem:[%s5856_s4 + $0x129] sm:$0xff] %vm365_vm4, %v3819_v18  ;;  %v3565_v62 = vadd.f32 %v3494_v46, %v7766_v36 }
 0x5eb   : > { %v3833_v27 = vmax.f32 %v3800_v6, 0.0 }
 0x5ec   : > { %v3488_v23 = vpop.permute.xlu0 %3487  ;;  %v3762_v15 = vadd.f32 %v3691_v34, %v3565_v62 }
 0x5ed   : > { %3866 = vst.msk [vmem:[%s5856_s4 + $0x199] sm:$0x7f] %vm2368_vm6, %v3833_v27  ;;  %v3562_v43 = vadd.f32 %v3488_v23, %v7752_v59 }
 0x5ee   : > { %3890 = vst.msk [vmem:[%s5856_s4 + $0x198] sm:$0xff] %vm365_vm4, %v9107_v3  ;;  %v3795_v14 = vadd.f32 %v7774_v42, %v3762_v15 }
 0x5ef   : > { %v3759_v36 = vadd.f32 %v3685_v40, %v3562_v43 }
 0x5f0   : > { %v3828_v24 = vmax.f32 %v3795_v14, 0.0 }
 0x5f1   : > { %v3792_v41 = vadd.f32 %v7774_v42, %v3759_v36 }
 0x5f2   : > { %3861 = vst.msk [vmem:[%s5856_s4 + $0x171] sm:$0xff] %vm365_vm4, %v3828_v24 }
 0x5f3   : > { %v3825_v39 = vmax.f32 %v3792_v41, 0.0 }
 0x5f5   : > { %3858 = vst.msk [vmem:[%s5856_s4 + $0x159] sm:$0xff] %vm365_vm4, %v3825_v39 }
 0x5f6 PF: > { %s13_s12 = sadd.s32 1, %s4112_s12  }
 0x5f7   : > { %p10_p4 = scmp.ge.s32.totalorder %s13_s12, 4  }
 0x5f9   :  { %12 = sbr.rel (!%p10_p4) target bundleno = 1 (0x1), region = 62 }

</bundles_post_ra>
